<compile_context>
chip_gen: v7x
topology: tpu7x:2x2x1
jax: 0.10.0
libtpu: 0.0.40
codegen_flags: <defaults>
</compile_context>

<pallas_src>
import functools
import math

import jax
import jax.numpy as jnp
from jax.experimental import pallas as pl
from jax.experimental.pallas import tpu as pltpu


# Flipped to False (once) if this JAX build rejects pipeline_mode=pl.Buffered(1).
_BUFFERED_WEIGHTS_SUPPORTED = [True]

# Packed-parameter row indices (one f32 row each, padded to a common lane width).
_ROW_BQKV, _ROW_BO, _ROW_B1, _ROW_B2 = 0, 1, 2, 3
_ROW_LN1W, _ROW_LN1B, _ROW_LN2W, _ROW_LN2B = 4, 5, 6, 7
_ROW_FNW, _ROW_FNB = 8, 9
_NUM_PARAM_ROWS = 10


def _round_up(n, m):
    return ((n + m - 1) // m) * m


def _layernorm(x, gamma, beta, eps=1e-5):
    # x: (S, E) f32; gamma/beta: (E,). PyTorch LayerNorm (biased variance).
    mean = jnp.mean(x, axis=-1, keepdims=True)
    xc = x - mean
    var = jnp.mean(xc * xc, axis=-1, keepdims=True)
    inv = jax.lax.rsqrt(var + eps)
    return xc * inv * gamma + beta


def encoder_layer_kernel(x_ref, wqkv_ref, wo_ref, w1_ref, w2_ref, pvec_ref,
                         out_ref, ctx_ref, *, nhead, apply_final_norm):
    E = wo_ref.shape[0]
    S = x_ref.shape[1]
    dff = w1_ref.shape[1]
    D = E // nhead

    x_in = x_ref[0]                              # (S, E), f32 or bf16 (inter-layer)
    x = x_in.astype(jnp.float32)                 # residual / LayerNorm path in f32
    xb = x_in.astype(jnp.bfloat16)               # MXU operand

    pv = pvec_ref[...]                           # (10, W) f32 packed small params
    bqkv = pv[_ROW_BQKV, :3 * E]
    bo = pv[_ROW_BO, :E]
    b1 = pv[_ROW_B1, :dff]
    b2 = pv[_ROW_B2, :E]
    ln1w, ln1b = pv[_ROW_LN1W, :E], pv[_ROW_LN1B, :E]
    ln2w, ln2b = pv[_ROW_LN2W, :E], pv[_ROW_LN2B, :E]

    # ---- self-attention: fused QKV projection (bf16 MXU, f32 accumulate) ----
    # 1/sqrt(head_dim) is folded into the Q columns of wqkv AND the Q bias.
    qkv = jnp.dot(xb, wqkv_ref[...],
                  preferred_element_type=jnp.float32) + bqkv     # (S, 3E) f32

    # Per-head attention; each head's context is written into a bf16 (S, E) VMEM
    # scratch at its column block — the concat never touches HBM, and the output
    # projection below runs as a single full-depth (K=E) MXU matmul.
    for h in range(nhead):                       # static unroll (see TODO above)
        qh = qkv[:, h * D:(h + 1) * D].astype(jnp.bfloat16)            # (S, D)
        kh = qkv[:, E + h * D:E + (h + 1) * D].astype(jnp.bfloat16)
        vh = qkv[:, 2 * E + h * D:2 * E + (h + 1) * D].astype(jnp.bfloat16)
        # scores = qh @ kh^T without explicit transpose
        s = jax.lax.dot_general(qh, kh, (((1,), (1,)), ((), ())),
                                preferred_element_type=jnp.float32)    # (S, S) f32
        s = s - jnp.max(s, axis=-1, keepdims=True)
        p = jnp.exp(s)
        denom = jnp.sum(p, axis=-1, keepdims=True)                     # (S, 1) f32
        ctx = jnp.dot(p.astype(jnp.bfloat16), vh,
                      preferred_element_type=jnp.float32)              # (S, D) f32
        # Deferred softmax normalization: scale (S,D) ctx, not the (S,S) probs.
        ctx = ctx * pl.reciprocal(denom, approx=True)
        ctx_ref[:, h * D:(h + 1) * D] = ctx.astype(jnp.bfloat16)

    # Single full-depth output projection over the VMEM-resident concat.
    attn = jnp.dot(ctx_ref[...], wo_ref[...],
                   preferred_element_type=jnp.float32) + bo            # (S, E) f32

    # ---- add & norm 1 (post-norm, f32) ----
    y = _layernorm(x + attn, ln1w, ln1b)

    # ---- feed-forward (ReLU), bf16 matmuls + f32 accumulate ----
    ff = jnp.dot(y.astype(jnp.bfloat16), w1_ref[...],
                 preferred_element_type=jnp.float32) + b1
    ff = jnp.maximum(ff, 0.0)
    ff = jnp.dot(ff.astype(jnp.bfloat16), w2_ref[...],
                 preferred_element_type=jnp.float32) + b2

    # ---- add & norm 2 (+ optional fused final LayerNorm of the encoder) ----
    z = _layernorm(y + ff, ln2w, ln2b)
    if apply_final_norm:
        z = _layernorm(z, pv[_ROW_FNW, :E], pv[_ROW_FNB, :E])
    out_ref[0] = z.astype(out_ref.dtype)


def layernorm_kernel(x_ref, w_ref, b_ref, out_ref):
    out_ref[0] = _layernorm(x_ref[0].astype(jnp.float32), w_ref[0], b_ref[0])


def _invariant_spec(shape, single_buffer):
    """Whole-array block, same block for every grid index (grid-invariant)."""
    nd = len(shape)
    index_map = lambda b, _nd=nd: (0,) * _nd
    if single_buffer:
        # Grid-invariant operand: one VMEM buffer is enough (no double-buffer).
        return pl.BlockSpec(shape, index_map, pipeline_mode=pl.Buffered(1))
    return pl.BlockSpec(shape, index_map)


def _vmem_limit_bytes(S, E, dff, width, single_buffer_weights):
    # Generation-aware: size from the chip's actual VMEM capacity (v5e/v6e 128 MiB,
    # v7x 64 MiB) with ~20% headroom for compiler-internal scratch.
    phys = 128 << 20
    try:
        phys = int(pltpu.get_tpu_info().vmem_capacity_bytes)
    except Exception:
        pass
    budget = int(phys * 0.80)
    wbufs = 1 if single_buffer_weights else 2
    w_bytes = 2 * (3 * E * E + E * E + 2 * E * dff)          # bf16 weights
    p_bytes = 4 * _NUM_PARAM_ROWS * width                    # packed f32 params
    act_bytes = 4 * S * E                                    # one (1,S,E) block (<=f32)
    est = (wbufs * (w_bytes + p_bytes)
           + 2 * 2 * act_bytes                               # double-buffered in/out
           + 2 * S * E                                       # bf16 ctx scratch
           + (8 << 20))                                      # headroom
    return int(min(budget, max(est, 32 << 20)))


def encoder_layer_fwd(x, p, nhead, pvec, apply_final_norm, out_dtype):
    B, S, E = x.shape
    dff = p["w1_t"].shape[1]
    width = pvec.shape[1]

    def call(single_buffer):
        kernel = functools.partial(encoder_layer_kernel, nhead=nhead,
                                   apply_final_norm=apply_final_norm)
        return pl.pallas_call(
            kernel,
            out_shape=jax.ShapeDtypeStruct((B, S, E), out_dtype),
            grid=(B,),
            in_specs=[
                pl.BlockSpec((1, S, E), lambda b: (b, 0, 0)),     # x, per-batch block
                _invariant_spec((E, 3 * E), single_buffer),       # wqkv_t (bf16, Q-scaled)
                _invariant_spec((E, E), single_buffer),           # wo_t   (bf16)
                _invariant_spec((E, dff), single_buffer),         # w1_t   (bf16)
                _invariant_spec((dff, E), single_buffer),         # w2_t   (bf16)
                _invariant_spec((_NUM_PARAM_ROWS, width), single_buffer),  # packed params
            ],
            out_specs=pl.BlockSpec((1, S, E), lambda b: (b, 0, 0)),
            scratch_shapes=[pltpu.VMEM((S, E), jnp.bfloat16)],    # per-head context concat
            compiler_params=pltpu.CompilerParams(
                dimension_semantics=("parallel",),
                vmem_limit_bytes=_vmem_limit_bytes(S, E, dff, width, single_buffer)),
        )(x, p["wqkv_t"], p["wo_t"], p["w1_t"], p["w2_t"], pvec)

    if _BUFFERED_WEIGHTS_SUPPORTED[0]:
        try:
            return call(True)
        except Exception:
            _BUFFERED_WEIGHTS_SUPPORTED[0] = False   # fall back to default buffering
    return call(False)


def final_norm_fwd(x, gamma, beta):
    # Only used when num_layers == 0 (otherwise fused into the last layer kernel).
    B, S, E = x.shape
    g = gamma.reshape(1, E).astype(jnp.float32)
    b = beta.reshape(1, E).astype(jnp.float32)
    return pl.pallas_call(
        layernorm_kernel,
        out_shape=jax.ShapeDtypeStruct((B, S, E), jnp.float32),
        grid=(B,),
        in_specs=[
            pl.BlockSpec((1, S, E), lambda i: (i, 0, 0)),
            pl.BlockSpec((1, E), lambda i: (0, 0)),
            pl.BlockSpec((1, E), lambda i: (0, 0)),
        ],
        out_specs=pl.BlockSpec((1, S, E), lambda i: (i, 0, 0)),
        compiler_params=pltpu.CompilerParams(dimension_semantics=("parallel",)),
    )(x, g, b)


def transformer_encoder_fwd(src, layer_params, final_norm_params, nhead):
    """Stack of num_layers encoder layers, optional final LayerNorm (fused)."""
    output = src
    n = len(layer_params)
    E = src.shape[-1]
    for i, p in enumerate(layer_params):
        is_last = (i == n - 1)
        apply_final = is_last and (final_norm_params is not None)
        pvec = p["pvec"]
        if apply_final:
            fnw, fnb = final_norm_params
            pvec = (pvec.at[_ROW_FNW, :E].set(fnw.reshape(-1))
                         .at[_ROW_FNB, :E].set(fnb.reshape(-1)))
        # Inter-layer activations go through HBM in bf16; final layer emits f32.
        out_dtype = jnp.float32 if is_last else jnp.bfloat16
        output = encoder_layer_fwd(output, p, nhead, pvec, apply_final, out_dtype)
    if n == 0 and final_norm_params is not None:
        output = final_norm_fwd(output, *final_norm_params)
    return output


def _pack_rows(rows, width):
    out = []
    for r in rows:
        r = jnp.asarray(r, jnp.float32).reshape(-1)
        out.append(jnp.pad(r, (0, width - r.shape[0])))
    return jnp.stack(out)


def init_layer_params(key, d_model, nhead, dim_ff):
    E = d_model
    ks = jax.random.split(key, 6)

    def xavier(k, shape):
        fan_out, fan_in = shape[0], shape[1]
        bound = math.sqrt(6.0 / (fan_in + fan_out))
        return jax.random.uniform(k, shape, jnp.float32, -bound, bound)

    def linear_bias(k, fan_in, n):
        bound = 1.0 / math.sqrt(fan_in)
        return jax.random.uniform(k, (n,), jnp.float32, -bound, bound)

    head_dim = E // nhead
    scale = 1.0 / math.sqrt(head_dim)

    # PyTorch stores in_proj_weight (3E, E); pre-transpose to (E, 3E) for x @ W.
    # Fold the 1/sqrt(head_dim) attention scale into BOTH the Q weight columns and
    # the Q bias:  scale*(x@Wq + bq) == x@(scale*Wq) + scale*bq.
    wqkv_t = xavier(ks[0], (3 * E, E)).T                      # (E, 3E) f32
    wqkv_t = wqkv_t.at[:, :E].multiply(scale)
    bqkv = jnp.zeros((3 * E,), jnp.float32)                   # PyTorch MHA default: zeros
    bqkv = bqkv.at[:E].multiply(scale)

    wo_t = xavier(ks[1], (E, E)).T
    bo = jnp.zeros((E,), jnp.float32)                         # PyTorch default: zeros
    w1_t = xavier(ks[2], (dim_ff, E)).T                       # (E, dff)
    b1 = linear_bias(ks[4], E, dim_ff)
    w2_t = xavier(ks[3], (E, dim_ff)).T                       # (dff, E)
    b2 = linear_bias(ks[5], dim_ff, E)

    ones = jnp.ones((E,), jnp.float32)
    zeros = jnp.zeros((E,), jnp.float32)
    width = _round_up(max(3 * E, dim_ff), 128)                # lane-dense packed params
    pvec = _pack_rows([bqkv, bo, b1, b2,
                       ones, zeros,        # ln1 gamma/beta
                       ones, zeros,        # ln2 gamma/beta
                       ones, zeros],       # final-norm slots (overwritten if fused)
                      width)

    # Weights stored bf16 (MXU fast path on v5e/v6e/v7x; f32 accumulation in-kernel).
    return {"wqkv_t": wqkv_t.astype(jnp.bfloat16),
            "wo_t": wo_t.astype(jnp.bfloat16),
            "w1_t": w1_t.astype(jnp.bfloat16),
            "w2_t": w2_t.astype(jnp.bfloat16),
            "pvec": pvec}


def _reference_forward(src, layer_params, final_norm, nhead):
    # Pure-JAX f32 reference using the same (bf16-rounded) weights — checks the
    # kernel within bf16/approx-reciprocal tolerance.
    def ln(x, g, b, eps=1e-5):
        m = x.mean(-1, keepdims=True)
        v = ((x - m) ** 2).mean(-1, keepdims=True)
        return (x - m) * jax.lax.rsqrt(v + eps) * g + b

    x = src
    E = src.shape[-1]
    D = E // nhead
    for p in layer_params:
        wqkv = p["wqkv_t"].astype(jnp.float32)
        wo = p["wo_t"].astype(jnp.float32)
        w1 = p["w1_t"].astype(jnp.float32)
        w2 = p["w2_t"].astype(jnp.float32)
        dff = w1.shape[1]
        pv = p["pvec"]
        bqkv, bo = pv[_ROW_BQKV, :3 * E], pv[_ROW_BO, :E]
        b1, b2 = pv[_ROW_B1, :dff], pv[_ROW_B2, :E]
        ln1w, ln1b = pv[_ROW_LN1W, :E], pv[_ROW_LN1B, :E]
        ln2w, ln2b = pv[_ROW_LN2W, :E], pv[_ROW_LN2B, :E]

        qkv = x @ wqkv + bqkv                      # scale already folded into Q
        q, k, v = qkv[..., :E], qkv[..., E:2 * E], qkv[..., 2 * E:]
        heads = []
        for h in range(nhead):
            qh = q[..., h * D:(h + 1) * D]
            kh = k[..., h * D:(h + 1) * D]
            vh = v[..., h * D:(h + 1) * D]
            s = jnp.einsum("bqd,bkd->bqk", qh, kh)
            pmat = jax.nn.softmax(s, axis=-1)
            heads.append(jnp.einsum("bqk,bkd->bqd", pmat, vh))
        attn = jnp.concatenate(heads, axis=-1) @ wo + bo
        y = ln(x + attn, ln1w, ln1b)
        ff = jnp.maximum(y @ w1 + b1, 0.0) @ w2 + b2
        x = ln(y + ff, ln2w, ln2b)
    if final_norm is not None:
        x = ln(x, final_norm[0], final_norm[1])
    return x


if __name__ == "__main__":
    # Lane-dense small shapes: E, dff multiples of 128; head_dim = 32 (mult. of 16).
    B, S, E = 2, 16, 128
    NHEAD, DFF, NUM_LAYERS = 4, 256, 2

    key = jax.random.PRNGKey(0)
    k_src, *k_layers = jax.random.split(key, NUM_LAYERS + 1)

    src = jax.random.normal(k_src, (B, S, E), jnp.float32)
    layer_params = [init_layer_params(k, E, NHEAD, DFF) for k in k_layers]
    final_norm = (jnp.ones((E,), jnp.float32), jnp.zeros((E,), jnp.float32))

    out = transformer_encoder_fwd(src, layer_params, final_norm, NHEAD)
    out = jax.block_until_ready(out)
    assert out.shape == (B, S, E)
    assert out.dtype == jnp.float32
    assert jnp.all(jnp.isfinite(out))

    # Tolerance check vs. pure-JAX f32 reference (bf16 activations + approx
    # reciprocal in softmax → small expected deviation).
    ref = _reference_forward(src, layer_params, final_norm, NHEAD)
    max_err = float(jnp.max(jnp.abs(out - ref)))
    assert max_err < 0.3, f"max abs error vs reference too large: {max_err}"

    print("KERNEL_OK")
</pallas_src>

<mosaic_0001>
module attributes {stable_mosaic.version = 11 : i64} {
  func.func @encoder_layer_kernel(%arg0: i32, %arg1: memref<1x16x128xf32, #tpu.memory_space<vmem>>, %arg2: memref<128x384xbf16, #tpu.memory_space<vmem>>, %arg3: memref<128x128xbf16, #tpu.memory_space<vmem>>, %arg4: memref<128x256xbf16, #tpu.memory_space<vmem>>, %arg5: memref<256x128xbf16, #tpu.memory_space<vmem>>, %arg6: memref<10x384xf32, #tpu.memory_space<vmem>>, %arg7: memref<1x16x128xbf16, #tpu.memory_space<vmem>>, %arg8: memref<16x128xbf16, #tpu.memory_space<vmem>>) attributes {dimension_semantics = [#tpu.dimension_semantics<parallel>], iteration_bounds = array<i64: 2>, scalar_prefetch = 0 : i64, scratch_operands = 1 : i64, tpu.core_type = #tpu.core_type<tc>, window_params = [{transform_indices = @transform_0, window_bounds = array<i64: 1, 16, 128>}, {pipeline_mode = #tpu.pipeline_mode<synchronous>, transform_indices = @transform_1, window_bounds = array<i64: 128, 384>}, {pipeline_mode = #tpu.pipeline_mode<synchronous>, transform_indices = @transform_2, window_bounds = array<i64: 128, 128>}, {pipeline_mode = #tpu.pipeline_mode<synchronous>, transform_indices = @transform_3, window_bounds = array<i64: 128, 256>}, {pipeline_mode = #tpu.pipeline_mode<synchronous>, transform_indices = @transform_4, window_bounds = array<i64: 256, 128>}, {pipeline_mode = #tpu.pipeline_mode<synchronous>, transform_indices = @transform_5, window_bounds = array<i64: 10, 384>}, {transform_indices = @transform_6, window_bounds = array<i64: 1, 16, 128>}]} {
    %c0 = arith.constant 0 : index
    %c0_0 = arith.constant 0 : index
    %c0_1 = arith.constant 0 : index
    %0 = vector.load %arg1[%c0, %c0_0, %c0_1] : memref<1x16x128xf32, #tpu.memory_space<vmem>>, vector<1x16x128xf32>
    %1 = vector.shape_cast %0 : vector<1x16x128xf32> to vector<16x128xf32>
    %2 = arith.truncf %1 : vector<16x128xf32> to vector<16x128xbf16>
    %c0_2 = arith.constant 0 : index
    %c0_3 = arith.constant 0 : index
    %3 = vector.load %arg6[%c0_2, %c0_3] : memref<10x384xf32, #tpu.memory_space<vmem>>, vector<10x384xf32>
    %4 = vector.extract_strided_slice %3 {offsets = [0, 0], sizes = [1, 384], strides = [1, 1]} : vector<10x384xf32> to vector<1x384xf32>
    %5 = vector.shape_cast %4 : vector<1x384xf32> to vector<384xf32>
    %6 = vector.extract_strided_slice %3 {offsets = [1, 0], sizes = [1, 128], strides = [1, 1]} : vector<10x384xf32> to vector<1x128xf32>
    %7 = vector.shape_cast %6 : vector<1x128xf32> to vector<128xf32>
    %8 = vector.extract_strided_slice %3 {offsets = [2, 0], sizes = [1, 256], strides = [1, 1]} : vector<10x384xf32> to vector<1x256xf32>
    %9 = vector.shape_cast %8 : vector<1x256xf32> to vector<256xf32>
    %10 = vector.extract_strided_slice %3 {offsets = [3, 0], sizes = [1, 128], strides = [1, 1]} : vector<10x384xf32> to vector<1x128xf32>
    %11 = vector.shape_cast %10 : vector<1x128xf32> to vector<128xf32>
    %12 = vector.extract_strided_slice %3 {offsets = [4, 0], sizes = [1, 128], strides = [1, 1]} : vector<10x384xf32> to vector<1x128xf32>
    %13 = vector.shape_cast %12 : vector<1x128xf32> to vector<128xf32>
    %14 = vector.extract_strided_slice %3 {offsets = [5, 0], sizes = [1, 128], strides = [1, 1]} : vector<10x384xf32> to vector<1x128xf32>
    %15 = vector.shape_cast %14 : vector<1x128xf32> to vector<128xf32>
    %16 = vector.extract_strided_slice %3 {offsets = [6, 0], sizes = [1, 128], strides = [1, 1]} : vector<10x384xf32> to vector<1x128xf32>
    %17 = vector.shape_cast %16 : vector<1x128xf32> to vector<128xf32>
    %18 = vector.extract_strided_slice %3 {offsets = [7, 0], sizes = [1, 128], strides = [1, 1]} : vector<10x384xf32> to vector<1x128xf32>
    %19 = vector.shape_cast %18 : vector<1x128xf32> to vector<128xf32>
    %c0_4 = arith.constant 0 : index
    %c0_5 = arith.constant 0 : index
    %20 = vector.load %arg2[%c0_4, %c0_5] : memref<128x384xbf16, #tpu.memory_space<vmem>>, vector<128x384xbf16>
    %cst = arith.constant dense<0.000000e+00> : vector<16x384xf32>
    %21 = tpu.matmul %2, %20, %cst {dimension_numbers = #tpu.dot_dimension_numbers<[1], [0], [0], [1], [0, 0, 1, 1], [], []>} : vector<16x128xbf16>, vector<128x384xbf16>, vector<16x384xf32> -> vector<16x384xf32>
    %22 = vector.shape_cast %5 : vector<384xf32> to vector<1x384xf32>
    %23 = vector.broadcast %22 : vector<1x384xf32> to vector<16x384xf32>
    %24 = arith.addf %21, %23 : vector<16x384xf32>
    %25 = vector.extract_strided_slice %24 {offsets = [0, 0], sizes = [16, 32], strides = [1, 1]} : vector<16x384xf32> to vector<16x32xf32>
    %26 = arith.truncf %25 : vector<16x32xf32> to vector<16x32xbf16>
    %27 = vector.extract_strided_slice %24 {offsets = [0, 128], sizes = [16, 32], strides = [1, 1]} : vector<16x384xf32> to vector<16x32xf32>
    %28 = arith.truncf %27 : vector<16x32xf32> to vector<16x32xbf16>
    %29 = vector.extract_strided_slice %24 {offsets = [0, 256], sizes = [16, 32], strides = [1, 1]} : vector<16x384xf32> to vector<16x32xf32>
    %30 = arith.truncf %29 : vector<16x32xf32> to vector<16x32xbf16>
    %cst_6 = arith.constant dense<0.000000e+00> : vector<16x16xf32>
    %31 = tpu.matmul %26, %28, %cst_6 {dimension_numbers = #tpu.dot_dimension_numbers<[1], [1], [0], [0], [0, 0, 1, 0], [], []>} : vector<16x32xbf16>, vector<16x32xbf16>, vector<16x16xf32> -> vector<16x16xf32>
    %cst_7 = arith.constant dense<0xFF800000> : vector<16xf32>
    %32 = vector.multi_reduction <maximumf>, %31, %cst_7 [1] : vector<16x16xf32> to vector<16xf32>
    %33 = vector.shape_cast %32 : vector<16xf32> to vector<16x1xf32>
    %34 = vector.broadcast %33 : vector<16x1xf32> to vector<16x16xf32>
    %35 = arith.subf %31, %34 : vector<16x16xf32>
    %36 = math.exp %35 : vector<16x16xf32>
    %cst_8 = arith.constant dense<0.000000e+00> : vector<16xf32>
    %37 = vector.multi_reduction <add>, %36, %cst_8 [1] : vector<16x16xf32> to vector<16xf32>
    %38 = vector.shape_cast %37 : vector<16xf32> to vector<16x1xf32>
    %39 = arith.truncf %36 : vector<16x16xf32> to vector<16x16xbf16>
    %cst_9 = arith.constant dense<0.000000e+00> : vector<16x32xf32>
    %40 = tpu.matmul %39, %30, %cst_9 {dimension_numbers = #tpu.dot_dimension_numbers<[1], [0], [0], [1], [0, 0, 1, 1], [], []>} : vector<16x16xbf16>, vector<16x32xbf16>, vector<16x32xf32> -> vector<16x32xf32>
    %41 = tpu.reciprocal %38 {approx = true} : vector<16x1xf32> -> vector<16x1xf32>
    %42 = vector.broadcast %41 : vector<16x1xf32> to vector<16x32xf32>
    %43 = arith.mulf %40, %42 : vector<16x32xf32>
    %44 = arith.truncf %43 : vector<16x32xf32> to vector<16x32xbf16>
    %c0_10 = arith.constant 0 : index
    %c0_11 = arith.constant 0 : index
    %45 = vector.load %arg8[%c0_10, %c0_11] : memref<16x128xbf16, #tpu.memory_space<vmem>>, vector<16x32xbf16>
    tpu.vector_store %arg8[%c0_10, %c0_11], %44 {strides = array<i32>} : memref<16x128xbf16, #tpu.memory_space<vmem>>, vector<16x32xbf16>,
    %46 = vector.extract_strided_slice %24 {offsets = [0, 32], sizes = [16, 32], strides = [1, 1]} : vector<16x384xf32> to vector<16x32xf32>
    %47 = arith.truncf %46 : vector<16x32xf32> to vector<16x32xbf16>
    %48 = vector.extract_strided_slice %24 {offsets = [0, 160], sizes = [16, 32], strides = [1, 1]} : vector<16x384xf32> to vector<16x32xf32>
    %49 = arith.truncf %48 : vector<16x32xf32> to vector<16x32xbf16>
    %50 = vector.extract_strided_slice %24 {offsets = [0, 288], sizes = [16, 32], strides = [1, 1]} : vector<16x384xf32> to vector<16x32xf32>
    %51 = arith.truncf %50 : vector<16x32xf32> to vector<16x32xbf16>
    %cst_12 = arith.constant dense<0.000000e+00> : vector<16x16xf32>
    %52 = tpu.matmul %47, %49, %cst_12 {dimension_numbers = #tpu.dot_dimension_numbers<[1], [1], [0], [0], [0, 0, 1, 0], [], []>} : vector<16x32xbf16>, vector<16x32xbf16>, vector<16x16xf32> -> vector<16x16xf32>
    %cst_13 = arith.constant dense<0xFF800000> : vector<16xf32>
    %53 = vector.multi_reduction <maximumf>, %52, %cst_13 [1] : vector<16x16xf32> to vector<16xf32>
    %54 = vector.shape_cast %53 : vector<16xf32> to vector<16x1xf32>
    %55 = vector.broadcast %54 : vector<16x1xf32> to vector<16x16xf32>
    %56 = arith.subf %52, %55 : vector<16x16xf32>
    %57 = math.exp %56 : vector<16x16xf32>
    %cst_14 = arith.constant dense<0.000000e+00> : vector<16xf32>
    %58 = vector.multi_reduction <add>, %57, %cst_14 [1] : vector<16x16xf32> to vector<16xf32>
    %59 = vector.shape_cast %58 : vector<16xf32> to vector<16x1xf32>
    %60 = arith.truncf %57 : vector<16x16xf32> to vector<16x16xbf16>
    %cst_15 = arith.constant dense<0.000000e+00> : vector<16x32xf32>
    %61 = tpu.matmul %60, %51, %cst_15 {dimension_numbers = #tpu.dot_dimension_numbers<[1], [0], [0], [1], [0, 0, 1, 1], [], []>} : vector<16x16xbf16>, vector<16x32xbf16>, vector<16x32xf32> -> vector<16x32xf32>
    %62 = tpu.reciprocal %59 {approx = true} : vector<16x1xf32> -> vector<16x1xf32>
    %63 = vector.broadcast %62 : vector<16x1xf32> to vector<16x32xf32>
    %64 = arith.mulf %61, %63 : vector<16x32xf32>
    %65 = arith.truncf %64 : vector<16x32xf32> to vector<16x32xbf16>
    %c0_16 = arith.constant 0 : index
    %c32 = arith.constant 32 : index
    %66 = vector.load %arg8[%c0_16, %c32] : memref<16x128xbf16, #tpu.memory_space<vmem>>, vector<16x32xbf16>
    tpu.vector_store %arg8[%c0_16, %c32], %65 {strides = array<i32>} : memref<16x128xbf16, #tpu.memory_space<vmem>>, vector<16x32xbf16>,
    %67 = vector.extract_strided_slice %24 {offsets = [0, 64], sizes = [16, 32], strides = [1, 1]} : vector<16x384xf32> to vector<16x32xf32>
    %68 = arith.truncf %67 : vector<16x32xf32> to vector<16x32xbf16>
    %69 = vector.extract_strided_slice %24 {offsets = [0, 192], sizes = [16, 32], strides = [1, 1]} : vector<16x384xf32> to vector<16x32xf32>
    %70 = arith.truncf %69 : vector<16x32xf32> to vector<16x32xbf16>
    %71 = vector.extract_strided_slice %24 {offsets = [0, 320], sizes = [16, 32], strides = [1, 1]} : vector<16x384xf32> to vector<16x32xf32>
    %72 = arith.truncf %71 : vector<16x32xf32> to vector<16x32xbf16>
    %cst_17 = arith.constant dense<0.000000e+00> : vector<16x16xf32>
    %73 = tpu.matmul %68, %70, %cst_17 {dimension_numbers = #tpu.dot_dimension_numbers<[1], [1], [0], [0], [0, 0, 1, 0], [], []>} : vector<16x32xbf16>, vector<16x32xbf16>, vector<16x16xf32> -> vector<16x16xf32>
    %cst_18 = arith.constant dense<0xFF800000> : vector<16xf32>
    %74 = vector.multi_reduction <maximumf>, %73, %cst_18 [1] : vector<16x16xf32> to vector<16xf32>
    %75 = vector.shape_cast %74 : vector<16xf32> to vector<16x1xf32>
    %76 = vector.broadcast %75 : vector<16x1xf32> to vector<16x16xf32>
    %77 = arith.subf %73, %76 : vector<16x16xf32>
    %78 = math.exp %77 : vector<16x16xf32>
    %cst_19 = arith.constant dense<0.000000e+00> : vector<16xf32>
    %79 = vector.multi_reduction <add>, %78, %cst_19 [1] : vector<16x16xf32> to vector<16xf32>
    %80 = vector.shape_cast %79 : vector<16xf32> to vector<16x1xf32>
    %81 = arith.truncf %78 : vector<16x16xf32> to vector<16x16xbf16>
    %cst_20 = arith.constant dense<0.000000e+00> : vector<16x32xf32>
    %82 = tpu.matmul %81, %72, %cst_20 {dimension_numbers = #tpu.dot_dimension_numbers<[1], [0], [0], [1], [0, 0, 1, 1], [], []>} : vector<16x16xbf16>, vector<16x32xbf16>, vector<16x32xf32> -> vector<16x32xf32>
    %83 = tpu.reciprocal %80 {approx = true} : vector<16x1xf32> -> vector<16x1xf32>
    %84 = vector.broadcast %83 : vector<16x1xf32> to vector<16x32xf32>
    %85 = arith.mulf %82, %84 : vector<16x32xf32>
    %86 = arith.truncf %85 : vector<16x32xf32> to vector<16x32xbf16>
    %c0_21 = arith.constant 0 : index
    %c64 = arith.constant 64 : index
    %87 = vector.load %arg8[%c0_21, %c64] : memref<16x128xbf16, #tpu.memory_space<vmem>>, vector<16x32xbf16>
    tpu.vector_store %arg8[%c0_21, %c64], %86 {strides = array<i32>} : memref<16x128xbf16, #tpu.memory_space<vmem>>, vector<16x32xbf16>,
    %88 = vector.extract_strided_slice %24 {offsets = [0, 96], sizes = [16, 32], strides = [1, 1]} : vector<16x384xf32> to vector<16x32xf32>
    %89 = arith.truncf %88 : vector<16x32xf32> to vector<16x32xbf16>
    %90 = vector.extract_strided_slice %24 {offsets = [0, 224], sizes = [16, 32], strides = [1, 1]} : vector<16x384xf32> to vector<16x32xf32>
    %91 = arith.truncf %90 : vector<16x32xf32> to vector<16x32xbf16>
    %92 = vector.extract_strided_slice %24 {offsets = [0, 352], sizes = [16, 32], strides = [1, 1]} : vector<16x384xf32> to vector<16x32xf32>
    %93 = arith.truncf %92 : vector<16x32xf32> to vector<16x32xbf16>
    %cst_22 = arith.constant dense<0.000000e+00> : vector<16x16xf32>
    %94 = tpu.matmul %89, %91, %cst_22 {dimension_numbers = #tpu.dot_dimension_numbers<[1], [1], [0], [0], [0, 0, 1, 0], [], []>} : vector<16x32xbf16>, vector<16x32xbf16>, vector<16x16xf32> -> vector<16x16xf32>
    %cst_23 = arith.constant dense<0xFF800000> : vector<16xf32>
    %95 = vector.multi_reduction <maximumf>, %94, %cst_23 [1] : vector<16x16xf32> to vector<16xf32>
    %96 = vector.shape_cast %95 : vector<16xf32> to vector<16x1xf32>
    %97 = vector.broadcast %96 : vector<16x1xf32> to vector<16x16xf32>
    %98 = arith.subf %94, %97 : vector<16x16xf32>
    %99 = math.exp %98 : vector<16x16xf32>
    %cst_24 = arith.constant dense<0.000000e+00> : vector<16xf32>
    %100 = vector.multi_reduction <add>, %99, %cst_24 [1] : vector<16x16xf32> to vector<16xf32>
    %101 = vector.shape_cast %100 : vector<16xf32> to vector<16x1xf32>
    %102 = arith.truncf %99 : vector<16x16xf32> to vector<16x16xbf16>
    %cst_25 = arith.constant dense<0.000000e+00> : vector<16x32xf32>
    %103 = tpu.matmul %102, %93, %cst_25 {dimension_numbers = #tpu.dot_dimension_numbers<[1], [0], [0], [1], [0, 0, 1, 1], [], []>} : vector<16x16xbf16>, vector<16x32xbf16>, vector<16x32xf32> -> vector<16x32xf32>
    %104 = tpu.reciprocal %101 {approx = true} : vector<16x1xf32> -> vector<16x1xf32>
    %105 = vector.broadcast %104 : vector<16x1xf32> to vector<16x32xf32>
    %106 = arith.mulf %103, %105 : vector<16x32xf32>
    %107 = arith.truncf %106 : vector<16x32xf32> to vector<16x32xbf16>
    %c0_26 = arith.constant 0 : index
    %c96 = arith.constant 96 : index
    %108 = vector.load %arg8[%c0_26, %c96] : memref<16x128xbf16, #tpu.memory_space<vmem>>, vector<16x32xbf16>
    tpu.vector_store %arg8[%c0_26, %c96], %107 {strides = array<i32>} : memref<16x128xbf16, #tpu.memory_space<vmem>>, vector<16x32xbf16>,
    %c0_27 = arith.constant 0 : index
    %c0_28 = arith.constant 0 : index
    %109 = vector.load %arg8[%c0_27, %c0_28] : memref<16x128xbf16, #tpu.memory_space<vmem>>, vector<16x128xbf16>
    %c0_29 = arith.constant 0 : index
    %c0_30 = arith.constant 0 : index
    %110 = vector.load %arg3[%c0_29, %c0_30] : memref<128x128xbf16, #tpu.memory_space<vmem>>, vector<128x128xbf16>
    %cst_31 = arith.constant dense<0.000000e+00> : vector<16x128xf32>
    %111 = tpu.matmul %109, %110, %cst_31 {dimension_numbers = #tpu.dot_dimension_numbers<[1], [0], [0], [1], [0, 0, 1, 1], [], []>} : vector<16x128xbf16>, vector<128x128xbf16>, vector<16x128xf32> -> vector<16x128xf32>
    %112 = vector.shape_cast %7 : vector<128xf32> to vector<1x128xf32>
    %113 = vector.broadcast %112 : vector<1x128xf32> to vector<16x128xf32>
    %114 = arith.addf %111, %113 : vector<16x128xf32>
    %115 = arith.addf %1, %114 : vector<16x128xf32>
    %cst_32 = arith.constant dense<0.000000e+00> : vector<16xf32>
    %116 = vector.multi_reduction <add>, %115, %cst_32 [1] : vector<16x128xf32> to vector<16xf32>
    %117 = vector.shape_cast %116 : vector<16xf32> to vector<16x1xf32>
    %cst_33 = arith.constant 1.280000e+02 : f32
    %118 = vector.broadcast %cst_33 : f32 to vector<16x1xf32>
    %119 = arith.divf %117, %118 : vector<16x1xf32>
    %120 = vector.broadcast %119 : vector<16x1xf32> to vector<16x128xf32>
    %121 = arith.subf %115, %120 : vector<16x128xf32>
    %122 = arith.mulf %121, %121 : vector<16x128xf32>
    %cst_34 = arith.constant dense<0.000000e+00> : vector<16xf32>
    %123 = vector.multi_reduction <add>, %122, %cst_34 [1] : vector<16x128xf32> to vector<16xf32>
    %124 = vector.shape_cast %123 : vector<16xf32> to vector<16x1xf32>
    %cst_35 = arith.constant 1.280000e+02 : f32
    %125 = vector.broadcast %cst_35 : f32 to vector<16x1xf32>
    %126 = arith.divf %124, %125 : vector<16x1xf32>
    %cst_36 = arith.constant 9.99999974E-6 : f32
    %127 = vector.broadcast %cst_36 : f32 to vector<16x1xf32>
    %128 = arith.addf %126, %127 : vector<16x1xf32>
    %129 = math.rsqrt %128 : vector<16x1xf32>
    %130 = vector.broadcast %129 : vector<16x1xf32> to vector<16x128xf32>
    %131 = arith.mulf %121, %130 : vector<16x128xf32>
    %132 = vector.shape_cast %13 : vector<128xf32> to vector<1x128xf32>
    %133 = vector.broadcast %132 : vector<1x128xf32> to vector<16x128xf32>
    %134 = arith.mulf %131, %133 : vector<16x128xf32>
    %135 = vector.shape_cast %15 : vector<128xf32> to vector<1x128xf32>
    %136 = vector.broadcast %135 : vector<1x128xf32> to vector<16x128xf32>
    %137 = arith.addf %134, %136 : vector<16x128xf32>
    %138 = arith.truncf %137 : vector<16x128xf32> to vector<16x128xbf16>
    %c0_37 = arith.constant 0 : index
    %c0_38 = arith.constant 0 : index
    %139 = vector.load %arg4[%c0_37, %c0_38] : memref<128x256xbf16, #tpu.memory_space<vmem>>, vector<128x256xbf16>
    %cst_39 = arith.constant dense<0.000000e+00> : vector<16x256xf32>
    %140 = tpu.matmul %138, %139, %cst_39 {dimension_numbers = #tpu.dot_dimension_numbers<[1], [0], [0], [1], [0, 0, 1, 1], [], []>} : vector<16x128xbf16>, vector<128x256xbf16>, vector<16x256xf32> -> vector<16x256xf32>
    %141 = vector.shape_cast %9 : vector<256xf32> to vector<1x256xf32>
    %142 = vector.broadcast %141 : vector<1x256xf32> to vector<16x256xf32>
    %143 = arith.addf %140, %142 : vector<16x256xf32>
    %cst_40 = arith.constant 0.000000e+00 : f32
    %144 = vector.broadcast %cst_40 : f32 to vector<16x256xf32>
    %145 = arith.maximumf %143, %144 : vector<16x256xf32>
    %146 = arith.truncf %145 : vector<16x256xf32> to vector<16x256xbf16>
    %c0_41 = arith.constant 0 : index
    %c0_42 = arith.constant 0 : index
    %147 = vector.load %arg5[%c0_41, %c0_42] : memref<256x128xbf16, #tpu.memory_space<vmem>>, vector<256x128xbf16>
    %cst_43 = arith.constant dense<0.000000e+00> : vector<16x128xf32>
    %148 = tpu.matmul %146, %147, %cst_43 {dimension_numbers = #tpu.dot_dimension_numbers<[1], [0], [0], [1], [0, 0, 1, 1], [], []>} : vector<16x256xbf16>, vector<256x128xbf16>, vector<16x128xf32> -> vector<16x128xf32>
    %149 = vector.shape_cast %11 : vector<128xf32> to vector<1x128xf32>
    %150 = vector.broadcast %149 : vector<1x128xf32> to vector<16x128xf32>
    %151 = arith.addf %148, %150 : vector<16x128xf32>
    %152 = arith.addf %137, %151 : vector<16x128xf32>
    %cst_44 = arith.constant dense<0.000000e+00> : vector<16xf32>
    %153 = vector.multi_reduction <add>, %152, %cst_44 [1] : vector<16x128xf32> to vector<16xf32>
    %154 = vector.shape_cast %153 : vector<16xf32> to vector<16x1xf32>
    %cst_45 = arith.constant 1.280000e+02 : f32
    %155 = vector.broadcast %cst_45 : f32 to vector<16x1xf32>
    %156 = arith.divf %154, %155 : vector<16x1xf32>
    %157 = vector.broadcast %156 : vector<16x1xf32> to vector<16x128xf32>
    %158 = arith.subf %152, %157 : vector<16x128xf32>
    %159 = arith.mulf %158, %158 : vector<16x128xf32>
    %cst_46 = arith.constant dense<0.000000e+00> : vector<16xf32>
    %160 = vector.multi_reduction <add>, %159, %cst_46 [1] : vector<16x128xf32> to vector<16xf32>
    %161 = vector.shape_cast %160 : vector<16xf32> to vector<16x1xf32>
    %cst_47 = arith.constant 1.280000e+02 : f32
    %162 = vector.broadcast %cst_47 : f32 to vector<16x1xf32>
    %163 = arith.divf %161, %162 : vector<16x1xf32>
    %cst_48 = arith.constant 9.99999974E-6 : f32
    %164 = vector.broadcast %cst_48 : f32 to vector<16x1xf32>
    %165 = arith.addf %163, %164 : vector<16x1xf32>
    %166 = math.rsqrt %165 : vector<16x1xf32>
    %167 = vector.broadcast %166 : vector<16x1xf32> to vector<16x128xf32>
    %168 = arith.mulf %158, %167 : vector<16x128xf32>
    %169 = vector.shape_cast %17 : vector<128xf32> to vector<1x128xf32>
    %170 = vector.broadcast %169 : vector<1x128xf32> to vector<16x128xf32>
    %171 = arith.mulf %168, %170 : vector<16x128xf32>
    %172 = vector.shape_cast %19 : vector<128xf32> to vector<1x128xf32>
    %173 = vector.broadcast %172 : vector<1x128xf32> to vector<16x128xf32>
    %174 = arith.addf %171, %173 : vector<16x128xf32>
    %175 = arith.truncf %174 : vector<16x128xf32> to vector<16x128xbf16>
    %c0_49 = arith.constant 0 : index
    %c0_50 = arith.constant 0 : index
    %c0_51 = arith.constant 0 : index
    %176 = vector.load %arg7[%c0_49, %c0_50, %c0_51] : memref<1x16x128xbf16, #tpu.memory_space<vmem>>, vector<1x16x128xbf16>
    %177 = vector.shape_cast %176 : vector<1x16x128xbf16> to vector<16x128xbf16>
    %178 = vector.shape_cast %175 : vector<16x128xbf16> to vector<1x16x128xbf16>
    tpu.vector_store %arg7[%c0_49, %c0_50, %c0_51], %178 {strides = array<i32>} : memref<1x16x128xbf16, #tpu.memory_space<vmem>>, vector<1x16x128xbf16>,
    return
  }
  func.func @transform_0(%arg0: i32) -> (i32, i32, i32) {
    %c0_i32 = arith.constant 0 : i32
    %c0_i32_0 = arith.constant 0 : i32
    %c0_i32_1 = arith.constant 0 : i32
    return %arg0, %c0_i32, %c0_i32_0 : i32, i32, i32
  }
  func.func @transform_1(%arg0: i32) -> (i32, i32) {
    %c0_i32 = arith.constant 0 : i32
    %c0_i32_0 = arith.constant 0 : i32
    %c0_i32_1 = arith.constant 0 : i32
    return %c0_i32, %c0_i32_0 : i32, i32
  }
  func.func @transform_2(%arg0: i32) -> (i32, i32) {
    %c0_i32 = arith.constant 0 : i32
    %c0_i32_0 = arith.constant 0 : i32
    %c0_i32_1 = arith.constant 0 : i32
    return %c0_i32, %c0_i32_0 : i32, i32
  }
  func.func @transform_3(%arg0: i32) -> (i32, i32) {
    %c0_i32 = arith.constant 0 : i32
    %c0_i32_0 = arith.constant 0 : i32
    %c0_i32_1 = arith.constant 0 : i32
    return %c0_i32, %c0_i32_0 : i32, i32
  }
  func.func @transform_4(%arg0: i32) -> (i32, i32) {
    %c0_i32 = arith.constant 0 : i32
    %c0_i32_0 = arith.constant 0 : i32
    %c0_i32_1 = arith.constant 0 : i32
    return %c0_i32, %c0_i32_0 : i32, i32
  }
  func.func @transform_5(%arg0: i32) -> (i32, i32) {
    %c0_i32 = arith.constant 0 : i32
    %c0_i32_0 = arith.constant 0 : i32
    %c0_i32_1 = arith.constant 0 : i32
    return %c0_i32, %c0_i32_0 : i32, i32
  }
  func.func @transform_6(%arg0: i32) -> (i32, i32, i32) {
    %c0_i32 = arith.constant 0 : i32
    %c0_i32_0 = arith.constant 0 : i32
    %c0_i32_1 = arith.constant 0 : i32
    return %arg0, %c0_i32, %c0_i32_0 : i32, i32, i32
  }
}

module attributes {stable_mosaic.version = 11 : i64} {
  func.func @encoder_layer_kernel(%arg0: i32, %arg1: memref<1x16x128xf32, #tpu.memory_space<vmem>>, %arg2: memref<128x384xbf16, #tpu.memory_space<vmem>>, %arg3: memref<128x128xbf16, #tpu.memory_space<vmem>>, %arg4: memref<128x256xbf16, #tpu.memory_space<vmem>>, %arg5: memref<256x128xbf16, #tpu.memory_space<vmem>>, %arg6: memref<10x384xf32, #tpu.memory_space<vmem>>, %arg7: memref<1x16x128xbf16, #tpu.memory_space<vmem>>, %arg8: memref<16x128xbf16, #tpu.memory_space<vmem>>) attributes {dimension_semantics = [#tpu.dimension_semantics<parallel>], iteration_bounds = array<i64: 2>, scalar_prefetch = 0 : i64, scratch_operands = 1 : i64, tpu.core_type = #tpu.core_type<tc>, window_params = [{transform_indices = @transform_0, window_bounds = array<i64: 1, 16, 128>}, {pipeline_mode = #tpu.pipeline_mode<synchronous>, transform_indices = @transform_1, window_bounds = array<i64: 128, 384>}, {pipeline_mode = #tpu.pipeline_mode<synchronous>, transform_indices = @transform_2, window_bounds = array<i64: 128, 128>}, {pipeline_mode = #tpu.pipeline_mode<synchronous>, transform_indices = @transform_3, window_bounds = array<i64: 128, 256>}, {pipeline_mode = #tpu.pipeline_mode<synchronous>, transform_indices = @transform_4, window_bounds = array<i64: 256, 128>}, {pipeline_mode = #tpu.pipeline_mode<synchronous>, transform_indices = @transform_5, window_bounds = array<i64: 10, 384>}, {transform_indices = @transform_6, window_bounds = array<i64: 1, 16, 128>}]} {
    %c0 = arith.constant 0 : index
    %c0_0 = arith.constant 0 : index
    %c0_1 = arith.constant 0 : index
    %0 = vector.load %arg1[%c0, %c0_0, %c0_1] : memref<1x16x128xf32, #tpu.memory_space<vmem>>, vector<1x16x128xf32>
    %1 = vector.shape_cast %0 : vector<1x16x128xf32> to vector<16x128xf32>
    %2 = arith.truncf %1 : vector<16x128xf32> to vector<16x128xbf16>
    %c0_2 = arith.constant 0 : index
    %c0_3 = arith.constant 0 : index
    %3 = vector.load %arg6[%c0_2, %c0_3] : memref<10x384xf32, #tpu.memory_space<vmem>>, vector<10x384xf32>
    %4 = vector.extract_strided_slice %3 {offsets = [0, 0], sizes = [1, 384], strides = [1, 1]} : vector<10x384xf32> to vector<1x384xf32>
    %5 = vector.shape_cast %4 : vector<1x384xf32> to vector<384xf32>
    %6 = vector.extract_strided_slice %3 {offsets = [1, 0], sizes = [1, 128], strides = [1, 1]} : vector<10x384xf32> to vector<1x128xf32>
    %7 = vector.shape_cast %6 : vector<1x128xf32> to vector<128xf32>
    %8 = vector.extract_strided_slice %3 {offsets = [2, 0], sizes = [1, 256], strides = [1, 1]} : vector<10x384xf32> to vector<1x256xf32>
    %9 = vector.shape_cast %8 : vector<1x256xf32> to vector<256xf32>
    %10 = vector.extract_strided_slice %3 {offsets = [3, 0], sizes = [1, 128], strides = [1, 1]} : vector<10x384xf32> to vector<1x128xf32>
    %11 = vector.shape_cast %10 : vector<1x128xf32> to vector<128xf32>
    %12 = vector.extract_strided_slice %3 {offsets = [4, 0], sizes = [1, 128], strides = [1, 1]} : vector<10x384xf32> to vector<1x128xf32>
    %13 = vector.shape_cast %12 : vector<1x128xf32> to vector<128xf32>
    %14 = vector.extract_strided_slice %3 {offsets = [5, 0], sizes = [1, 128], strides = [1, 1]} : vector<10x384xf32> to vector<1x128xf32>
    %15 = vector.shape_cast %14 : vector<1x128xf32> to vector<128xf32>
    %16 = vector.extract_strided_slice %3 {offsets = [6, 0], sizes = [1, 128], strides = [1, 1]} : vector<10x384xf32> to vector<1x128xf32>
    %17 = vector.shape_cast %16 : vector<1x128xf32> to vector<128xf32>
    %18 = vector.extract_strided_slice %3 {offsets = [7, 0], sizes = [1, 128], strides = [1, 1]} : vector<10x384xf32> to vector<1x128xf32>
    %19 = vector.shape_cast %18 : vector<1x128xf32> to vector<128xf32>
    %c0_4 = arith.constant 0 : index
    %c0_5 = arith.constant 0 : index
    %20 = vector.load %arg2[%c0_4, %c0_5] : memref<128x384xbf16, #tpu.memory_space<vmem>>, vector<128x384xbf16>
    %cst = arith.constant dense<0.000000e+00> : vector<16x384xf32>
    %21 = tpu.matmul %2, %20, %cst {dimension_numbers = #tpu.dot_dimension_numbers<[1], [0], [0], [1], [0, 0, 1, 1], [], []>} : vector<16x128xbf16>, vector<128x384xbf16>, vector<16x384xf32> -> vector<16x384xf32>
    %22 = vector.shape_cast %5 : vector<384xf32> to vector<1x384xf32>
    %23 = vector.broadcast %22 : vector<1x384xf32> to vector<16x384xf32>
    %24 = arith.addf %21, %23 : vector<16x384xf32>
    %25 = vector.extract_strided_slice %24 {offsets = [0, 0], sizes = [16, 32], strides = [1, 1]} : vector<16x384xf32> to vector<16x32xf32>
    %26 = arith.truncf %25 : vector<16x32xf32> to vector<16x32xbf16>
    %27 = vector.extract_strided_slice %24 {offsets = [0, 128], sizes = [16, 32], strides = [1, 1]} : vector<16x384xf32> to vector<16x32xf32>
    %28 = arith.truncf %27 : vector<16x32xf32> to vector<16x32xbf16>
    %29 = vector.extract_strided_slice %24 {offsets = [0, 256], sizes = [16, 32], strides = [1, 1]} : vector<16x384xf32> to vector<16x32xf32>
    %30 = arith.truncf %29 : vector<16x32xf32> to vector<16x32xbf16>
    %cst_6 = arith.constant dense<0.000000e+00> : vector<16x16xf32>
    %31 = tpu.matmul %26, %28, %cst_6 {dimension_numbers = #tpu.dot_dimension_numbers<[1], [1], [0], [0], [0, 0, 1, 0], [], []>} : vector<16x32xbf16>, vector<16x32xbf16>, vector<16x16xf32> -> vector<16x16xf32>
    %cst_7 = arith.constant dense<0xFF800000> : vector<16xf32>
    %32 = vector.multi_reduction <maximumf>, %31, %cst_7 [1] : vector<16x16xf32> to vector<16xf32>
    %33 = vector.shape_cast %32 : vector<16xf32> to vector<16x1xf32>
    %34 = vector.broadcast %33 : vector<16x1xf32> to vector<16x16xf32>
    %35 = arith.subf %31, %34 : vector<16x16xf32>
    %36 = math.exp %35 : vector<16x16xf32>
    %cst_8 = arith.constant dense<0.000000e+00> : vector<16xf32>
    %37 = vector.multi_reduction <add>, %36, %cst_8 [1] : vector<16x16xf32> to vector<16xf32>
    %38 = vector.shape_cast %37 : vector<16xf32> to vector<16x1xf32>
    %39 = arith.truncf %36 : vector<16x16xf32> to vector<16x16xbf16>
    %cst_9 = arith.constant dense<0.000000e+00> : vector<16x32xf32>
    %40 = tpu.matmul %39, %30, %cst_9 {dimension_numbers = #tpu.dot_dimension_numbers<[1], [0], [0], [1], [0, 0, 1, 1], [], []>} : vector<16x16xbf16>, vector<16x32xbf16>, vector<16x32xf32> -> vector<16x32xf32>
    %41 = tpu.reciprocal %38 {approx = true} : vector<16x1xf32> -> vector<16x1xf32>
    %42 = vector.broadcast %41 : vector<16x1xf32> to vector<16x32xf32>
    %43 = arith.mulf %40, %42 : vector<16x32xf32>
    %44 = arith.truncf %43 : vector<16x32xf32> to vector<16x32xbf16>
    %c0_10 = arith.constant 0 : index
    %c0_11 = arith.constant 0 : index
    %45 = vector.load %arg8[%c0_10, %c0_11] : memref<16x128xbf16, #tpu.memory_space<vmem>>, vector<16x32xbf16>
    tpu.vector_store %arg8[%c0_10, %c0_11], %44 {strides = array<i32>} : memref<16x128xbf16, #tpu.memory_space<vmem>>, vector<16x32xbf16>,
    %46 = vector.extract_strided_slice %24 {offsets = [0, 32], sizes = [16, 32], strides = [1, 1]} : vector<16x384xf32> to vector<16x32xf32>
    %47 = arith.truncf %46 : vector<16x32xf32> to vector<16x32xbf16>
    %48 = vector.extract_strided_slice %24 {offsets = [0, 160], sizes = [16, 32], strides = [1, 1]} : vector<16x384xf32> to vector<16x32xf32>
    %49 = arith.truncf %48 : vector<16x32xf32> to vector<16x32xbf16>
    %50 = vector.extract_strided_slice %24 {offsets = [0, 288], sizes = [16, 32], strides = [1, 1]} : vector<16x384xf32> to vector<16x32xf32>
    %51 = arith.truncf %50 : vector<16x32xf32> to vector<16x32xbf16>
    %cst_12 = arith.constant dense<0.000000e+00> : vector<16x16xf32>
    %52 = tpu.matmul %47, %49, %cst_12 {dimension_numbers = #tpu.dot_dimension_numbers<[1], [1], [0], [0], [0, 0, 1, 0], [], []>} : vector<16x32xbf16>, vector<16x32xbf16>, vector<16x16xf32> -> vector<16x16xf32>
    %cst_13 = arith.constant dense<0xFF800000> : vector<16xf32>
    %53 = vector.multi_reduction <maximumf>, %52, %cst_13 [1] : vector<16x16xf32> to vector<16xf32>
    %54 = vector.shape_cast %53 : vector<16xf32> to vector<16x1xf32>
    %55 = vector.broadcast %54 : vector<16x1xf32> to vector<16x16xf32>
    %56 = arith.subf %52, %55 : vector<16x16xf32>
    %57 = math.exp %56 : vector<16x16xf32>
    %cst_14 = arith.constant dense<0.000000e+00> : vector<16xf32>
    %58 = vector.multi_reduction <add>, %57, %cst_14 [1] : vector<16x16xf32> to vector<16xf32>
    %59 = vector.shape_cast %58 : vector<16xf32> to vector<16x1xf32>
    %60 = arith.truncf %57 : vector<16x16xf32> to vector<16x16xbf16>
    %cst_15 = arith.constant dense<0.000000e+00> : vector<16x32xf32>
    %61 = tpu.matmul %60, %51, %cst_15 {dimension_numbers = #tpu.dot_dimension_numbers<[1], [0], [0], [1], [0, 0, 1, 1], [], []>} : vector<16x16xbf16>, vector<16x32xbf16>, vector<16x32xf32> -> vector<16x32xf32>
    %62 = tpu.reciprocal %59 {approx = true} : vector<16x1xf32> -> vector<16x1xf32>
    %63 = vector.broadcast %62 : vector<16x1xf32> to vector<16x32xf32>
    %64 = arith.mulf %61, %63 : vector<16x32xf32>
    %65 = arith.truncf %64 : vector<16x32xf32> to vector<16x32xbf16>
    %c0_16 = arith.constant 0 : index
    %c32 = arith.constant 32 : index
    %66 = vector.load %arg8[%c0_16, %c32] : memref<16x128xbf16, #tpu.memory_space<vmem>>, vector<16x32xbf16>
    tpu.vector_store %arg8[%c0_16, %c32], %65 {strides = array<i32>} : memref<16x128xbf16, #tpu.memory_space<vmem>>, vector<16x32xbf16>,
    %67 = vector.extract_strided_slice %24 {offsets = [0, 64], sizes = [16, 32], strides = [1, 1]} : vector<16x384xf32> to vector<16x32xf32>
    %68 = arith.truncf %67 : vector<16x32xf32> to vector<16x32xbf16>
    %69 = vector.extract_strided_slice %24 {offsets = [0, 192], sizes = [16, 32], strides = [1, 1]} : vector<16x384xf32> to vector<16x32xf32>
    %70 = arith.truncf %69 : vector<16x32xf32> to vector<16x32xbf16>
    %71 = vector.extract_strided_slice %24 {offsets = [0, 320], sizes = [16, 32], strides = [1, 1]} : vector<16x384xf32> to vector<16x32xf32>
    %72 = arith.truncf %71 : vector<16x32xf32> to vector<16x32xbf16>
    %cst_17 = arith.constant dense<0.000000e+00> : vector<16x16xf32>
    %73 = tpu.matmul %68, %70, %cst_17 {dimension_numbers = #tpu.dot_dimension_numbers<[1], [1], [0], [0], [0, 0, 1, 0], [], []>} : vector<16x32xbf16>, vector<16x32xbf16>, vector<16x16xf32> -> vector<16x16xf32>
    %cst_18 = arith.constant dense<0xFF800000> : vector<16xf32>
    %74 = vector.multi_reduction <maximumf>, %73, %cst_18 [1] : vector<16x16xf32> to vector<16xf32>
    %75 = vector.shape_cast %74 : vector<16xf32> to vector<16x1xf32>
    %76 = vector.broadcast %75 : vector<16x1xf32> to vector<16x16xf32>
    %77 = arith.subf %73, %76 : vector<16x16xf32>
    %78 = math.exp %77 : vector<16x16xf32>
    %cst_19 = arith.constant dense<0.000000e+00> : vector<16xf32>
    %79 = vector.multi_reduction <add>, %78, %cst_19 [1] : vector<16x16xf32> to vector<16xf32>
    %80 = vector.shape_cast %79 : vector<16xf32> to vector<16x1xf32>
    %81 = arith.truncf %78 : vector<16x16xf32> to vector<16x16xbf16>
    %cst_20 = arith.constant dense<0.000000e+00> : vector<16x32xf32>
    %82 = tpu.matmul %81, %72, %cst_20 {dimension_numbers = #tpu.dot_dimension_numbers<[1], [0], [0], [1], [0, 0, 1, 1], [], []>} : vector<16x16xbf16>, vector<16x32xbf16>, vector<16x32xf32> -> vector<16x32xf32>
    %83 = tpu.reciprocal %80 {approx = true} : vector<16x1xf32> -> vector<16x1xf32>
    %84 = vector.broadcast %83 : vector<16x1xf32> to vector<16x32xf32>
    %85 = arith.mulf %82, %84 : vector<16x32xf32>
    %86 = arith.truncf %85 : vector<16x32xf32> to vector<16x32xbf16>
    %c0_21 = arith.constant 0 : index
    %c64 = arith.constant 64 : index
    %87 = vector.load %arg8[%c0_21, %c64] : memref<16x128xbf16, #tpu.memory_space<vmem>>, vector<16x32xbf16>
    tpu.vector_store %arg8[%c0_21, %c64], %86 {strides = array<i32>} : memref<16x128xbf16, #tpu.memory_space<vmem>>, vector<16x32xbf16>,
    %88 = vector.extract_strided_slice %24 {offsets = [0, 96], sizes = [16, 32], strides = [1, 1]} : vector<16x384xf32> to vector<16x32xf32>
    %89 = arith.truncf %88 : vector<16x32xf32> to vector<16x32xbf16>
    %90 = vector.extract_strided_slice %24 {offsets = [0, 224], sizes = [16, 32], strides = [1, 1]} : vector<16x384xf32> to vector<16x32xf32>
    %91 = arith.truncf %90 : vector<16x32xf32> to vector<16x32xbf16>
    %92 = vector.extract_strided_slice %24 {offsets = [0, 352], sizes = [16, 32], strides = [1, 1]} : vector<16x384xf32> to vector<16x32xf32>
    %93 = arith.truncf %92 : vector<16x32xf32> to vector<16x32xbf16>
    %cst_22 = arith.constant dense<0.000000e+00> : vector<16x16xf32>
    %94 = tpu.matmul %89, %91, %cst_22 {dimension_numbers = #tpu.dot_dimension_numbers<[1], [1], [0], [0], [0, 0, 1, 0], [], []>} : vector<16x32xbf16>, vector<16x32xbf16>, vector<16x16xf32> -> vector<16x16xf32>
    %cst_23 = arith.constant dense<0xFF800000> : vector<16xf32>
    %95 = vector.multi_reduction <maximumf>, %94, %cst_23 [1] : vector<16x16xf32> to vector<16xf32>
    %96 = vector.shape_cast %95 : vector<16xf32> to vector<16x1xf32>
    %97 = vector.broadcast %96 : vector<16x1xf32> to vector<16x16xf32>
    %98 = arith.subf %94, %97 : vector<16x16xf32>
    %99 = math.exp %98 : vector<16x16xf32>
    %cst_24 = arith.constant dense<0.000000e+00> : vector<16xf32>
    %100 = vector.multi_reduction <add>, %99, %cst_24 [1] : vector<16x16xf32> to vector<16xf32>
    %101 = vector.shape_cast %100 : vector<16xf32> to vector<16x1xf32>
    %102 = arith.truncf %99 : vector<16x16xf32> to vector<16x16xbf16>
    %cst_25 = arith.constant dense<0.000000e+00> : vector<16x32xf32>
    %103 = tpu.matmul %102, %93, %cst_25 {dimension_numbers = #tpu.dot_dimension_numbers<[1], [0], [0], [1], [0, 0, 1, 1], [], []>} : vector<16x16xbf16>, vector<16x32xbf16>, vector<16x32xf32> -> vector<16x32xf32>
    %104 = tpu.reciprocal %101 {approx = true} : vector<16x1xf32> -> vector<16x1xf32>
    %105 = vector.broadcast %104 : vector<16x1xf32> to vector<16x32xf32>
    %106 = arith.mulf %103, %105 : vector<16x32xf32>
    %107 = arith.truncf %106 : vector<16x32xf32> to vector<16x32xbf16>
    %c0_26 = arith.constant 0 : index
    %c96 = arith.constant 96 : index
    %108 = vector.load %arg8[%c0_26, %c96] : memref<16x128xbf16, #tpu.memory_space<vmem>>, vector<16x32xbf16>
    tpu.vector_store %arg8[%c0_26, %c96], %107 {strides = array<i32>} : memref<16x128xbf16, #tpu.memory_space<vmem>>, vector<16x32xbf16>,
    %c0_27 = arith.constant 0 : index
    %c0_28 = arith.constant 0 : index
    %109 = vector.load %arg8[%c0_27, %c0_28] : memref<16x128xbf16, #tpu.memory_space<vmem>>, vector<16x128xbf16>
    %c0_29 = arith.constant 0 : index
    %c0_30 = arith.constant 0 : index
    %110 = vector.load %arg3[%c0_29, %c0_30] : memref<128x128xbf16, #tpu.memory_space<vmem>>, vector<128x128xbf16>
    %cst_31 = arith.constant dense<0.000000e+00> : vector<16x128xf32>
    %111 = tpu.matmul %109, %110, %cst_31 {dimension_numbers = #tpu.dot_dimension_numbers<[1], [0], [0], [1], [0, 0, 1, 1], [], []>} : vector<16x128xbf16>, vector<128x128xbf16>, vector<16x128xf32> -> vector<16x128xf32>
    %112 = vector.shape_cast %7 : vector<128xf32> to vector<1x128xf32>
    %113 = vector.broadcast %112 : vector<1x128xf32> to vector<16x128xf32>
    %114 = arith.addf %111, %113 : vector<16x128xf32>
    %115 = arith.addf %1, %114 : vector<16x128xf32>
    %cst_32 = arith.constant dense<0.000000e+00> : vector<16xf32>
    %116 = vector.multi_reduction <add>, %115, %cst_32 [1] : vector<16x128xf32> to vector<16xf32>
    %117 = vector.shape_cast %116 : vector<16xf32> to vector<16x1xf32>
    %cst_33 = arith.constant 1.280000e+02 : f32
    %118 = vector.broadcast %cst_33 : f32 to vector<16x1xf32>
    %119 = arith.divf %117, %118 : vector<16x1xf32>
    %120 = vector.broadcast %119 : vector<16x1xf32> to vector<16x128xf32>
    %121 = arith.subf %115, %120 : vector<16x128xf32>
    %122 = arith.mulf %121, %121 : vector<16x128xf32>
    %cst_34 = arith.constant dense<0.000000e+00> : vector<16xf32>
    %123 = vector.multi_reduction <add>, %122, %cst_34 [1] : vector<16x128xf32> to vector<16xf32>
    %124 = vector.shape_cast %123 : vector<16xf32> to vector<16x1xf32>
    %cst_35 = arith.constant 1.280000e+02 : f32
    %125 = vector.broadcast %cst_35 : f32 to vector<16x1xf32>
    %126 = arith.divf %124, %125 : vector<16x1xf32>
    %cst_36 = arith.constant 9.99999974E-6 : f32
    %127 = vector.broadcast %cst_36 : f32 to vector<16x1xf32>
    %128 = arith.addf %126, %127 : vector<16x1xf32>
    %129 = math.rsqrt %128 : vector<16x1xf32>
    %130 = vector.broadcast %129 : vector<16x1xf32> to vector<16x128xf32>
    %131 = arith.mulf %121, %130 : vector<16x128xf32>
    %132 = vector.shape_cast %13 : vector<128xf32> to vector<1x128xf32>
    %133 = vector.broadcast %132 : vector<1x128xf32> to vector<16x128xf32>
    %134 = arith.mulf %131, %133 : vector<16x128xf32>
    %135 = vector.shape_cast %15 : vector<128xf32> to vector<1x128xf32>
    %136 = vector.broadcast %135 : vector<1x128xf32> to vector<16x128xf32>
    %137 = arith.addf %134, %136 : vector<16x128xf32>
    %138 = arith.truncf %137 : vector<16x128xf32> to vector<16x128xbf16>
    %c0_37 = arith.constant 0 : index
    %c0_38 = arith.constant 0 : index
    %139 = vector.load %arg4[%c0_37, %c0_38] : memref<128x256xbf16, #tpu.memory_space<vmem>>, vector<128x256xbf16>
    %cst_39 = arith.constant dense<0.000000e+00> : vector<16x256xf32>
    %140 = tpu.matmul %138, %139, %cst_39 {dimension_numbers = #tpu.dot_dimension_numbers<[1], [0], [0], [1], [0, 0, 1, 1], [], []>} : vector<16x128xbf16>, vector<128x256xbf16>, vector<16x256xf32> -> vector<16x256xf32>
    %141 = vector.shape_cast %9 : vector<256xf32> to vector<1x256xf32>
    %142 = vector.broadcast %141 : vector<1x256xf32> to vector<16x256xf32>
    %143 = arith.addf %140, %142 : vector<16x256xf32>
    %cst_40 = arith.constant 0.000000e+00 : f32
    %144 = vector.broadcast %cst_40 : f32 to vector<16x256xf32>
    %145 = arith.maximumf %143, %144 : vector<16x256xf32>
    %146 = arith.truncf %145 : vector<16x256xf32> to vector<16x256xbf16>
    %c0_41 = arith.constant 0 : index
    %c0_42 = arith.constant 0 : index
    %147 = vector.load %arg5[%c0_41, %c0_42] : memref<256x128xbf16, #tpu.memory_space<vmem>>, vector<256x128xbf16>
    %cst_43 = arith.constant dense<0.000000e+00> : vector<16x128xf32>
    %148 = tpu.matmul %146, %147, %cst_43 {dimension_numbers = #tpu.dot_dimension_numbers<[1], [0], [0], [1], [0, 0, 1, 1], [], []>} : vector<16x256xbf16>, vector<256x128xbf16>, vector<16x128xf32> -> vector<16x128xf32>
    %149 = vector.shape_cast %11 : vector<128xf32> to vector<1x128xf32>
    %150 = vector.broadcast %149 : vector<1x128xf32> to vector<16x128xf32>
    %151 = arith.addf %148, %150 : vector<16x128xf32>
    %152 = arith.addf %137, %151 : vector<16x128xf32>
    %cst_44 = arith.constant dense<0.000000e+00> : vector<16xf32>
    %153 = vector.multi_reduction <add>, %152, %cst_44 [1] : vector<16x128xf32> to vector<16xf32>
    %154 = vector.shape_cast %153 : vector<16xf32> to vector<16x1xf32>
    %cst_45 = arith.constant 1.280000e+02 : f32
    %155 = vector.broadcast %cst_45 : f32 to vector<16x1xf32>
    %156 = arith.divf %154, %155 : vector<16x1xf32>
    %157 = vector.broadcast %156 : vector<16x1xf32> to vector<16x128xf32>
    %158 = arith.subf %152, %157 : vector<16x128xf32>
    %159 = arith.mulf %158, %158 : vector<16x128xf32>
    %cst_46 = arith.constant dense<0.000000e+00> : vector<16xf32>
    %160 = vector.multi_reduction <add>, %159, %cst_46 [1] : vector<16x128xf32> to vector<16xf32>
    %161 = vector.shape_cast %160 : vector<16xf32> to vector<16x1xf32>
    %cst_47 = arith.constant 1.280000e+02 : f32
    %162 = vector.broadcast %cst_47 : f32 to vector<16x1xf32>
    %163 = arith.divf %161, %162 : vector<16x1xf32>
    %cst_48 = arith.constant 9.99999974E-6 : f32
    %164 = vector.broadcast %cst_48 : f32 to vector<16x1xf32>
    %165 = arith.addf %163, %164 : vector<16x1xf32>
    %166 = math.rsqrt %165 : vector<16x1xf32>
    %167 = vector.broadcast %166 : vector<16x1xf32> to vector<16x128xf32>
    %168 = arith.mulf %158, %167 : vector<16x128xf32>
    %169 = vector.shape_cast %17 : vector<128xf32> to vector<1x128xf32>
    %170 = vector.broadcast %169 : vector<1x128xf32> to vector<16x128xf32>
    %171 = arith.mulf %168, %170 : vector<16x128xf32>
    %172 = vector.shape_cast %19 : vector<128xf32> to vector<1x128xf32>
    %173 = vector.broadcast %172 : vector<1x128xf32> to vector<16x128xf32>
    %174 = arith.addf %171, %173 : vector<16x128xf32>
    %175 = arith.truncf %174 : vector<16x128xf32> to vector<16x128xbf16>
    %c0_49 = arith.constant 0 : index
    %c0_50 = arith.constant 0 : index
    %c0_51 = arith.constant 0 : index
    %176 = vector.load %arg7[%c0_49, %c0_50, %c0_51] : memref<1x16x128xbf16, #tpu.memory_space<vmem>>, vector<1x16x128xbf16>
    %177 = vector.shape_cast %176 : vector<1x16x128xbf16> to vector<16x128xbf16>
    %178 = vector.shape_cast %175 : vector<16x128xbf16> to vector<1x16x128xbf16>
    tpu.vector_store %arg7[%c0_49, %c0_50, %c0_51], %178 {strides = array<i32>} : memref<1x16x128xbf16, #tpu.memory_space<vmem>>, vector<1x16x128xbf16>,
    return
  }
  func.func @transform_0(%arg0: i32) -> (i32, i32, i32) {
    %c0_i32 = arith.constant 0 : i32
    %c0_i32_0 = arith.constant 0 : i32
    %c0_i32_1 = arith.constant 0 : i32
    return %arg0, %c0_i32, %c0_i32_0 : i32, i32, i32
  }
  func.func @transform_1(%arg0: i32) -> (i32, i32) {
    %c0_i32 = arith.constant 0 : i32
    %c0_i32_0 = arith.constant 0 : i32
    %c0_i32_1 = arith.constant 0 : i32
    return %c0_i32, %c0_i32_0 : i32, i32
  }
  func.func @transform_2(%arg0: i32) -> (i32, i32) {
    %c0_i32 = arith.constant 0 : i32
    %c0_i32_0 = arith.constant 0 : i32
    %c0_i32_1 = arith.constant 0 : i32
    return %c0_i32, %c0_i32_0 : i32, i32
  }
  func.func @transform_3(%arg0: i32) -> (i32, i32) {
    %c0_i32 = arith.constant 0 : i32
    %c0_i32_0 = arith.constant 0 : i32
    %c0_i32_1 = arith.constant 0 : i32
    return %c0_i32, %c0_i32_0 : i32, i32
  }
  func.func @transform_4(%arg0: i32) -> (i32, i32) {
    %c0_i32 = arith.constant 0 : i32
    %c0_i32_0 = arith.constant 0 : i32
    %c0_i32_1 = arith.constant 0 : i32
    return %c0_i32, %c0_i32_0 : i32, i32
  }
  func.func @transform_5(%arg0: i32) -> (i32, i32) {
    %c0_i32 = arith.constant 0 : i32
    %c0_i32_0 = arith.constant 0 : i32
    %c0_i32_1 = arith.constant 0 : i32
    return %c0_i32, %c0_i32_0 : i32, i32
  }
  func.func @transform_6(%arg0: i32) -> (i32, i32, i32) {
    %c0_i32 = arith.constant 0 : i32
    %c0_i32_0 = arith.constant 0 : i32
    %c0_i32_1 = arith.constant 0 : i32
    return %arg0, %c0_i32, %c0_i32_0 : i32, i32, i32
  }
}

</mosaic_0001>

<bundles_post_ra>
// kernel: tpu_custom_call.1
= control target key start
LH: loop header
LB: loop body
LE: loop exit
PB: predicated region body
PF: predicated region fallthrough
CT: control target
= control target key end

     0   :  { %11 = vsyncpa [#allocation4], 0  ;;  %s3018_s0 = inlined_call_operand.hbm [shape: f32[2,16,128], index: 0, kind: input, shape index: {}]   ;;  %s3019_s1 = inlined_call_operand.hbm [shape: bf16[128,384], index: 1, kind: input, shape index: {}]   ;;  %s3020_s2 = inlined_call_operand.hbm [shape: bf16[128,128], index: 2, kind: input, shape index: {}]   ;;  %s3021_s3 = inlined_call_operand.hbm [shape: bf16[128,256], index: 3, kind: input, shape index: {}]   ;;  %s3022_s4 = inlined_call_operand.hbm [shape: bf16[256,128], index: 4, kind: input, shape index: {}]   ;;  %s3023_s5 = inlined_call_operand.hbm [shape: f32[10,384], index: 5, kind: input, shape index: {}]   ;;  %s3024_s6 = inlined_call_operand.hbm [shape: bf16[2,16,128], index: 6, kind: output, shape index: {}]  }
   0x1   :  { %13 = vsyncpa [#allocation4 + $0x1], 0 }
   0x2   :  { %14 = vsyncpa [#allocation7], 0 }
   0x3   :  { %15 = vsyncpa [#allocation10], 0 }
   0x4   :  { %16 = vsyncpa [#allocation13], 0 }
   0x5   :  { %17 = vsyncpa [#allocation5], 0 }
   0x6   :  { %19 = vsyncpa [#allocation5 + $0x1], 0  ;;  %s2559_s21 = smov 0   ;;  %s2561_s22 = smov 0  }
   0x7   :  { %s2563_s23 = smov 0   ;;  %s2565_s24 = smov 0  }
   0x8 LB: > { %s2502_s25 = smov [#allocation6]   ;;  %s2580_s27 = sadd.s32 4294967295, %s2500_s24   ;;  %s2500_s24 = sphi %s2565_s24, %s3053_s24   ;;  %s2496_s23 = sphi %s2563_s23, %s3052_s23   ;;  %s2492_s22 = sphi %s2561_s22, %s3051_s22   ;;  %s2488_s21 = sphi %s2559_s21, %s3050_s21  }
   0x9   : > { %s199_s26 = sshll.u32 %s2502_s25, 4  ;;  %p1770_p0 = scmp.ge.s32.totalorder %s2500_s24, 1  ;;  %s2585_s26 = int_to_ptr.vmem [resolvable:$true] %s199_s26 }
   0xa   : > { %p3025_p1 = scmp.eq.s32.totalorder %s2580_s27, 0  ;;  %p187_p2 = scmp.lt.s32.totalorder %s2500_s24, 3 }
   0xb   : > { %s2503_s29 = smov [#allocation9]   ;;  %s2504_s8 = smov [#allocation8]  }
   0xc   : > { %p2587_p3 = pnand %p1770_p0, %p187_p2  ;;  %s225_s30 = sshll.u32 %s2503_s29, 4  ;;  %s2600_s30 = int_to_ptr.vmem [resolvable:$true] %s225_s30 }
   0xd   : > { %s2602_s9 = sshll.u32 %s2504_s8, 4  ;;  %s2252_s12 = scalar_lea.hbm %s3019_s1, 3072  ;;  %s213_s9 = int_to_ptr.vmem [resolvable:$true] %s2602_s9 }
   0xe   : > { %s3030_s28 = scalar_select %p2587_p3, 1, 0 }
   0xf   : > { %p2044_p5 = pneg %p2587_p3  ;;  %p2253_p7 = scmp.ne.s32.totalorder %s3019_s1, %s2252_s12 }
  0x10   : > { %p2259_p11 = scmp.lt.u32.totalorder %s2252_s12, %s3019_s1 }
  0x11   : > { %p2596_p6 = pnand %p2044_p5, %p3025_p1 }
  0x13   : > { %p2612_p8 = pneg %p2596_p6 }
  0x15   : > { %p2255_p9 = pnand %p2612_p8, %p2253_p7 }
  0x17   : > { %p2256_p10 = pneg %p2255_p9 }
  0x19   : > { %p2261_p12 = pnand %p2259_p11, %p2256_p10 }
  0x1b   : > { %2264 = shalt.err (!%p2261_p12)
}
  0x1c   : > { %s2265_s18 = scalar_lea.vmem %s2585_s26, 3072  ;;  %p2273_p5 = scmp.lt.s32.totalorder %s2585_s26, %s2585_s26 }
  0x1d   : > { %p2266_p13 = scmp.ne.s32.totalorder %s2585_s26, %s2265_s18  ;;  %p2274_p4 = scmp.lt.s32.totalorder %s2265_s18, %s2265_s18 }
  0x1f   : > { %p2268_p0 = pnand %p2266_p13, %p2612_p8  ;;  %p2275_p7 = por %p2274_p4, %p2273_p5 }
  0x21   : > { %p2269_p2 = pneg %p2268_p0 }
  0x23   : > { %p2276_p9 = pnand %p2275_p7, %p2269_p2 }
  0x25   : > { %2279 = shalt.err (!%p2276_p9)
}
  0x26   : > { %s2505_s19 = smov 192   ;;  %s2506_s20 = smov 12  }
  0x27   : > { %2047 = dma.hbm_to_vmem [thread:$0]  (!%p2596_p6), %s3019_s1, 3072, %s2585_s26, [#allocation7], %s2505_s19, %s2505_s19, %s2506_s20  }
  0x28   : > { %s2280_s11 = scalar_lea.hbm %s3021_s3, 2048 }
  0x29   : > { %p2281_p4 = scmp.ne.s32.totalorder %s3021_s3, %s2280_s11  ;;  %p2287_p12 = scmp.lt.u32.totalorder %s2280_s11, %s3021_s3 }
  0x2b   : > { %p2283_p10 = pnand %p2281_p4, %p2612_p8 }
  0x2d   : > { %p2284_p11 = pneg %p2283_p10 }
  0x2f   : > { %p2289_p13 = pnand %p2287_p12, %p2284_p11 }
  0x31   : > { %2292 = shalt.err (!%p2289_p13)
}
  0x32   : > { %s2293_s26 = scalar_lea.vmem %s2600_s30, 2048  ;;  %p2301_p7 = scmp.lt.s32.totalorder %s2600_s30, %s2600_s30 }
  0x33   : > { %p2294_p0 = scmp.ne.s32.totalorder %s2600_s30, %s2293_s26  ;;  %p2302_p9 = scmp.lt.s32.totalorder %s2293_s26, %s2293_s26 }
  0x35   : > { %p2296_p2 = pnand %p2294_p0, %p2612_p8  ;;  %p2303_p4 = por %p2302_p9, %p2301_p7 }
  0x37   : > { %p2297_p5 = pneg %p2296_p2 }
  0x39   : > { %p2304_p10 = pnand %p2303_p4, %p2297_p5 }
  0x3b   : > { %2307 = shalt.err (!%p2304_p10)
}
  0x3c   : > { %s3027_s17 = smov 128   ;;  %s3028_s18 = smov 8  }
  0x3d   : > { %2053 = dma.hbm_to_vmem [thread:$0]  (!%p2596_p6), %s3021_s3, 2048, %s2600_s30, [#allocation10], %s3027_s17, %s3027_s17, %s3028_s18  }
  0x3e   : > { %s2308_s8 = scalar_lea.hbm %s3020_s2, 1024 }
  0x3f   : > { %p2309_p11 = scmp.ne.s32.totalorder %s3020_s2, %s2308_s8  ;;  %p2315_p0 = scmp.lt.u32.totalorder %s2308_s8, %s3020_s2 }
  0x41   : > { %p2311_p12 = pnand %p2309_p11, %p2612_p8 }
  0x43   : > { %p2312_p13 = pneg %p2311_p12 }
  0x45   : > { %p2317_p2 = pnand %p2315_p0, %p2312_p13 }
  0x47   : > { %2320 = shalt.err (!%p2317_p2)
}
  0x48   : > { %s2321_s14 = scalar_lea.vmem %s213_s9, 1024  ;;  %p2329_p4 = scmp.lt.s32.totalorder %s213_s9, %s213_s9 }
  0x49   : > { %p2322_p5 = scmp.ne.s32.totalorder %s213_s9, %s2321_s14  ;;  %p2330_p10 = scmp.lt.s32.totalorder %s2321_s14, %s2321_s14 }
  0x4b   : > { %p2324_p7 = pnand %p2322_p5, %p2612_p8  ;;  %p2331_p1 = por %p2330_p10, %p2329_p4 }
  0x4d   : > { %p2325_p9 = pneg %p2324_p7 }
  0x4f   : > { %p2332_p3 = pnand %p2331_p1, %p2325_p9 }
  0x51   : > { %2335 = shalt.err (!%p2332_p3)
}
  0x52   : > { %s2509_s30 = smov 64   ;;  %s2510_s16 = smov 4  }
  0x53   : > { %2050 = dma.hbm_to_vmem [thread:$0]  (!%p2596_p6), %s3020_s2, 1024, %s213_s9, [#allocation7], %s2509_s30, %s2509_s30, %s2510_s16  }
  0x54   : > { %s2511_s20 = smov [#allocation11]   ;;  %s2512_s29 = smov [#allocation12]  }
  0x55   : > { %s238_s25 = sshll.u32 %s2511_s20, 4  ;;  %s251_s8 = sshll.u32 %s2512_s29, 4  ;;  %s239_s25 = int_to_ptr.vmem [resolvable:$true] %s238_s25  ;;  %s252_s8 = int_to_ptr.vmem [resolvable:$true] %s251_s8 }
  0x56   : > { %s2336_s12 = scalar_lea.hbm %s3022_s4, 2048 }
  0x57   : > { %p2337_p1 = scmp.ne.s32.totalorder %s3022_s4, %s2336_s12  ;;  %p2343_p12 = scmp.lt.u32.totalorder %s2336_s12, %s3022_s4 }
  0x59   : > { %p2339_p3 = pnand %p2337_p1, %p2612_p8 }
  0x5b   : > { %p2340_p11 = pneg %p2339_p3 }
  0x5d   : > { %p2345_p13 = pnand %p2343_p12, %p2340_p11 }
  0x5f   : > { %2348 = shalt.err (!%p2345_p13)
}
  0x60   : > { %s2349_s9 = scalar_lea.vmem %s239_s25, 2048  ;;  %p2357_p7 = scmp.lt.s32.totalorder %s239_s25, %s239_s25 }
  0x61   : > { %p2350_p0 = scmp.ne.s32.totalorder %s239_s25, %s2349_s9  ;;  %p2358_p9 = scmp.lt.s32.totalorder %s2349_s9, %s2349_s9 }
  0x63   : > { %p2352_p2 = pnand %p2350_p0, %p2612_p8  ;;  %p2359_p4 = por %p2358_p9, %p2357_p7 }
  0x65   : > { %p2353_p5 = pneg %p2352_p2 }
  0x67   : > { %p2360_p10 = pnand %p2359_p4, %p2353_p5 }
  0x69   : > { %2363 = shalt.err (!%p2360_p10)
}
  0x6a   : > { %2056 = dma.hbm_to_vmem [thread:$0]  (!%p2596_p6), %s3022_s4, 2048, %s239_s25, [#allocation10], %s2509_s30, %s2509_s30, %s2510_s16  }
  0x6b   : > { %s2364_s20 = scalar_lea.hbm %s3023_s5, 768 }
  0x6c   : > { %p2365_p1 = scmp.ne.s32.totalorder %s3023_s5, %s2364_s20  ;;  %p2371_p12 = scmp.lt.u32.totalorder %s2364_s20, %s3023_s5 }
  0x6e   : > { %p2367_p3 = pnand %p2365_p1, %p2612_p8 }
  0x70   : > { %p2368_p11 = pneg %p2367_p3 }
  0x72   : > { %p2373_p13 = pnand %p2371_p12, %p2368_p11 }
  0x74   : > { %2376 = shalt.err (!%p2373_p13)
}
  0x75   : > { %s2377_s13 = scalar_lea.vmem %s252_s8, 768  ;;  %p2385_p7 = scmp.lt.s32.totalorder %s252_s8, %s252_s8 }
  0x76   : > { %p2378_p0 = scmp.ne.s32.totalorder %s252_s8, %s2377_s13  ;;  %p2386_p9 = scmp.lt.s32.totalorder %s2377_s13, %s2377_s13 }
  0x78   : > { %p2380_p2 = pnand %p2378_p0, %p2612_p8  ;;  %p2387_p4 = por %p2386_p9, %p2385_p7 }
  0x7a   : > { %p2381_p5 = pneg %p2380_p2 }
  0x7c   : > { %p2388_p10 = pnand %p2387_p4, %p2381_p5 }
  0x7e   : > { %2391 = shalt.err (!%p2388_p10)
}
  0x7f   : > { %s2513_s30 = smov 384   ;;  %s2514_s15 = smov 24  }
  0x80   : > { %2059 = dma.hbm_to_vmem [thread:$0]  (!%p2596_p6), %s3023_s5, 768, %s252_s8, [#allocation13], %s2513_s30, %s2513_s30, %s2514_s15  }
  0x81   : > { %s1769_s14 = sadd.s32 4294967294, %s2500_s24   ;;  %s2716_s9 = sadd.s32 1, %s2500_s24  }
  0x82   : > { %s32_s26 = sadd.s32 1, %s2496_s23  ;;  %s29_s19 = ssub.s32 %s2500_s24, %s2716_s9 }
  0x83   : > { %p39_p8 = scmp.ne.s32.totalorder %s2496_s23, %s2492_s22  ;;  %p30_p1 = scmp.eq.s32.totalorder %s29_s19, 0 }
  0x84   : > { %p40_p3 = scmp.eq.s32.totalorder %s2500_s24, 0  ;;  %p45_p11 = scmp.ne.s32.totalorder %s2492_s22, %s2488_s21 }
  0x85   : > { %p174_p12 = scmp.eq.s32.totalorder %s2580_s27, 1  ;;  %p3033_p0 = scmp.eq.s32.totalorder %s2580_s27, 0 }
  0x86   : > { %s2728_s17 = scalar_select %p30_p1, %s2496_s23, %s32_s26  }
  0x87   : > { %p41_p13 = por %p40_p3, %p39_p8  ;;  %p2732_p2 = por %p3033_p0, %p45_p11 }
  0x88   : > { %p2736_p6 = por %p174_p12, %p39_p8  ;;  %p180_p5 = scmp.eq.s32.totalorder %s1769_s14, 1 }
  0x89   : > { %p2073_p7 = scmp.lt.s32.totalorder %s2500_s24, 2  ;;  %s265_s18 = sand.u32 1, %s2496_s23  }
  0x8a   : > { %s3035_s8 = scalar_select %p2736_p6, 1, 0 }
  0x8b   : > { %p2742_p9 = por %p180_p5, %p45_p11  ;;  %s1777_s29 = sshll.u32 %s265_s18, 4 }
  0x8c   : > { %s1867_s10 = sshll.u32 %s2500_s24, 8  ;;  %s269_s30 = scalar_lea.vmem [#allocation3], %s1777_s29 }
  0x8d   : > { %s3036_s20 = scalar_select %p2742_p9, 1, 0 }
  0x8e   : > { %s2750_s13 = scalar_lea.hbm %s3018_s0, %s1867_s10  ;;  %s276_s15 = sshll.u32 %s269_s30, 4  ;;  %s2756_s15 = int_to_ptr.vmem [resolvable:$true] %s276_s15 }
  0x8f   : > { %p2752_p4 = pnand %p2073_p7, %p41_p13  ;;  %s2758_s25 = scalar_lea.sflag [#allocation4], %s265_s18 }
  0x90   : > { %s2392_s14 = scalar_lea.hbm %s2750_s13, 256  ;;  %s2397_s29 = scalar_lea.hbm %s3018_s0, 512 }
  0x91   : > { %p2393_p10 = scmp.ne.s32.totalorder %s2750_s13, %s2392_s14  ;;  %p2394_p8 = pneg %p2752_p4 }
  0x92   : > { %p2398_p11 = scmp.lt.u32.totalorder %s2750_s13, %s3018_s0  ;;  %p2399_p12 = scmp.lt.u32.totalorder %s2397_s29, %s2392_s14 }
  0x93   : > { %p2395_p1 = pnand %p2394_p8, %p2393_p10  ;;  %p2401_p0 = scmp.lt.u32.totalorder %s2392_s14, %s2750_s13 }
  0x94   : > { %p2400_p13 = por %p2399_p12, %p2398_p11 }
  0x95   : > { %p2396_p3 = pneg %p2395_p1 }
  0x96   : > { %p2402_p5 = por %p2401_p0, %p2400_p13 }
  0x98   : > { %p2403_p7 = pnand %p2402_p5, %p2396_p3 }
  0x9a   : > { %2406 = shalt.err (!%p2403_p7)
}
  0x9b   : > { %s2407_s18 = scalar_lea.vmem %s2756_s15, 256  ;;  %s2515_s12 = smov [#allocation3]  }
  0x9c   : > { %p2408_p10 = scmp.ne.s32.totalorder %s2756_s15, %s2407_s18  ;;  %s2412_s30 = sshll.u32 %s2515_s12, 4  ;;  %s2413_s30 = int_to_ptr.vmem [resolvable:$false] %s2412_s30 }
  0x9d   : > { %s2414_s26 = scalar_lea.vmem %s2413_s30, 512  ;;  %p2415_p6 = scmp.lt.s32.totalorder %s2756_s15, %s2413_s30 }
  0x9e   : > { %p2410_p1 = pnand %p2408_p10, %p2394_p8  ;;  %p2416_p11 = scmp.lt.s32.totalorder %s2414_s26, %s2407_s18 }
  0xa0   : > { %p2411_p9 = pneg %p2410_p1  ;;  %p2417_p12 = por %p2416_p11, %p2415_p6 }
  0xa2   : > { %p2418_p13 = pnand %p2417_p12, %p2411_p9 }
  0xa4   : > { %2421 = shalt.err (!%p2418_p13)
}
  0xa5   : > { %s3038_s14 = smov 8   ;;  %s3039_s19 = smov 128  }
  0xa6   : > { %2063 = dma.hbm_to_vmem [thread:$0]  (!%p2752_p4), %s2750_s13, 256, %s2756_s15, %s2758_s25, %s3039_s19, %s3039_s19, %s3038_s14  }
  0xa7   : > { %p3040_p8 = scmp.ne.s32.totalorder %s3030_s28, 0 }
  0xa8   : > { %s2792_s29 = sand.u32 (!%p3040_p8), 1, %s2492_s22  }
  0xa9   : > { %288 = sbr.rel (%p3040_p8) target bundleno = 2865 (0xb31), region = 44  ;;  %s1781_s10 = sshll.u32 (!%p3040_p8), %s2792_s29, 4 }
  0xaa   : > { %s291_s11 = scalar_lea.sflag (!%p3040_p8), [#allocation4], %s2792_s29  ;;  %s2796_s18 = scalar_lea.vmem (!%p3040_p8), [#allocation3], %s1781_s10 }
  0xb0   : > { %2467 = dma.done.wait (%p2732_p2), %s291_s11, 256  }
  0xb1   : > { %2469 = vsyncadd (%p2732_p2), %s291_s11, 4294967040  ;;  %p3041_p6 = scmp.eq.s32.totalorder %s2580_s27, 0 }
  0xb3   : > { %2471 = dma.done.wait (%p3041_p6), [#allocation7], 4096   ;;  %p3042_p9 = pmov %p3041_p6 }
  0xb4   : > { %p3043_p4 = pmov %p3041_p6 }
  0xb5   : > { %2473 = vsyncadd (%p3042_p9), [#allocation7], 4294963200 }
  0xb6   : > { %2475 = dma.done.wait (%p3043_p4), [#allocation10], 4096   ;;  %p3044_p3 = pmov %p3043_p4 }
  0xb8   : > { %2477 = vsyncadd (%p3044_p3), [#allocation10], 4294963200  ;;  %p3045_p0 = pmov %p3044_p3 }
  0xba   : > { %2479 = dma.done.wait (%p3045_p0), [#allocation13], 768   ;;  %p3046_p5 = pmov %p3045_p0 }
  0xbb   : > { %v2516_v0 = vmov 0   ;;  %v2517_v1 = vmov 0.0   ;;  %v2132_v2 = vld [vmem:[#allocation6 + $0x4] ss:$12 sps:$4 sm:$0xff]   ;;  %v2134_v3 = vld [vmem:[#allocation6] ss:$12 sps:$4 sm:$0xff]   ;;  %v382_v29 = vlaneseq }
  0xbc   : > { %2481 = vsyncadd (%p3046_p5), [#allocation13], 4294966528  ;;  %554 = vmatprep.mubr.bf16.mxu0 %v2516_v0  ;;  %1932 = vmatprep.subr.bf16.mxu1 %v2517_v1  ;;  %v2135_v4 = vld [vmem:[#allocation6 + $0x1c] ss:$12 sps:$4 sm:$0xff]   ;;  %v2137_v5 = vld [vmem:[#allocation6 + $0x18] ss:$12 sps:$4 sm:$0xff]  }
  0xbd   : > { %522 = vmatprep.subr.bf16.mxu0 %v2132_v2  ;;  %v2138_v6 = vld [vmem:[#allocation6 + $0x34] ss:$12 sps:$4 sm:$0xff]   ;;  %v2140_v7 = vld [vmem:[#allocation6 + $0x30] ss:$12 sps:$4 sm:$0xff]   ;;  %v2141_v8 = vld [vmem:[#allocation6 + $0x4c] ss:$12 sps:$4 sm:$0xff]  }
  0xbe   : > { %523 = vmatpush1.bf16.msra.mxu0 %v2134_v3  ;;  %v2143_v9 = vld [vmem:[#allocation6 + $0x48] ss:$12 sps:$4 sm:$0xff]   ;;  %v2144_v10 = vld [vmem:[#allocation6 + $0x64] ss:$12 sps:$4 sm:$0xff]   ;;  %v2157_v12 = vld [vmem:[#allocation6 + $0x20] ss:$12 sps:$4 sm:$0xff]  }
  0xbf   : > { %524 = vmatprep.subr.bf16.mxu0 %v2135_v4  ;;  %v2156_v11 = vld [vmem:[#allocation6 + $0x8] ss:$12 sps:$4 sm:$0xff]   ;;  %v2146_v13 = vld [vmem:[#allocation6 + $0x60] ss:$12 sps:$4 sm:$0xff]   ;;  %v2149_v15 = vld [vmem:[#allocation6 + $0x78] ss:$12 sps:$4 sm:$0xff]  }
  0xc0   : > { %1933 = vmatpush3.bf16.msra.mxu1 %v2156_v11  ;;  %v2147_v14 = vld [vmem:[#allocation6 + $0x7c] ss:$12 sps:$4 sm:$0xff]   ;;  %v2150_v16 = vld [vmem:[#allocation6 + $0x94] ss:$12 sps:$4 sm:$0xff]   ;;  %v2158_v17 = vld [vmem:[#allocation6 + $0x38] ss:$12 sps:$4 sm:$0xff]  }
  0xc1   : > { %1934 = vmatprep.subr.bf16.mxu1 %v2517_v1  ;;  %v2159_v18 = vld [vmem:[#allocation6 + $0x50] ss:$12 sps:$4 sm:$0xff]   ;;  %v2153_v20 = vld [vmem:[#allocation6 + $0xac] ss:$12 sps:$4 sm:$0xff]   ;;  %v2160_v21 = vld [vmem:[#allocation6 + $0x68] ss:$12 sps:$4 sm:$0xff]  }
  0xc2   : > { %525 = vmatpush1.bf16.msra.mxu0 %v2137_v5  ;;  %v2152_v19 = vld [vmem:[#allocation6 + $0x90] ss:$12 sps:$4 sm:$0xff]   ;;  %v2155_v22 = vld [vmem:[#allocation6 + $0xa8] ss:$12 sps:$4 sm:$0xff]   ;;  %v2161_v25 = vld [vmem:[#allocation6 + $0x80] ss:$12 sps:$4 sm:$0xff]  }
  0xc3   : > { %526 = vmatprep.subr.bf16.mxu0 %v2138_v6  ;;  %v2820_v23 = vld [vmem:[%s2796_s18] sm:$0xff]  ;;  %v2823_v24 = vld [vmem:[%s2796_s18 + $0x8] sm:$0xff]  ;;  %vm2518_vm0 = vmmov 0   ;;  %v2839_v30 = vshrl.u32 %v382_v29, 7  ;;  %vm609_vm1 = vcmask 261120   ;;  %s2519_s28 = smov 96  }
  0xc4   : > { %1935 = vmatpush3.bf16.msra.mxu1 %v2157_v12  ;;  %v346_v26 = vpack.c.bf16 %v2823_v24, %v2820_v23  ;;  %v2162_v27 = vld [vmem:[#allocation6 + $0x98] ss:$12 sps:$4 sm:$0xff]   ;;  %v2163_v28 = vld [vmem:[#allocation6 + $0xb0] ss:$12 sps:$4 sm:$0xff]   ;;  %1948 = vmatprep.mubr.msk.bf16.mxu1 %vm2518_vm0, %v2517_v1  ;;  %v2844_v33 = vld [vmem:[#allocation12 + $0x8] sm:$0xff]  ;;  %s2520_s7 = smov 64  }
  0xc5   : > { %1936 = vmatprep.subr.bf16.mxu1 %v2517_v1  ;;  %v384_v31 = vsub.s32 0, %v2839_v30  ;;  %v2842_v32 = vld [vmem:[#allocation12] sm:$0xff]  ;;  %s2521_s13 = smov 32   ;;  %v349_v47 = vld [vmem:[#allocation12 + $0x10] sm:$0xff]  ;;  %vm657_vm2 = vcmask 130048   ;;  %vm856_vm3 = vcmask 523520  }
  0xc6   : > { %527 = vmatpush1.bf16.msra.mxu0 %v2140_v7  ;;  %vm984_vm4 = vcmask 785920   ;;  %vm1112_vm5 = vcmask 1048320   ;;  %s1787_s15 = sshll.u32 %s2792_s29, 3  ;;  %s1870_s16 = sshll.u32 %s2580_s27, 7 }
  0xc7   : > { %528 = vmatprep.subr.bf16.mxu0 %v2141_v8  ;;  %v385_v34 = vrot.slane %v2842_v32, %v384_v31  ;;  %v389_v36 = vrot.slane %v2844_v33, %v384_v31  ;;  %v393_v48 = vrot.slane %v349_v47, %v384_v31  ;;  %s342_s25 = scalar_lea.vmem [#allocation14], %s1787_s15  ;;  %s2970_s14 = scalar_lea.hbm %s3024_s6, %s1870_s16 }
  0xc8   : > { %1937 = vmatpush3.bf16.msra.mxu1 %v2158_v17  ;;  %s1648_s12 = sshll.u32 %s342_s25, 4  ;;  %s1635_s19 = scalar_lea.sflag [#allocation5], %s2792_s29  ;;  %s2972_s12 = int_to_ptr.vmem [resolvable:$true] %s1648_s12 }
  0xc9   : > { %1938 = vmatprep.subr.bf16.mxu1 %v2517_v1  ;;  %s2422_s10 = scalar_lea.vmem %s2972_s12, 128  ;;  %p3047_p7 = scmp.ne.s32.totalorder %s3035_s8, 0 }
  0xca   : > { %529 = vmatpush1.bf16.msra.mxu0 %v2143_v9  ;;  %p2423_p2 = scmp.ne.s32.totalorder %s2972_s12, %s2422_s10  ;;  %s2522_s27 = smov [#allocation14]  }
  0xcb   : > { %530 = vmatprep.subr.bf16.mxu0 %v2144_v10  ;;  %s2426_s11 = sshll.u32 %s2522_s27, 4  ;;  %s2427_s11 = int_to_ptr.vmem [resolvable:$false] %s2426_s11 }
  0xcc   : > { %1939 = vmatpush3.bf16.msra.mxu1 %v2159_v18  ;;  %p2424_p10 = pnand %p2423_p2, %p3047_p7  ;;  %s2428_s18 = scalar_lea.vmem %s2427_s11, 256 }
  0xcd   : > { %1940 = vmatprep.subr.bf16.mxu1 %v2517_v1  ;;  %p2429_p11 = scmp.lt.s32.totalorder %s2972_s12, %s2427_s11  ;;  %p2430_p12 = scmp.lt.s32.totalorder %s2428_s18, %s2422_s10 }
  0xce   : > { %531 = vmatpush1.bf16.msra.mxu0 %v2146_v13  ;;  %p2425_p1 = pneg %p2424_p10 }
  0xcf   : > { %532 = vmatprep.subr.bf16.mxu0 %v2147_v14  ;;  %p2431_p13 = por %p2430_p12, %p2429_p11 }
  0xd0   : > { %1941 = vmatpush3.bf16.msra.mxu1 %v2160_v21 }
  0xd1   : > { %1942 = vmatprep.subr.bf16.mxu1 %v2517_v1  ;;  %p2432_p8 = pnand %p2431_p13, %p2425_p1 }
  0xd2   : > { %533 = vmatpush1.bf16.msra.mxu0 %v2149_v15 }
  0xd3   : > { %534 = vmatprep.subr.bf16.mxu0 %v2150_v16 }
  0xd4   : > { %1943 = vmatpush3.bf16.msra.mxu1 %v2161_v25 }
  0xd5   : > { %1944 = vmatprep.subr.bf16.mxu1 %v2517_v1 }
  0xd6   : > { %535 = vmatpush1.bf16.msra.mxu0 %v2152_v19 }
  0xd7   : > { %536 = vmatprep.subr.bf16.mxu0 %v2153_v20 }
  0xd8   : > { %1945 = vmatpush3.bf16.msra.mxu1 %v2162_v27 }
  0xd9   : > { %1946 = vmatprep.subr.bf16.mxu1 %v2517_v1 }
  0xda   : > { %537 = vmatpush1.bf16.msra.mxu0 %v2155_v22 }
  0xdb   : > { %1976 = vmatprep.subr.bf16.mxu0 %v2517_v1 }
  0xdc   : > { %1947 = vmatpush3.bf16.msra.mxu1 %v2163_v28 }
  0xdd   : > { %555 = vmatmul.mubr.bf16.vlgmr.msra.gmra.mrb[0].mxu0 %v346_v26  ;;  %1952 = vmatprep.subr.bf16.mxu1 %v2517_v1 }
  0xde   : > { %1978 = vmatprep.mubr.msk.bf16.mxu0 %vm2518_vm0, %v2517_v1 }
  0xdf   : > { %1949 = vmatmul.mubr.bf16.vlgmr.msra.gmra.mrb[0].mxu1 %v346_v26 }
  0xe0   : > { %1954 = vmatprep.mubr.msk.bf16.mxu1 %vm2518_vm0, %v2517_v1 }
 0x1b0   : > { %v556_v35 = vpop.f32.mrb[0].mxu0 }
 0x1b1   : > { %v558_v37 = vpop.f32.mrb[1].mxu0  ;;  %v557_v39 = vadd.f32 %v556_v35, %v385_v34 }
 0x1b2   : > { %v560_v38 = vpop.f32.mrb[2].mxu0  ;;  %v559_v42 = vadd.f32 %v558_v37, %v389_v36  ;;  %v599_v49 = vpop.f32.mrb[0].mxu1 }
 0x1b3   : > { %v561_v40 = vadd.f32 %v560_v38, %v385_v34  ;;  %v562_v41 = vpop.f32.mrb[3].mxu0  ;;  %v600_v50 = vadd.f32 %v599_v49, %v393_v48  ;;  %v1950_v51 = vpop.f32.mrb[1].mxu1 }
 0x1b4   : > { %v563_v43 = vadd.f32 %v562_v41, %v389_v36  ;;  %v602_v52 = vpop.f32.mrb[2].mxu1 }
 0x1b5   : > { %v606_v44 = vpack.c.bf16 %v561_v40, %v557_v39  ;;  %v603_v53 = vadd.f32 %v602_v52, %v393_v48  ;;  %v1951_v54 = vpop.f32.mrb[3].mxu1 }
 0x1b6   : > { %v607_v45 = vpack.c.bf16 %v563_v43, %v559_v42 }
 0x1b7   : > { %v2858_v55 = vpack.c.bf16 %v603_v53, %v600_v50 }
 0x1b8   : > { %731 = vrot.lane.b32.xlu1 %v607_v45, %s2519_s28  ;;  %v614_v46 = vsel %vm609_vm1, %v607_v45, 0 }
 0x1b9   : > { %1953 = vmatpush3.bf16.xpose.msra.mxu1 %v614_v46 }
 0x1ba   : > { %1958 = vmatprep.subr.bf16.mxu1 %v2517_v1 }
 0x1bc   : > { %728 = vrot.lane.b32.xlu1 %v606_v44, %s2519_s28 }
 0x1c0   : > { %858 = vrot.lane.b32.xlu1 %v606_v44, %s2520_s7  ;;  %1955 = vmatmul.mubr.msk.bf16.vlgmr.msra.gmra.mrb[4].mxu1 %vm609_vm1, %v606_v44 }
 0x1c1   : > { %1960 = vmatprep.mubr.msk.bf16.mxu1 %vm2518_vm0, %v2517_v1  ;;  %1959 = vmatpush3.bf16.msra.mxu1 %v2858_v55 }
 0x1c2   : > { %1964 = vmatprep.subr.bf16.mxu1 %v2517_v1 }
 0x1c4   : > { %988 = vrot.lane.b32.xlu1 %v607_v45, %s2521_s13 }
 0x1c8   : > { %986 = vrot.lane.b32.xlu1 %v606_v44, %s2521_s13 }
 0x22a   : > { %v732_v62 = vpop.permute.xlu1 %731 }
 0x22b   : > { %v737_v16 = vsel %vm609_vm1, %v732_v62, 0 }
 0x22e   : > { %v729_v3 = vpop.permute.xlu1 %728 }
 0x232   : > { %v859_v8 = vpop.permute.xlu1 %858 }
 0x236   : > { %v989_v11 = vpop.permute.xlu1 %988 }
 0x237   : > { %v994_v12 = vsel %vm609_vm1, %v989_v11, 0 }
 0x23a   : > { %v987_v17 = vpop.permute.xlu1 %986 }
 0x293   : > { %v650_v56 = vpop.f32.mrb[4].mxu1 }
 0x294   : > { %v1956_v57 = vpop.f32.mrb[5].mxu1  ;;  %v658_v58 = vsel %vm657_vm2, %v650_v56, -inf }
 0x295   : > { %659 = vmax.xlane.f32.xlu0 %v658_v58  ;;  %v653_v59 = vpop.f32.mrb[6].mxu1 }
 0x296   : > { %v1957_v60 = vpop.f32.mrb[7].mxu1  ;;  %v661_v61 = vsel %vm657_vm2, %v653_v59, -inf }
 0x299   : > { %662 = vmax.xlane.f32.xlu0 %v661_v61 }
 0x2af   : > { %860 = vrot.lane.b32.xlu0 %v607_v45, %s2520_s7 }
 0x322   : > { %v660_v63 = vpop.xlane.xlu0 %659 }
 0x323   : > { %v664_v2 = vsub.f32 %v650_v56, %v660_v63 }
 0x325   : > { %v666_v4 = vmul.f32 1.442695, %v664_v2 }
 0x326   : > { %v663_v5 = vpop.xlane.xlu0 %662 }
 0x327   : > { %v665_v6 = vsub.f32 %v653_v59, %v663_v5  ;;  %2212 = vpow2.f32 %v666_v4 }
 0x329   : > { %v668_v7 = vmul.f32 1.442695, %v665_v6 }
 0x32a   : > { %v861_v9 = vpop.permute.xlu0 %860 }
 0x32b   : > { %2214 = vpow2.f32 %v668_v7  ;;  %v866_v10 = vsel %vm609_vm1, %v861_v9, 0 }
 0x32c   : > { %1977 = vmatpush3.bf16.xpose.msra.mxu0 %v866_v10 }
 0x32d   : > { %1988 = vmatprep.subr.bf16.mxu0 %v2517_v1 }
 0x331   : > { %v2869_v13 = vpop.eup %2212 }
 0x333   : > { %1979 = vmatmul.mubr.msk.bf16.vlgmr.msra.gmra.mrb[4].mxu0 %vm609_vm1, %v859_v8 }
 0x334   : > { %1989 = vmatpush3.bf16.xpose.msra.mxu0 %v994_v12  ;;  %1990 = vmatprep.mubr.msk.bf16.mxu0 %vm2518_vm0, %v2517_v1 }
 0x335   : > { %v2873_v14 = vpop.eup %2214  ;;  %2000 = vmatprep.subr.bf16.mxu0 %v2517_v1 }
 0x336   : > { %v676_v15 = vpack.c.bf16 %v2873_v14, %v2869_v13 }
 0x338   : > { %1961 = vmatmul.mubr.msk.bf16.vlgmr.msra.gmra.mrb[8].mxu1 %vm657_vm2, %v676_v15 }
 0x339   : > { %1965 = vmatpush3.bf16.xpose.msra.mxu1 %v737_v16  ;;  %1966 = vmatprep.mubr.msk.bf16.mxu1 %vm2518_vm0, %v2517_v1 }
 0x33a   : > { %1970 = vmatprep.subr.bf16.mxu1 %v2517_v1 }
 0x33b   : > { %1991 = vmatmul.mubr.msk.bf16.vlgmr.msra.gmra.mrb[8].mxu0 %vm609_vm1, %v987_v17 }
 0x33c   : > { %2016 = vmatprep.mubr.msk.bf16.mxu0 %vm2518_vm0, %v2517_v1 }
 0x340   : > { %1967 = vmatmul.mubr.msk.bf16.vlgmr.msra.gmra.mrb[12].mxu1 %vm609_vm1, %v729_v3 }
 0x341   : > { %1972 = vmatprep.mubr.msk.bf16.mxu1 %vm2518_vm0, %v2517_v1 }
 0x406   : > { %v902_v18 = vpop.f32.mrb[4].mxu0 }
 0x407   : > { %v1980_v19 = vpop.f32.mrb[5].mxu0  ;;  %v909_v20 = vsel %vm657_vm2, %v902_v18, -inf }
 0x408   : > { %910 = vmax.xlane.f32.xlu1 %v909_v20  ;;  %v905_v21 = vpop.f32.mrb[6].mxu0  ;;  %v673_v20 = vsel %vm657_vm2, %v2873_v14, 0.0 }
 0x409   : > { %v1981_v22 = vpop.f32.mrb[7].mxu0  ;;  %v912_v26 = vsel %vm657_vm2, %v905_v21, -inf }
 0x40b   : > { %v2890_v25 = vpop.f32.mrb[8].mxu1 }
 0x40c   : > { %913 = vmax.xlane.f32.xlu1 %v912_v26  ;;  %v1962_v27 = vpop.f32.mrb[9].mxu1  ;;  %v2164_v26 = vld [vmem:[#allocation8] sm:$0xff]  }
 0x40d   : > { %v2893_v28 = vpop.f32.mrb[10].mxu1  ;;  %2001 = vmatpush3.bf16.msra.mxu0 %v2164_v26  ;;  %v2165_v27 = vld [vmem:[#allocation8 + $0x8] sm:$0xff]  }
 0x40e   : > { %v1963_v29 = vpop.f32.mrb[11].mxu1  ;;  %v1030_v31 = vpop.f32.mrb[8].mxu0  ;;  %2002 = vmatprep.subr.bf16.mxu0 %v2517_v1 }
 0x40f   : > { %v1992_v34 = vpop.f32.mrb[9].mxu0  ;;  %v1037_v35 = vsel %vm657_vm2, %v1030_v31, -inf }
 0x410   : > { %1038 = vmax.xlane.f32.xlu0 %v1037_v35  ;;  %v1033_v36 = vpop.f32.mrb[10].mxu0 }
 0x411   : > { %v1993_v37 = vpop.f32.mrb[11].mxu0  ;;  %v1040_v38 = vsel %vm657_vm2, %v1033_v36, -inf  ;;  %2003 = vmatpush3.bf16.msra.mxu0 %v2165_v27 }
 0x412   : > { %1041 = vmax.xlane.f32.xlu1 %v1040_v38  ;;  %2004 = vmatprep.subr.bf16.mxu0 %v2517_v1 }
 0x413   : > { %v773_v39 = vpop.f32.mrb[12].mxu1 }
 0x414   : > { %v1968_v40 = vpop.f32.mrb[13].mxu1  ;;  %v780_v41 = vsel %vm657_vm2, %v773_v39, -inf }
 0x415   : > { %v776_v42 = vpop.f32.mrb[14].mxu1 }
 0x416   : > { %781 = vmax.xlane.f32.xlu1 %v780_v41  ;;  %v1969_v43 = vpop.f32.mrb[15].mxu1  ;;  %v783_v44 = vsel %vm657_vm2, %v776_v42, -inf }
 0x417   : > { %784 = vmax.xlane.f32.xlu0 %v783_v44  ;;  %v2167_v43 = vld [vmem:[#allocation8 + $0x18] sm:$0xff]  }
 0x427   : > { %928 = vrot.lane.b32.xlu1 %v2858_v55, %s2520_s7 }
 0x42b   : > { %1056 = vrot.lane.b32.xlu1 %v2858_v55, %s2521_s13 }
 0x42d   : > { %800 = vrot.lane.b32.xlu0 %v2858_v55, %s2519_s28 }
 0x495   : > { %v911_v45 = vpop.xlane.xlu1 %910 }
 0x496   : > { %v915_v46 = vsub.f32 %v902_v18, %v911_v45 }
 0x498   : > { %v917_v47 = vmul.f32 1.442695, %v915_v46 }
 0x499   : > { %v914_v48 = vpop.xlane.xlu1 %913 }
 0x49a   : > { %2216 = vpow2.f32 %v917_v47  ;;  %v916_v49 = vsub.f32 %v905_v21, %v914_v48  ;;  %v670_v21 = vsel %vm657_vm2, %v2869_v13, 0.0  ;;  %v2168_v47 = vld [vmem:[#allocation8 + $0x20] sm:$0xff]  }
 0x49c   : > { %v919_v50 = vmul.f32 1.442695, %v916_v49 }
 0x49d   : > { %v1039_v51 = vpop.xlane.xlu0 %1038 }
 0x49e   : > { %2218 = vpow2.f32 %v919_v50  ;;  %v1043_v52 = vsub.f32 %v1030_v31, %v1039_v51  ;;  %v2169_v51 = vld [vmem:[#allocation8 + $0x28] sm:$0xff]  }
 0x49f   : > { %v1042_v53 = vpop.xlane.xlu1 %1041 }
 0x4a0   : > { %v1045_v54 = vmul.f32 1.442695, %v1043_v52  ;;  %v1044_v56 = vsub.f32 %v1033_v36, %v1042_v53 }
 0x4a2   : > { %v1047_v57 = vmul.f32 1.442695, %v1044_v56  ;;  %2220 = vpow2.f32 %v1045_v54 }
 0x4a3   : > { %v782_v58 = vpop.xlane.xlu1 %781 }
 0x4a4   : > { %v2217_v59 = vpop.eup %2216  ;;  %2222 = vpow2.f32 %v1047_v57  ;;  %v786_v60 = vsub.f32 %v773_v39, %v782_v58  ;;  %v785_v55 = vpop.xlane.xlu0 %784 }
 0x4a5   : > { %v787_v61 = vsub.f32 %v776_v42, %v785_v55  ;;  %v921_v62 = vsel %vm657_vm2, %v2217_v59, 0.0  ;;  %v2166_v42 = vld [vmem:[#allocation8 + $0x10] sm:$0xff]  }
 0x4a6   : > { %v788_v63 = vmul.f32 1.442695, %v786_v60  ;;  %922 = vadd.xlane.f32.xlu0 %v921_v62  ;;  %2005 = vmatpush3.bf16.msra.mxu0 %v2166_v42  ;;  %v2170_v60 = vld [vmem:[#allocation8 + $0x30] sm:$0xff]   ;;  %v2171_v62 = vld [vmem:[#allocation8 + $0x38] sm:$0xff]  }
 0x4a7   : > { %v790_v2 = vmul.f32 1.442695, %v787_v61  ;;  %v929_v17 = vpop.permute.xlu1 %928  ;;  %2006 = vmatprep.subr.bf16.mxu0 %v2517_v1  ;;  %v2183_v42 = vld [vmem:[#allocation9 + $0x34] ss:$8 sps:$4 sm:$0xff]  }
 0x4a8   : > { %v2219_v3 = vpop.eup %2218  ;;  %2224 = vpow2.f32 %v788_v63  ;;  %v801_v4 = vpop.permute.xlu0 %800 }
 0x4a9   : > { %2226 = vpow2.f32 %v790_v2  ;;  %1971 = vmatpush3.bf16.msra.mxu1 %v801_v4  ;;  %v924_v5 = vsel %vm657_vm2, %v2219_v3, 0.0  ;;  %v927_v6 = vpack.c.bf16 %v2219_v3, %v2217_v59 }
 0x4aa   : > { %925 = vadd.xlane.f32.xlu0 %v924_v5  ;;  %1982 = vmatprep.subr.bf16.mxu1 %v2517_v1 }
 0x4ab   : > { %v1057_v22 = vpop.permute.xlu1 %1056  ;;  %2007 = vmatpush3.bf16.msra.mxu0 %v2167_v43  ;;  %v2181_v43 = vld [vmem:[#allocation9 + $0x30] ss:$8 sps:$4 sm:$0xff]  }
 0x4ac   : > { %v2221_v7 = vpop.eup %2220  ;;  %2008 = vmatprep.subr.bf16.mxu0 %v2517_v1 }
 0x4ad   : > { %v1049_v19 = vsel %vm657_vm2, %v2221_v7, 0.0 }
 0x4ae   : > { %v2223_v8 = vpop.eup %2222 }
 0x4af   : > { %v1055_v9 = vpack.c.bf16 %v2223_v8, %v2221_v7  ;;  %v1052_v18 = vsel %vm657_vm2, %v2223_v8, 0.0  ;;  %2009 = vmatpush3.bf16.msra.mxu0 %v2168_v47  ;;  %v2190_v47 = vld [vmem:[#allocation9 + $0x60] ss:$8 sps:$4 sm:$0xff]  }
 0x4b0   : > { %2010 = vmatprep.subr.bf16.mxu0 %v2517_v1 }
 0x4b2   : > { %v2225_v10 = vpop.eup %2224 }
 0x4b3   : > { %v2227_v11 = vpop.eup %2226  ;;  %v792_v12 = vsel %vm657_vm2, %v2225_v10, 0.0  ;;  %2011 = vmatpush3.bf16.msra.mxu0 %v2169_v51  ;;  %v2197_v51 = vld [vmem:[#allocation11] sm:$0xff]  }
 0x4b4   : > { %793 = vadd.xlane.f32.xlu0 %v792_v12  ;;  %v795_v15 = vsel %vm657_vm2, %v2227_v11, 0.0  ;;  %v798_v16 = vpack.c.bf16 %v2227_v11, %v2225_v10  ;;  %2012 = vmatprep.subr.bf16.mxu0 %v2517_v1 }
 0x4b5   : > { %796 = vadd.xlane.f32.xlu1 %v795_v15 }
 0x4b6   : > { %1973 = vmatmul.mubr.msk.bf16.vlgmr.msra.gmra.mrb[16].mxu1 %vm657_vm2, %v798_v16  ;;  %v1133_v16 = vsub.s32 1, %v2839_v30 }
 0x4b7   : > { %1983 = vmatpush3.bf16.msra.mxu1 %v929_v17  ;;  %1984 = vmatprep.mubr.msk.bf16.mxu1 %vm2518_vm0, %v2517_v1 }
 0x4b8   : > { %1053 = vadd.xlane.f32.xlu0 %v1052_v18  ;;  %1994 = vmatprep.subr.bf16.mxu1 %v2517_v1  ;;  %v1134_v17 = vrot.slane %v2842_v32, %v1133_v16 }
 0x4b9   : > { %1050 = vadd.xlane.f32.xlu1 %v1049_v19  ;;  %2013 = vmatpush3.bf16.msra.mxu0 %v2170_v60  ;;  %v2205_v60 = vld [vmem:[#allocation11 + $0x20] sm:$0xff]  }
 0x4ba   : > { %2014 = vmatprep.subr.bf16.mxu0 %v2517_v1 }
 0x4bc   : > { %674 = vadd.xlane.f32.xlu0 %v673_v20 }
 0x4bd   : > { %671 = vadd.xlane.f32.xlu1 %v670_v21  ;;  %2015 = vmatpush3.bf16.msra.mxu0 %v2171_v62 }
 0x4be   : > { %1985 = vmatmul.mubr.msk.bf16.vlgmr.msra.gmra.mrb[20].mxu1 %vm657_vm2, %v927_v6 }
 0x4bf   : > { %1995 = vmatpush3.bf16.msra.mxu1 %v1057_v22  ;;  %1996 = vmatprep.mubr.msk.bf16.mxu1 %vm2518_vm0, %v2517_v1 }
 0x4c6   : > { %1997 = vmatmul.mubr.msk.bf16.vlgmr.msra.gmra.mrb[24].mxu1 %vm657_vm2, %v1055_v9 }
 0x4c7   : > { %1398 = vmatprep.mubr.bf16.mxu1 %v2516_v0 }
 0x533   : > { %v923_v13 = vpop.xlane.xlu0 %922 }
 0x537   : > { %v926_v14 = vpop.xlane.xlu0 %925 }
 0x541   : > { %v794_v29 = vpop.xlane.xlu0 %793 }
 0x542   : > { %v797_v31 = vpop.xlane.xlu1 %796 }
 0x545   : > { %v1054_v34 = vpop.xlane.xlu0 %1053 }
 0x546   : > { %v1051_v35 = vpop.xlane.xlu1 %1050 }
 0x549   : > { %v675_v36 = vpop.xlane.xlu0 %674 }
 0x54a   : > { %2228 = vrcp.f32 %v675_v36  ;;  %v672_v37 = vpop.xlane.xlu1 %671 }
 0x54b   : > { %2230 = vrcp.f32 %v672_v37 }
 0x54c   : > { %2232 = vrcp.f32 %v794_v29  ;;  %v2174_v29 = vld [vmem:[#allocation9 + $0x4] ss:$8 sps:$4 sm:$0xff]  }
 0x54d   : > { %2234 = vrcp.f32 %v797_v31  ;;  %v2177_v31 = vld [vmem:[#allocation9 + $0x14] ss:$8 sps:$4 sm:$0xff]   ;;  %1366 = vmatprep.subr.bf16.mxu1 %v2174_v29 }
 0x54e   : > { %2236 = vrcp.f32 %v923_v13 }
 0x54f   : > { %2238 = vrcp.f32 %v926_v14  ;;  %v2172_v14 = vld [vmem:[#allocation9] ss:$8 sps:$4 sm:$0xff]  }
 0x550   : > { %2240 = vrcp.f32 %v1051_v35  ;;  %1367 = vmatpush1.bf16.msra.mxu1 %v2172_v14 }
 0x551   : > { %2242 = vrcp.f32 %v1054_v34  ;;  %v2175_v34 = vld [vmem:[#allocation9 + $0x10] ss:$8 sps:$4 sm:$0xff]   ;;  %1368 = vmatprep.subr.bf16.mxu1 %v2177_v31 }
 0x554   : > { %v2229_v38 = vpop.eup %2228  ;;  %1369 = vmatpush1.bf16.msra.mxu1 %v2175_v34 }
 0x555   : > { %v2231_v0 = vpop.eup %2230  ;;  %v724_v39 = vmul.f32 %v2229_v38, %v2893_v28 }
 0x556   : > { %v723_v40 = vmul.f32 %v2231_v0, %v2890_v25  ;;  %v2233_v45 = vpop.eup %2232 }
 0x557   : > { %v2235_v28 = vpop.eup %2234 }
 0x558   : > { %v725_v41 = vpack.c.bf16 %v724_v39, %v723_v40  ;;  %v2237_v53 = vpop.eup %2236  ;;  %v2180_v40 = vld [vmem:[#allocation9 + $0x24] ss:$8 sps:$4 sm:$0xff]  }
 0x559   : > { %v2239_v58 = vpop.eup %2238  ;;  %1370 = vmatprep.subr.bf16.mxu1 %v2180_v40 }
 0x55a   : > { %726 = vst.msk [vmem:[#allocation2] sm:$0xff] %vm609_vm1, %v725_v41  ;;  %v2241_v2 = vpop.eup %2240  ;;  %v2178_v41 = vld [vmem:[#allocation9 + $0x20] ss:$8 sps:$4 sm:$0xff]  }
 0x55b   : > { %v2243_v6 = vpop.eup %2242  ;;  %1371 = vmatpush1.bf16.msra.mxu1 %v2178_v41 }
 0x55c   : > { %1372 = vmatprep.subr.bf16.mxu1 %v2183_v42 }
 0x55f   : > { %1373 = vmatpush1.bf16.msra.mxu1 %v2181_v43  ;;  %v1449_v43 = vsub.s32 3, %v2839_v30 }
 0x589   : > { %v840_v44 = vpop.f32.mrb[16].mxu1 }
 0x58a   : > { %v1974_v46 = vpop.f32.mrb[17].mxu1  ;;  %v849_v48 = vmul.f32 %v2233_v45, %v840_v44  ;;  %v2186_v44 = vld [vmem:[#allocation9 + $0x44] ss:$8 sps:$4 sm:$0xff]   ;;  %v2184_v45 = vld [vmem:[#allocation9 + $0x40] ss:$8 sps:$4 sm:$0xff]  }
 0x58b   : > { %v843_v25 = vpop.f32.mrb[18].mxu1  ;;  %1374 = vmatprep.subr.bf16.mxu1 %v2186_v44  ;;  %v2189_v46 = vld [vmem:[#allocation9 + $0x54] ss:$8 sps:$4 sm:$0xff]  }
 0x58c   : > { %v850_v49 = vmul.f32 %v2235_v28, %v843_v25  ;;  %v1975_v50 = vpop.f32.mrb[19].mxu1  ;;  %1375 = vmatpush1.bf16.msra.mxu1 %v2184_v45  ;;  %v2187_v28 = vld [vmem:[#allocation9 + $0x50] ss:$8 sps:$4 sm:$0xff]   ;;  %v2192_v25 = vld [vmem:[#allocation9 + $0x64] ss:$8 sps:$4 sm:$0xff]  }
 0x58d   : > { %1376 = vmatprep.subr.bf16.mxu1 %v2189_v46  ;;  %v2196_v50 = vld [vmem:[#allocation11 + $0x40] sm:$0xff]  }
 0x58e   : > { %v851_v52 = vpack.c.bf16 %v850_v49, %v849_v48  ;;  %v2195_v48 = vld [vmem:[#allocation9 + $0x74] ss:$8 sps:$4 sm:$0xff]   ;;  %v2193_v49 = vld [vmem:[#allocation9 + $0x70] ss:$8 sps:$4 sm:$0xff]   ;;  %1910 = vmatprep.subr.bf16.mxu0 %v2196_v50 }
 0x590   : > { %853 = vrot.lane.b32.xlu1 %v851_v52, %s2521_s13  ;;  %1377 = vmatpush1.bf16.msra.mxu1 %v2187_v28  ;;  %v2198_v52 = vld [vmem:[#allocation11 + $0x48] sm:$0xff]  }
 0x591   : > { %v968_v54 = vpop.f32.mrb[20].mxu1  ;;  %1378 = vmatprep.subr.bf16.mxu1 %v2192_v25 }
 0x592   : > { %v977_v56 = vmul.f32 %v2237_v53, %v968_v54  ;;  %v1986_v57 = vpop.f32.mrb[21].mxu1  ;;  %v2199_v53 = vld [vmem:[#allocation11 + $0x8] sm:$0xff]   ;;  %v2200_v54 = vld [vmem:[#allocation11 + $0x50] sm:$0xff]  }
 0x593   : > { %v971_v59 = vpop.f32.mrb[22].mxu1  ;;  %v2202_v57 = vld [vmem:[#allocation11 + $0x58] sm:$0xff]  }
 0x594   : > { %v978_v55 = vmul.f32 %v2239_v58, %v971_v59  ;;  %v1987_v61 = vpop.f32.mrb[23].mxu1  ;;  %1379 = vmatpush1.bf16.msra.mxu1 %v2190_v47  ;;  %v2203_v58 = vld [vmem:[#allocation11 + $0x18] sm:$0xff]   ;;  %v2204_v59 = vld [vmem:[#allocation11 + $0x60] sm:$0xff]  }
 0x595   : > { %1380 = vmatprep.subr.bf16.mxu1 %v2195_v48 }
 0x596   : > { %v979_v63 = vpack.c.bf16 %v978_v55, %v977_v56  ;;  %v2201_v56 = vld [vmem:[#allocation11 + $0x10] sm:$0xff]   ;;  %v2206_v55 = vld [vmem:[#allocation11 + $0x68] sm:$0xff]  }
 0x598   : > { %981 = vrot.lane.b32.xlu0 %v979_v63, %s2520_s7  ;;  %1381 = vmatpush1.bf16.msra.mxu1 %v2193_v49 }
 0x599   : > { %v1096_v3 = vpop.f32.mrb[24].mxu1 }
 0x59a   : > { %v1105_v4 = vmul.f32 %v2241_v2, %v1096_v3  ;;  %v1998_v5 = vpop.f32.mrb[25].mxu1 }
 0x59b   : > { %v1099_v7 = vpop.f32.mrb[26].mxu1  ;;  %v1251_v5 = vsub.s32 4, %v2839_v30 }
 0x59c   : > { %v1106_v8 = vmul.f32 %v2243_v6, %v1099_v7  ;;  %v1999_v9 = vpop.f32.mrb[27].mxu1  ;;  %v1257_v7 = vsub.s32 5, %v2839_v30 }
 0x59d   : > { %v1252_v6 = vrot.slane %v2842_v32, %v1251_v5 }
 0x59e   : > { %v1107_v10 = vpack.c.bf16 %v1106_v8, %v1105_v4 }
 0x5a0   : > { %1109 = vrot.lane.b32.xlu1 %v1107_v10, %s2519_s28 }
 0x602   : > { %v854_v11 = vpop.permute.xlu1 %853 }
 0x603   : > { %857 = vst.msk [vmem:[#allocation2] sm:$0xff] %vm856_vm3, %v854_v11 }
 0x60a   : > { %v982_v12 = vpop.permute.xlu0 %981 }
 0x60b   : > { %985 = vst.msk [vmem:[#allocation2] sm:$0xff] %vm984_vm4, %v982_v12 }
 0x612   : > { %v1110_v1 = vpop.permute.xlu1 %1109 }
 0x613   : > { %1113 = vst.msk [vmem:[#allocation2] sm:$0xff] %vm1112_vm5, %v1110_v1  ;;  %v1258_v1 = vrot.slane %v2842_v32, %v1257_v7 }
 0x61a   : > { %v1114_v15 = vld [vmem:[#allocation2] sm:$0xff] }
 0x61b   : > { %2017 = vmatmul.mubr.bf16.vlgmr.msra.gmra.mrb[12].mxu0 %v1114_v15 }
 0x61c   : > { %1911 = vmatpush3.bf16.msra.mxu0 %v2197_v51 }
 0x61d   : > { %1912 = vmatprep.subr.bf16.mxu0 %v2198_v52 }
 0x620   : > { %1913 = vmatpush3.bf16.msra.mxu0 %v2199_v53 }
 0x621   : > { %1914 = vmatprep.subr.bf16.mxu0 %v2200_v54 }
 0x624   : > { %1915 = vmatpush3.bf16.msra.mxu0 %v2201_v56 }
 0x625   : > { %1916 = vmatprep.subr.bf16.mxu0 %v2202_v57 }
 0x628   : > { %1917 = vmatpush3.bf16.msra.mxu0 %v2203_v58 }
 0x629   : > { %1918 = vmatprep.subr.bf16.mxu0 %v2204_v59 }
 0x62c   : > { %1919 = vmatpush3.bf16.msra.mxu0 %v2205_v60 }
 0x62d   : > { %1920 = vmatprep.subr.bf16.mxu0 %v2206_v55 }
 0x6ee   : > { %v1217_v18 = vpop.f32.mrb[12].mxu0 }
 0x6ef   : > { %v1218_v19 = vadd.f32 %v1217_v18, %v1134_v17  ;;  %v2018_v20 = vpop.f32.mrb[13].mxu0 }
 0x6f0   : > { %v1220_v21 = vpop.f32.mrb[14].mxu0  ;;  %v2208_v20 = vld [vmem:[#allocation11 + $0x70] sm:$0xff]  }
 0x6f1   : > { %v1221_v22 = vadd.f32 %v1220_v21, %v1134_v17  ;;  %v2019_v26 = vpop.f32.mrb[15].mxu0  ;;  %v1224_v27 = vadd.f32 %v1218_v19, %v2820_v23  ;;  %v2207_v19 = vld [vmem:[#allocation11 + $0x28] sm:$0xff]   ;;  %v2209_v21 = vld [vmem:[#allocation11 + $0x30] sm:$0xff]  }
 0x6f2   : > { %1921 = vmatpush3.bf16.msra.mxu0 %v2207_v19  ;;  %v2211_v26 = vld [vmem:[#allocation11 + $0x38] sm:$0xff]  }
 0x6f3   : > { %1226 = vadd.xlane.f32.xlu1 %v1224_v27  ;;  %v1225_v13 = vadd.f32 %v1221_v22, %v2823_v24  ;;  %1922 = vmatprep.subr.bf16.mxu0 %v2208_v20  ;;  %v2210_v22 = vld [vmem:[#allocation11 + $0x78] sm:$0xff]  }
 0x6f5   : > { %1228 = vadd.xlane.f32.xlu0 %v1225_v13 }
 0x6f6   : > { %1923 = vmatpush3.bf16.msra.mxu0 %v2209_v21 }
 0x6f7   : > { %1924 = vmatprep.subr.bf16.mxu0 %v2210_v22 }
 0x6fa   : > { %1925 = vmatpush3.bf16.msra.mxu0 %v2211_v26 }
 0x780   : > { %v1227_v35 = vpop.xlane.xlu1 %1226 }
 0x781   : > { %v1231_v36 = vmul.f32 0.0078125, %v1227_v35 }
 0x782   : > { %v1229_v37 = vpop.xlane.xlu0 %1228 }
 0x783   : > { %v2942_v38 = vsub.f32 %v1224_v27, %v1231_v36  ;;  %v1232_v0 = vmul.f32 0.0078125, %v1229_v37  ;;  %v1280_v27 = vsub.s32 2, %v2839_v30 }
 0x785   : > { %v2944_v39 = vsub.f32 %v1225_v13, %v1232_v0  ;;  %v1235_v23 = vmul.f32 %v2942_v38, %v2942_v38  ;;  %v1281_v13 = vrot.slane %v2842_v32, %v1280_v27  ;;  %v1285_v14 = vrot.slane %v2844_v33, %v1280_v27 }
 0x786   : > { %v1450_v33 = vrot.slane %v2842_v32, %v1449_v43 }
 0x787   : > { %1237 = vadd.xlane.f32.xlu0 %v1235_v23  ;;  %v1236_v24 = vmul.f32 %v2944_v39, %v2944_v39 }
 0x789   : > { %1239 = vadd.xlane.f32.xlu1 %v1236_v24 }
 0x814   : > { %v1238_v61 = vpop.xlane.xlu0 %1237 }
 0x815   : > { %v1241_v62 = vmul.f32 0.0078125, %v1238_v61 }
 0x816   : > { %v1240_v63 = vpop.xlane.xlu1 %1239 }
 0x817   : > { %v1243_v2 = vadd.f32 1e-05, %v1241_v62  ;;  %v1242_v3 = vmul.f32 0.0078125, %v1240_v63 }
 0x819   : > { %2244 = vrsqrt.f32 %v1243_v2  ;;  %v1244_v4 = vadd.f32 1e-05, %v1242_v3 }
 0x81b   : > { %2246 = vrsqrt.f32 %v1244_v4  ;;  %v1614_v4 = vsub.s32 6, %v2839_v30 }
 0x81d   : > { %v1615_v5 = vrot.slane %v2842_v32, %v1614_v4 }
 0x823   : > { %v2245_v8 = vpop.eup %2244 }
 0x824   : > { %v1247_v9 = vmul.f32 %v2245_v8, %v2942_v38 }
 0x825   : > { %v2247_v10 = vpop.eup %2246 }
 0x826   : > { %v1248_v11 = vmul.f32 %v2247_v10, %v2944_v39  ;;  %v1253_v12 = vmul.f32 %v1252_v6, %v1247_v9 }
 0x828   : > { %v1254_v15 = vmul.f32 %v1252_v6, %v1248_v11  ;;  %v1259_v16 = vadd.f32 %v1258_v1, %v1253_v12  ;;  %v1620_v6 = vsub.s32 7, %v2839_v30 }
 0x82a   : > { %v1260_v17 = vadd.f32 %v1258_v1, %v1254_v15  ;;  %v1621_v10 = vrot.slane %v2842_v32, %v1620_v6 }
 0x82c   : > { %v1261_v18 = vpack.c.bf16 %v1260_v17, %v1259_v16 }
 0x82e   : > { %1399 = vmatmul.mubr.bf16.vlgmr.msra.gmra.mrb[28].mxu1 %v1261_v18 }
 0x901   : > { %v1400_v29 = vpop.f32.mrb[28].mxu1 }
 0x902   : > { %v1401_v31 = vadd.f32 %v1400_v29, %v1281_v13  ;;  %v1402_v34 = vpop.f32.mrb[29].mxu1 }
 0x903   : > { %v1403_v35 = vadd.f32 %v1402_v34, %v1285_v14  ;;  %v1404_v36 = vpop.f32.mrb[30].mxu1 }
 0x904   : > { %v1405_v37 = vadd.f32 %v1404_v36, %v1281_v13  ;;  %v1406_v38 = vpop.f32.mrb[31].mxu1  ;;  %v1409_v39 = vmax.f32 %v1401_v31, 0.0 }
 0x905   : > { %v1407_v0 = vadd.f32 %v1406_v38, %v1285_v14  ;;  %v1410_v24 = vmax.f32 %v1403_v35, 0.0 }
 0x906   : > { %v1411_v23 = vmax.f32 %v1405_v37, 0.0 }
 0x907   : > { %v1412_v40 = vmax.f32 %v1407_v0, 0.0 }
 0x908   : > { %v1413_v41 = vpack.c.bf16 %v1411_v23, %v1409_v39 }
 0x909   : > { %v1414_v42 = vpack.c.bf16 %v1412_v40, %v1410_v24 }
 0x90b   : > { %1579 = vmatprep.mubr.bf16.mxu0 %v1414_v42 }
 0x90c   : > { %1580 = vmatmul.mubr.bf16.vlgmr.msra.gmra.mrb[16].mxu0 %v1413_v41 }
 0x9df   : > { %v1926_v44 = vpop.f32.mrb[16].mxu0 }
 0x9e0   : > { %v1927_v45 = vpop.f32.mrb[17].mxu0 }
 0x9e1   : > { %v1928_v46 = vadd.f32 %v1927_v45, %v1926_v44  ;;  %v1929_v28 = vpop.f32.mrb[18].mxu0 }
 0x9e2   : > { %v1930_v25 = vpop.f32.mrb[19].mxu0 }
 0x9e3   : > { %v1582_v47 = vadd.f32 %v1928_v46, %v1450_v33  ;;  %v1931_v48 = vadd.f32 %v1930_v25, %v1929_v28 }
 0x9e5   : > { %v1585_v49 = vadd.f32 %v1931_v48, %v1450_v33  ;;  %v1588_v50 = vadd.f32 %v1582_v47, %v1259_v16 }
 0x9e7   : > { %1590 = vadd.xlane.f32.xlu0 %v1588_v50  ;;  %v1589_v51 = vadd.f32 %v1585_v49, %v1260_v17 }
 0x9e9   : > { %1592 = vadd.xlane.f32.xlu1 %v1589_v51 }
 0xa74   : > { %v1591_v52 = vpop.xlane.xlu0 %1590 }
 0xa75   : > { %v1594_v53 = vmul.f32 0.0078125, %v1591_v52 }
 0xa76   : > { %v1593_v54 = vpop.xlane.xlu1 %1592 }
 0xa77   : > { %v1596_v56 = vsub.f32 %v1588_v50, %v1594_v53  ;;  %v1595_v57 = vmul.f32 0.0078125, %v1593_v54 }
 0xa79   : > { %v1597_v58 = vsub.f32 %v1589_v51, %v1595_v57  ;;  %v1598_v59 = vmul.f32 %v1596_v56, %v1596_v56 }
 0xa7b   : > { %1600 = vadd.xlane.f32.xlu0 %v1598_v59  ;;  %v1599_v60 = vmul.f32 %v1597_v58, %v1597_v58 }
 0xa7d   : > { %1602 = vadd.xlane.f32.xlu1 %v1599_v60 }
 0xb08   : > { %v1601_v55 = vpop.xlane.xlu0 %1600 }
 0xb09   : > { %v1604_v61 = vmul.f32 0.0078125, %v1601_v55 }
 0xb0a   : > { %v1603_v62 = vpop.xlane.xlu1 %1602 }
 0xb0b   : > { %v1606_v63 = vadd.f32 1e-05, %v1604_v61  ;;  %v1605_v2 = vmul.f32 0.0078125, %v1603_v62 }
 0xb0d   : > { %2248 = vrsqrt.f32 %v1606_v63  ;;  %v1607_v3 = vadd.f32 1e-05, %v1605_v2 }
 0xb0f   : > { %2250 = vrsqrt.f32 %v1607_v3 }
 0xb17   : > { %v2249_v7 = vpop.eup %2248 }
 0xb18   : > { %v1610_v8 = vmul.f32 %v2249_v7, %v1596_v56 }
 0xb19   : > { %v2251_v9 = vpop.eup %2250 }
 0xb1a   : > { %v1616_v11 = vmul.f32 %v1615_v5, %v1610_v8  ;;  %v1611_v12 = vmul.f32 %v2251_v9, %v1597_v58 }
 0xb1c   : > { %v1617_v1 = vmul.f32 %v1615_v5, %v1611_v12  ;;  %v1622_v15 = vadd.f32 %v1621_v10, %v1616_v11 }
 0xb1e   : > { %v1623_v16 = vadd.f32 %v1621_v10, %v1617_v1 }
 0xb20   : > { %v1874_v30 = vpack.c.bf16 %v1623_v16, %v1622_v15 }
 0xb22   : > { %1875 = vst [vmem:[%s342_s25] sm:$0xff] %v1874_v30  }
 0xb23   : > { %2435 = shalt.err (!%p2432_p8)
}
 0xb24   : > { %s2436_s28 = scalar_lea.hbm %s2970_s14, 128  ;;  %s2440_s16 = scalar_lea.hbm %s3024_s6, 256 }
 0xb25   : > { %p2437_p6 = scmp.ne.s32.totalorder %s2970_s14, %s2436_s28  ;;  %p2441_p3 = scmp.lt.u32.totalorder %s2970_s14, %s3024_s6 }
 0xb26   : > { %p2442_p0 = scmp.lt.u32.totalorder %s2440_s16, %s2436_s28  ;;  %p2444_p2 = scmp.lt.u32.totalorder %s2436_s28, %s2970_s14 }
 0xb27   : > { %p2438_p9 = pnand %p2437_p6, %p3047_p7 }
 0xb28   : > { %p2443_p5 = por %p2442_p0, %p2441_p3 }
 0xb29   : > { %p2439_p4 = pneg %p2438_p9 }
 0xb2a   : > { %p2445_p10 = por %p2444_p2, %p2443_p5 }
 0xb2c   : > { %p2446_p1 = pnand %p2445_p10, %p2439_p4 }
 0xb2e   : > { %2449 = shalt.err (!%p2446_p1)
}
 0xb2f   : > { %s2523_s26 = smov 4  }
 0xb30   : > { %2042 = dma.vmem_to_hbm [thread:$0]  (%p3047_p7), %s2972_s12, 128, %s2970_s14, %s1635_s19, %s2520_s7, %s2520_s7, %s2523_s26  }
 0xb31 PF: > { %s1663_s10 = sand.u32 1, %s2488_s21   ;;  %p3048_p11 = scmp.ne.s32.totalorder %s3036_s20, 0 }
 0xb32   : > { %p3049_p12 = scmp.ge.s32.totalorder %s2500_s24, 2  ;;  %s1664_s27 = scalar_lea.sflag [#allocation5], %s1663_s10 }
 0xb34   : > { %p2065_p13 = pnand %p3049_p12, %p3048_p11 }
 0xb36   : > { %2483 = dma.done.wait (!%p2065_p13), %s1664_s27, 128  }
 0xb37   : > { %2485 = vsyncadd (!%p2065_p13), %s1664_s27, 4294967168  ;;  %p22_p8 = scmp.ge.s32.totalorder %s2716_s9, 4   ;;  %s3050_s21 = smov %s2492_s22 }
 0xb38   : > { %s3051_s22 = smov %s2496_s23  ;;  %s3052_s23 = smov %s2728_s17 }
 0xb39   : > { %s3053_s24 = smov %s2716_s9  ;;  %24 = sbr.rel (!%p22_p8) target bundleno = 8 (0x8), region = 109 }
 0xb40   :  { %1669 = vsyncpa [#allocation4], 1 }
 0xb41   :  { %1671 = vsyncpa [#allocation4 + $0x1], 1 }
 0xb42   :  { %1672 = vsyncpa [#allocation7], 1 }
 0xb43   :  { %1673 = vsyncpa [#allocation10], 1 }
 0xb44   :  { %1674 = vsyncpa [#allocation13], 1 }
 0xb45   :  { %1675 = vsyncpa [#allocation5], 1 }
 0xb46   :  { %1677 = vsyncpa [#allocation5 + $0x1], 1 }

// kernel: tpu_custom_call.1
= control target key start
LH: loop header
LB: loop body
LE: loop exit
PB: predicated region body
PF: predicated region fallthrough
CT: control target
= control target key end

     0   :  { %11 = vsyncpa [#allocation4], 0  ;;  %s3018_s0 = inlined_call_operand.hbm [shape: f32[2,16,128], index: 0, kind: input, shape index: {}]   ;;  %s3019_s1 = inlined_call_operand.hbm [shape: bf16[128,384], index: 1, kind: input, shape index: {}]   ;;  %s3020_s2 = inlined_call_operand.hbm [shape: bf16[128,128], index: 2, kind: input, shape index: {}]   ;;  %s3021_s3 = inlined_call_operand.hbm [shape: bf16[128,256], index: 3, kind: input, shape index: {}]   ;;  %s3022_s4 = inlined_call_operand.hbm [shape: bf16[256,128], index: 4, kind: input, shape index: {}]   ;;  %s3023_s5 = inlined_call_operand.hbm [shape: f32[10,384], index: 5, kind: input, shape index: {}]   ;;  %s3024_s6 = inlined_call_operand.hbm [shape: bf16[2,16,128], index: 6, kind: output, shape index: {}]  }
   0x1   :  { %13 = vsyncpa [#allocation4 + $0x1], 0 }
   0x2   :  { %14 = vsyncpa [#allocation7], 0 }
   0x3   :  { %15 = vsyncpa [#allocation10], 0 }
   0x4   :  { %16 = vsyncpa [#allocation13], 0 }
   0x5   :  { %17 = vsyncpa [#allocation5], 0 }
   0x6   :  { %19 = vsyncpa [#allocation5 + $0x1], 0  ;;  %s2559_s21 = smov 0   ;;  %s2561_s22 = smov 0  }
   0x7   :  { %s2563_s23 = smov 0   ;;  %s2565_s24 = smov 0  }
   0x8 LB: > { %s2502_s25 = smov [#allocation6]   ;;  %s2580_s27 = sadd.s32 4294967295, %s2500_s24   ;;  %s2500_s24 = sphi %s2565_s24, %s3053_s24   ;;  %s2496_s23 = sphi %s2563_s23, %s3052_s23   ;;  %s2492_s22 = sphi %s2561_s22, %s3051_s22   ;;  %s2488_s21 = sphi %s2559_s21, %s3050_s21  }
   0x9   : > { %s199_s26 = sshll.u32 %s2502_s25, 4  ;;  %p1770_p0 = scmp.ge.s32.totalorder %s2500_s24, 1  ;;  %s2585_s26 = int_to_ptr.vmem [resolvable:$true] %s199_s26 }
   0xa   : > { %p3025_p1 = scmp.eq.s32.totalorder %s2580_s27, 0  ;;  %p187_p2 = scmp.lt.s32.totalorder %s2500_s24, 3 }
   0xb   : > { %s2503_s29 = smov [#allocation9]   ;;  %s2504_s8 = smov [#allocation8]  }
   0xc   : > { %p2587_p3 = pnand %p1770_p0, %p187_p2  ;;  %s225_s30 = sshll.u32 %s2503_s29, 4  ;;  %s2600_s30 = int_to_ptr.vmem [resolvable:$true] %s225_s30 }
   0xd   : > { %s2602_s9 = sshll.u32 %s2504_s8, 4  ;;  %s2252_s12 = scalar_lea.hbm %s3019_s1, 3072  ;;  %s213_s9 = int_to_ptr.vmem [resolvable:$true] %s2602_s9 }
   0xe   : > { %s3030_s28 = scalar_select %p2587_p3, 1, 0 }
   0xf   : > { %p2044_p5 = pneg %p2587_p3  ;;  %p2253_p7 = scmp.ne.s32.totalorder %s3019_s1, %s2252_s12 }
  0x10   : > { %p2259_p11 = scmp.lt.u32.totalorder %s2252_s12, %s3019_s1 }
  0x11   : > { %p2596_p6 = pnand %p2044_p5, %p3025_p1 }
  0x13   : > { %p2612_p8 = pneg %p2596_p6 }
  0x15   : > { %p2255_p9 = pnand %p2612_p8, %p2253_p7 }
  0x17   : > { %p2256_p10 = pneg %p2255_p9 }
  0x19   : > { %p2261_p12 = pnand %p2259_p11, %p2256_p10 }
  0x1b   : > { %2264 = shalt.err (!%p2261_p12)
}
  0x1c   : > { %s2265_s18 = scalar_lea.vmem %s2585_s26, 3072  ;;  %p2273_p5 = scmp.lt.s32.totalorder %s2585_s26, %s2585_s26 }
  0x1d   : > { %p2266_p13 = scmp.ne.s32.totalorder %s2585_s26, %s2265_s18  ;;  %p2274_p4 = scmp.lt.s32.totalorder %s2265_s18, %s2265_s18 }
  0x1f   : > { %p2268_p0 = pnand %p2266_p13, %p2612_p8  ;;  %p2275_p7 = por %p2274_p4, %p2273_p5 }
  0x21   : > { %p2269_p2 = pneg %p2268_p0 }
  0x23   : > { %p2276_p9 = pnand %p2275_p7, %p2269_p2 }
  0x25   : > { %2279 = shalt.err (!%p2276_p9)
}
  0x26   : > { %s2505_s19 = smov 192   ;;  %s2506_s20 = smov 12  }
  0x27   : > { %2047 = dma.hbm_to_vmem [thread:$0]  (!%p2596_p6), %s3019_s1, 3072, %s2585_s26, [#allocation7], %s2505_s19, %s2505_s19, %s2506_s20  }
  0x28   : > { %s2280_s11 = scalar_lea.hbm %s3021_s3, 2048 }
  0x29   : > { %p2281_p4 = scmp.ne.s32.totalorder %s3021_s3, %s2280_s11  ;;  %p2287_p12 = scmp.lt.u32.totalorder %s2280_s11, %s3021_s3 }
  0x2b   : > { %p2283_p10 = pnand %p2281_p4, %p2612_p8 }
  0x2d   : > { %p2284_p11 = pneg %p2283_p10 }
  0x2f   : > { %p2289_p13 = pnand %p2287_p12, %p2284_p11 }
  0x31   : > { %2292 = shalt.err (!%p2289_p13)
}
  0x32   : > { %s2293_s26 = scalar_lea.vmem %s2600_s30, 2048  ;;  %p2301_p7 = scmp.lt.s32.totalorder %s2600_s30, %s2600_s30 }
  0x33   : > { %p2294_p0 = scmp.ne.s32.totalorder %s2600_s30, %s2293_s26  ;;  %p2302_p9 = scmp.lt.s32.totalorder %s2293_s26, %s2293_s26 }
  0x35   : > { %p2296_p2 = pnand %p2294_p0, %p2612_p8  ;;  %p2303_p4 = por %p2302_p9, %p2301_p7 }
  0x37   : > { %p2297_p5 = pneg %p2296_p2 }
  0x39   : > { %p2304_p10 = pnand %p2303_p4, %p2297_p5 }
  0x3b   : > { %2307 = shalt.err (!%p2304_p10)
}
  0x3c   : > { %s3027_s17 = smov 128   ;;  %s3028_s18 = smov 8  }
  0x3d   : > { %2053 = dma.hbm_to_vmem [thread:$0]  (!%p2596_p6), %s3021_s3, 2048, %s2600_s30, [#allocation10], %s3027_s17, %s3027_s17, %s3028_s18  }
  0x3e   : > { %s2308_s8 = scalar_lea.hbm %s3020_s2, 1024 }
  0x3f   : > { %p2309_p11 = scmp.ne.s32.totalorder %s3020_s2, %s2308_s8  ;;  %p2315_p0 = scmp.lt.u32.totalorder %s2308_s8, %s3020_s2 }
  0x41   : > { %p2311_p12 = pnand %p2309_p11, %p2612_p8 }
  0x43   : > { %p2312_p13 = pneg %p2311_p12 }
  0x45   : > { %p2317_p2 = pnand %p2315_p0, %p2312_p13 }
  0x47   : > { %2320 = shalt.err (!%p2317_p2)
}
  0x48   : > { %s2321_s14 = scalar_lea.vmem %s213_s9, 1024  ;;  %p2329_p4 = scmp.lt.s32.totalorder %s213_s9, %s213_s9 }
  0x49   : > { %p2322_p5 = scmp.ne.s32.totalorder %s213_s9, %s2321_s14  ;;  %p2330_p10 = scmp.lt.s32.totalorder %s2321_s14, %s2321_s14 }
  0x4b   : > { %p2324_p7 = pnand %p2322_p5, %p2612_p8  ;;  %p2331_p1 = por %p2330_p10, %p2329_p4 }
  0x4d   : > { %p2325_p9 = pneg %p2324_p7 }
  0x4f   : > { %p2332_p3 = pnand %p2331_p1, %p2325_p9 }
  0x51   : > { %2335 = shalt.err (!%p2332_p3)
}
  0x52   : > { %s2509_s30 = smov 64   ;;  %s2510_s16 = smov 4  }
  0x53   : > { %2050 = dma.hbm_to_vmem [thread:$0]  (!%p2596_p6), %s3020_s2, 1024, %s213_s9, [#allocation7], %s2509_s30, %s2509_s30, %s2510_s16  }
  0x54   : > { %s2511_s20 = smov [#allocation11]   ;;  %s2512_s29 = smov [#allocation12]  }
  0x55   : > { %s238_s25 = sshll.u32 %s2511_s20, 4  ;;  %s251_s8 = sshll.u32 %s2512_s29, 4  ;;  %s239_s25 = int_to_ptr.vmem [resolvable:$true] %s238_s25  ;;  %s252_s8 = int_to_ptr.vmem [resolvable:$true] %s251_s8 }
  0x56   : > { %s2336_s12 = scalar_lea.hbm %s3022_s4, 2048 }
  0x57   : > { %p2337_p1 = scmp.ne.s32.totalorder %s3022_s4, %s2336_s12  ;;  %p2343_p12 = scmp.lt.u32.totalorder %s2336_s12, %s3022_s4 }
  0x59   : > { %p2339_p3 = pnand %p2337_p1, %p2612_p8 }
  0x5b   : > { %p2340_p11 = pneg %p2339_p3 }
  0x5d   : > { %p2345_p13 = pnand %p2343_p12, %p2340_p11 }
  0x5f   : > { %2348 = shalt.err (!%p2345_p13)
}
  0x60   : > { %s2349_s9 = scalar_lea.vmem %s239_s25, 2048  ;;  %p2357_p7 = scmp.lt.s32.totalorder %s239_s25, %s239_s25 }
  0x61   : > { %p2350_p0 = scmp.ne.s32.totalorder %s239_s25, %s2349_s9  ;;  %p2358_p9 = scmp.lt.s32.totalorder %s2349_s9, %s2349_s9 }
  0x63   : > { %p2352_p2 = pnand %p2350_p0, %p2612_p8  ;;  %p2359_p4 = por %p2358_p9, %p2357_p7 }
  0x65   : > { %p2353_p5 = pneg %p2352_p2 }
  0x67   : > { %p2360_p10 = pnand %p2359_p4, %p2353_p5 }
  0x69   : > { %2363 = shalt.err (!%p2360_p10)
}
  0x6a   : > { %2056 = dma.hbm_to_vmem [thread:$0]  (!%p2596_p6), %s3022_s4, 2048, %s239_s25, [#allocation10], %s2509_s30, %s2509_s30, %s2510_s16  }
  0x6b   : > { %s2364_s20 = scalar_lea.hbm %s3023_s5, 768 }
  0x6c   : > { %p2365_p1 = scmp.ne.s32.totalorder %s3023_s5, %s2364_s20  ;;  %p2371_p12 = scmp.lt.u32.totalorder %s2364_s20, %s3023_s5 }
  0x6e   : > { %p2367_p3 = pnand %p2365_p1, %p2612_p8 }
  0x70   : > { %p2368_p11 = pneg %p2367_p3 }
  0x72   : > { %p2373_p13 = pnand %p2371_p12, %p2368_p11 }
  0x74   : > { %2376 = shalt.err (!%p2373_p13)
}
  0x75   : > { %s2377_s13 = scalar_lea.vmem %s252_s8, 768  ;;  %p2385_p7 = scmp.lt.s32.totalorder %s252_s8, %s252_s8 }
  0x76   : > { %p2378_p0 = scmp.ne.s32.totalorder %s252_s8, %s2377_s13  ;;  %p2386_p9 = scmp.lt.s32.totalorder %s2377_s13, %s2377_s13 }
  0x78   : > { %p2380_p2 = pnand %p2378_p0, %p2612_p8  ;;  %p2387_p4 = por %p2386_p9, %p2385_p7 }
  0x7a   : > { %p2381_p5 = pneg %p2380_p2 }
  0x7c   : > { %p2388_p10 = pnand %p2387_p4, %p2381_p5 }
  0x7e   : > { %2391 = shalt.err (!%p2388_p10)
}
  0x7f   : > { %s2513_s30 = smov 384   ;;  %s2514_s15 = smov 24  }
  0x80   : > { %2059 = dma.hbm_to_vmem [thread:$0]  (!%p2596_p6), %s3023_s5, 768, %s252_s8, [#allocation13], %s2513_s30, %s2513_s30, %s2514_s15  }
  0x81   : > { %s1769_s14 = sadd.s32 4294967294, %s2500_s24   ;;  %s2716_s9 = sadd.s32 1, %s2500_s24  }
  0x82   : > { %s32_s26 = sadd.s32 1, %s2496_s23  ;;  %s29_s19 = ssub.s32 %s2500_s24, %s2716_s9 }
  0x83   : > { %p39_p8 = scmp.ne.s32.totalorder %s2496_s23, %s2492_s22  ;;  %p30_p1 = scmp.eq.s32.totalorder %s29_s19, 0 }
  0x84   : > { %p40_p3 = scmp.eq.s32.totalorder %s2500_s24, 0  ;;  %p45_p11 = scmp.ne.s32.totalorder %s2492_s22, %s2488_s21 }
  0x85   : > { %p174_p12 = scmp.eq.s32.totalorder %s2580_s27, 1  ;;  %p3033_p0 = scmp.eq.s32.totalorder %s2580_s27, 0 }
  0x86   : > { %s2728_s17 = scalar_select %p30_p1, %s2496_s23, %s32_s26  }
  0x87   : > { %p41_p13 = por %p40_p3, %p39_p8  ;;  %p2732_p2 = por %p3033_p0, %p45_p11 }
  0x88   : > { %p2736_p6 = por %p174_p12, %p39_p8  ;;  %p180_p5 = scmp.eq.s32.totalorder %s1769_s14, 1 }
  0x89   : > { %p2073_p7 = scmp.lt.s32.totalorder %s2500_s24, 2  ;;  %s265_s18 = sand.u32 1, %s2496_s23  }
  0x8a   : > { %s3035_s8 = scalar_select %p2736_p6, 1, 0 }
  0x8b   : > { %p2742_p9 = por %p180_p5, %p45_p11  ;;  %s1777_s29 = sshll.u32 %s265_s18, 4 }
  0x8c   : > { %s1867_s10 = sshll.u32 %s2500_s24, 8  ;;  %s269_s30 = scalar_lea.vmem [#allocation3], %s1777_s29 }
  0x8d   : > { %s3036_s20 = scalar_select %p2742_p9, 1, 0 }
  0x8e   : > { %s2750_s13 = scalar_lea.hbm %s3018_s0, %s1867_s10  ;;  %s276_s15 = sshll.u32 %s269_s30, 4  ;;  %s2756_s15 = int_to_ptr.vmem [resolvable:$true] %s276_s15 }
  0x8f   : > { %p2752_p4 = pnand %p2073_p7, %p41_p13  ;;  %s2758_s25 = scalar_lea.sflag [#allocation4], %s265_s18 }
  0x90   : > { %s2392_s14 = scalar_lea.hbm %s2750_s13, 256  ;;  %s2397_s29 = scalar_lea.hbm %s3018_s0, 512 }
  0x91   : > { %p2393_p10 = scmp.ne.s32.totalorder %s2750_s13, %s2392_s14  ;;  %p2394_p8 = pneg %p2752_p4 }
  0x92   : > { %p2398_p11 = scmp.lt.u32.totalorder %s2750_s13, %s3018_s0  ;;  %p2399_p12 = scmp.lt.u32.totalorder %s2397_s29, %s2392_s14 }
  0x93   : > { %p2395_p1 = pnand %p2394_p8, %p2393_p10  ;;  %p2401_p0 = scmp.lt.u32.totalorder %s2392_s14, %s2750_s13 }
  0x94   : > { %p2400_p13 = por %p2399_p12, %p2398_p11 }
  0x95   : > { %p2396_p3 = pneg %p2395_p1 }
  0x96   : > { %p2402_p5 = por %p2401_p0, %p2400_p13 }
  0x98   : > { %p2403_p7 = pnand %p2402_p5, %p2396_p3 }
  0x9a   : > { %2406 = shalt.err (!%p2403_p7)
}
  0x9b   : > { %s2407_s18 = scalar_lea.vmem %s2756_s15, 256  ;;  %s2515_s12 = smov [#allocation3]  }
  0x9c   : > { %p2408_p10 = scmp.ne.s32.totalorder %s2756_s15, %s2407_s18  ;;  %s2412_s30 = sshll.u32 %s2515_s12, 4  ;;  %s2413_s30 = int_to_ptr.vmem [resolvable:$false] %s2412_s30 }
  0x9d   : > { %s2414_s26 = scalar_lea.vmem %s2413_s30, 512  ;;  %p2415_p6 = scmp.lt.s32.totalorder %s2756_s15, %s2413_s30 }
  0x9e   : > { %p2410_p1 = pnand %p2408_p10, %p2394_p8  ;;  %p2416_p11 = scmp.lt.s32.totalorder %s2414_s26, %s2407_s18 }
  0xa0   : > { %p2411_p9 = pneg %p2410_p1  ;;  %p2417_p12 = por %p2416_p11, %p2415_p6 }
  0xa2   : > { %p2418_p13 = pnand %p2417_p12, %p2411_p9 }
  0xa4   : > { %2421 = shalt.err (!%p2418_p13)
}
  0xa5   : > { %s3038_s14 = smov 8   ;;  %s3039_s19 = smov 128  }
  0xa6   : > { %2063 = dma.hbm_to_vmem [thread:$0]  (!%p2752_p4), %s2750_s13, 256, %s2756_s15, %s2758_s25, %s3039_s19, %s3039_s19, %s3038_s14  }
  0xa7   : > { %p3040_p8 = scmp.ne.s32.totalorder %s3030_s28, 0 }
  0xa8   : > { %s2792_s29 = sand.u32 (!%p3040_p8), 1, %s2492_s22  }
  0xa9   : > { %288 = sbr.rel (%p3040_p8) target bundleno = 2865 (0xb31), region = 44  ;;  %s1781_s10 = sshll.u32 (!%p3040_p8), %s2792_s29, 4 }
  0xaa   : > { %s291_s11 = scalar_lea.sflag (!%p3040_p8), [#allocation4], %s2792_s29  ;;  %s2796_s18 = scalar_lea.vmem (!%p3040_p8), [#allocation3], %s1781_s10 }
  0xb0   : > { %2467 = dma.done.wait (%p2732_p2), %s291_s11, 256  }
  0xb1   : > { %2469 = vsyncadd (%p2732_p2), %s291_s11, 4294967040  ;;  %p3041_p6 = scmp.eq.s32.totalorder %s2580_s27, 0 }
  0xb3   : > { %2471 = dma.done.wait (%p3041_p6), [#allocation7], 4096   ;;  %p3042_p9 = pmov %p3041_p6 }
  0xb4   : > { %p3043_p4 = pmov %p3041_p6 }
  0xb5   : > { %2473 = vsyncadd (%p3042_p9), [#allocation7], 4294963200 }
  0xb6   : > { %2475 = dma.done.wait (%p3043_p4), [#allocation10], 4096   ;;  %p3044_p3 = pmov %p3043_p4 }
  0xb8   : > { %2477 = vsyncadd (%p3044_p3), [#allocation10], 4294963200  ;;  %p3045_p0 = pmov %p3044_p3 }
  0xba   : > { %2479 = dma.done.wait (%p3045_p0), [#allocation13], 768   ;;  %p3046_p5 = pmov %p3045_p0 }
  0xbb   : > { %v2516_v0 = vmov 0   ;;  %v2517_v1 = vmov 0.0   ;;  %v2132_v2 = vld [vmem:[#allocation6 + $0x4] ss:$12 sps:$4 sm:$0xff]   ;;  %v2134_v3 = vld [vmem:[#allocation6] ss:$12 sps:$4 sm:$0xff]   ;;  %v382_v29 = vlaneseq }
  0xbc   : > { %2481 = vsyncadd (%p3046_p5), [#allocation13], 4294966528  ;;  %554 = vmatprep.mubr.bf16.mxu0 %v2516_v0  ;;  %1932 = vmatprep.subr.bf16.mxu1 %v2517_v1  ;;  %v2135_v4 = vld [vmem:[#allocation6 + $0x1c] ss:$12 sps:$4 sm:$0xff]   ;;  %v2137_v5 = vld [vmem:[#allocation6 + $0x18] ss:$12 sps:$4 sm:$0xff]  }
  0xbd   : > { %522 = vmatprep.subr.bf16.mxu0 %v2132_v2  ;;  %v2138_v6 = vld [vmem:[#allocation6 + $0x34] ss:$12 sps:$4 sm:$0xff]   ;;  %v2140_v7 = vld [vmem:[#allocation6 + $0x30] ss:$12 sps:$4 sm:$0xff]   ;;  %v2141_v8 = vld [vmem:[#allocation6 + $0x4c] ss:$12 sps:$4 sm:$0xff]  }
  0xbe   : > { %523 = vmatpush1.bf16.msra.mxu0 %v2134_v3  ;;  %v2143_v9 = vld [vmem:[#allocation6 + $0x48] ss:$12 sps:$4 sm:$0xff]   ;;  %v2144_v10 = vld [vmem:[#allocation6 + $0x64] ss:$12 sps:$4 sm:$0xff]   ;;  %v2157_v12 = vld [vmem:[#allocation6 + $0x20] ss:$12 sps:$4 sm:$0xff]  }
  0xbf   : > { %524 = vmatprep.subr.bf16.mxu0 %v2135_v4  ;;  %v2156_v11 = vld [vmem:[#allocation6 + $0x8] ss:$12 sps:$4 sm:$0xff]   ;;  %v2146_v13 = vld [vmem:[#allocation6 + $0x60] ss:$12 sps:$4 sm:$0xff]   ;;  %v2149_v15 = vld [vmem:[#allocation6 + $0x78] ss:$12 sps:$4 sm:$0xff]  }
  0xc0   : > { %1933 = vmatpush3.bf16.msra.mxu1 %v2156_v11  ;;  %v2147_v14 = vld [vmem:[#allocation6 + $0x7c] ss:$12 sps:$4 sm:$0xff]   ;;  %v2150_v16 = vld [vmem:[#allocation6 + $0x94] ss:$12 sps:$4 sm:$0xff]   ;;  %v2158_v17 = vld [vmem:[#allocation6 + $0x38] ss:$12 sps:$4 sm:$0xff]  }
  0xc1   : > { %1934 = vmatprep.subr.bf16.mxu1 %v2517_v1  ;;  %v2159_v18 = vld [vmem:[#allocation6 + $0x50] ss:$12 sps:$4 sm:$0xff]   ;;  %v2153_v20 = vld [vmem:[#allocation6 + $0xac] ss:$12 sps:$4 sm:$0xff]   ;;  %v2160_v21 = vld [vmem:[#allocation6 + $0x68] ss:$12 sps:$4 sm:$0xff]  }
  0xc2   : > { %525 = vmatpush1.bf16.msra.mxu0 %v2137_v5  ;;  %v2152_v19 = vld [vmem:[#allocation6 + $0x90] ss:$12 sps:$4 sm:$0xff]   ;;  %v2155_v22 = vld [vmem:[#allocation6 + $0xa8] ss:$12 sps:$4 sm:$0xff]   ;;  %v2161_v25 = vld [vmem:[#allocation6 + $0x80] ss:$12 sps:$4 sm:$0xff]  }
  0xc3   : > { %526 = vmatprep.subr.bf16.mxu0 %v2138_v6  ;;  %v2820_v23 = vld [vmem:[%s2796_s18] sm:$0xff]  ;;  %v2823_v24 = vld [vmem:[%s2796_s18 + $0x8] sm:$0xff]  ;;  %vm2518_vm0 = vmmov 0   ;;  %v2839_v30 = vshrl.u32 %v382_v29, 7  ;;  %vm609_vm1 = vcmask 261120   ;;  %s2519_s28 = smov 96  }
  0xc4   : > { %1935 = vmatpush3.bf16.msra.mxu1 %v2157_v12  ;;  %v346_v26 = vpack.c.bf16 %v2823_v24, %v2820_v23  ;;  %v2162_v27 = vld [vmem:[#allocation6 + $0x98] ss:$12 sps:$4 sm:$0xff]   ;;  %v2163_v28 = vld [vmem:[#allocation6 + $0xb0] ss:$12 sps:$4 sm:$0xff]   ;;  %1948 = vmatprep.mubr.msk.bf16.mxu1 %vm2518_vm0, %v2517_v1  ;;  %v2844_v33 = vld [vmem:[#allocation12 + $0x8] sm:$0xff]  ;;  %s2520_s7 = smov 64  }
  0xc5   : > { %1936 = vmatprep.subr.bf16.mxu1 %v2517_v1  ;;  %v384_v31 = vsub.s32 0, %v2839_v30  ;;  %v2842_v32 = vld [vmem:[#allocation12] sm:$0xff]  ;;  %s2521_s13 = smov 32   ;;  %v349_v47 = vld [vmem:[#allocation12 + $0x10] sm:$0xff]  ;;  %vm657_vm2 = vcmask 130048   ;;  %vm856_vm3 = vcmask 523520  }
  0xc6   : > { %527 = vmatpush1.bf16.msra.mxu0 %v2140_v7  ;;  %vm984_vm4 = vcmask 785920   ;;  %vm1112_vm5 = vcmask 1048320   ;;  %s1787_s15 = sshll.u32 %s2792_s29, 3  ;;  %s1870_s16 = sshll.u32 %s2580_s27, 7 }
  0xc7   : > { %528 = vmatprep.subr.bf16.mxu0 %v2141_v8  ;;  %v385_v34 = vrot.slane %v2842_v32, %v384_v31  ;;  %v389_v36 = vrot.slane %v2844_v33, %v384_v31  ;;  %v393_v48 = vrot.slane %v349_v47, %v384_v31  ;;  %s342_s25 = scalar_lea.vmem [#allocation14], %s1787_s15  ;;  %s2970_s14 = scalar_lea.hbm %s3024_s6, %s1870_s16 }
  0xc8   : > { %1937 = vmatpush3.bf16.msra.mxu1 %v2158_v17  ;;  %s1648_s12 = sshll.u32 %s342_s25, 4  ;;  %s1635_s19 = scalar_lea.sflag [#allocation5], %s2792_s29  ;;  %s2972_s12 = int_to_ptr.vmem [resolvable:$true] %s1648_s12 }
  0xc9   : > { %1938 = vmatprep.subr.bf16.mxu1 %v2517_v1  ;;  %s2422_s10 = scalar_lea.vmem %s2972_s12, 128  ;;  %p3047_p7 = scmp.ne.s32.totalorder %s3035_s8, 0 }
  0xca   : > { %529 = vmatpush1.bf16.msra.mxu0 %v2143_v9  ;;  %p2423_p2 = scmp.ne.s32.totalorder %s2972_s12, %s2422_s10  ;;  %s2522_s27 = smov [#allocation14]  }
  0xcb   : > { %530 = vmatprep.subr.bf16.mxu0 %v2144_v10  ;;  %s2426_s11 = sshll.u32 %s2522_s27, 4  ;;  %s2427_s11 = int_to_ptr.vmem [resolvable:$false] %s2426_s11 }
  0xcc   : > { %1939 = vmatpush3.bf16.msra.mxu1 %v2159_v18  ;;  %p2424_p10 = pnand %p2423_p2, %p3047_p7  ;;  %s2428_s18 = scalar_lea.vmem %s2427_s11, 256 }
  0xcd   : > { %1940 = vmatprep.subr.bf16.mxu1 %v2517_v1  ;;  %p2429_p11 = scmp.lt.s32.totalorder %s2972_s12, %s2427_s11  ;;  %p2430_p12 = scmp.lt.s32.totalorder %s2428_s18, %s2422_s10 }
  0xce   : > { %531 = vmatpush1.bf16.msra.mxu0 %v2146_v13  ;;  %p2425_p1 = pneg %p2424_p10 }
  0xcf   : > { %532 = vmatprep.subr.bf16.mxu0 %v2147_v14  ;;  %p2431_p13 = por %p2430_p12, %p2429_p11 }
  0xd0   : > { %1941 = vmatpush3.bf16.msra.mxu1 %v2160_v21 }
  0xd1   : > { %1942 = vmatprep.subr.bf16.mxu1 %v2517_v1  ;;  %p2432_p8 = pnand %p2431_p13, %p2425_p1 }
  0xd2   : > { %533 = vmatpush1.bf16.msra.mxu0 %v2149_v15 }
  0xd3   : > { %534 = vmatprep.subr.bf16.mxu0 %v2150_v16 }
  0xd4   : > { %1943 = vmatpush3.bf16.msra.mxu1 %v2161_v25 }
  0xd5   : > { %1944 = vmatprep.subr.bf16.mxu1 %v2517_v1 }
  0xd6   : > { %535 = vmatpush1.bf16.msra.mxu0 %v2152_v19 }
  0xd7   : > { %536 = vmatprep.subr.bf16.mxu0 %v2153_v20 }
  0xd8   : > { %1945 = vmatpush3.bf16.msra.mxu1 %v2162_v27 }
  0xd9   : > { %1946 = vmatprep.subr.bf16.mxu1 %v2517_v1 }
  0xda   : > { %537 = vmatpush1.bf16.msra.mxu0 %v2155_v22 }
  0xdb   : > { %1976 = vmatprep.subr.bf16.mxu0 %v2517_v1 }
  0xdc   : > { %1947 = vmatpush3.bf16.msra.mxu1 %v2163_v28 }
  0xdd   : > { %555 = vmatmul.mubr.bf16.vlgmr.msra.gmra.mrb[0].mxu0 %v346_v26  ;;  %1952 = vmatprep.subr.bf16.mxu1 %v2517_v1 }
  0xde   : > { %1978 = vmatprep.mubr.msk.bf16.mxu0 %vm2518_vm0, %v2517_v1 }
  0xdf   : > { %1949 = vmatmul.mubr.bf16.vlgmr.msra.gmra.mrb[0].mxu1 %v346_v26 }
  0xe0   : > { %1954 = vmatprep.mubr.msk.bf16.mxu1 %vm2518_vm0, %v2517_v1 }
 0x1b0   : > { %v556_v35 = vpop.f32.mrb[0].mxu0 }
 0x1b1   : > { %v558_v37 = vpop.f32.mrb[1].mxu0  ;;  %v557_v39 = vadd.f32 %v556_v35, %v385_v34 }
 0x1b2   : > { %v560_v38 = vpop.f32.mrb[2].mxu0  ;;  %v559_v42 = vadd.f32 %v558_v37, %v389_v36  ;;  %v599_v49 = vpop.f32.mrb[0].mxu1 }
 0x1b3   : > { %v561_v40 = vadd.f32 %v560_v38, %v385_v34  ;;  %v562_v41 = vpop.f32.mrb[3].mxu0  ;;  %v600_v50 = vadd.f32 %v599_v49, %v393_v48  ;;  %v1950_v51 = vpop.f32.mrb[1].mxu1 }
 0x1b4   : > { %v563_v43 = vadd.f32 %v562_v41, %v389_v36  ;;  %v602_v52 = vpop.f32.mrb[2].mxu1 }
 0x1b5   : > { %v606_v44 = vpack.c.bf16 %v561_v40, %v557_v39  ;;  %v603_v53 = vadd.f32 %v602_v52, %v393_v48  ;;  %v1951_v54 = vpop.f32.mrb[3].mxu1 }
 0x1b6   : > { %v607_v45 = vpack.c.bf16 %v563_v43, %v559_v42 }
 0x1b7   : > { %v2858_v55 = vpack.c.bf16 %v603_v53, %v600_v50 }
 0x1b8   : > { %731 = vrot.lane.b32.xlu1 %v607_v45, %s2519_s28  ;;  %v614_v46 = vsel %vm609_vm1, %v607_v45, 0 }
 0x1b9   : > { %1953 = vmatpush3.bf16.xpose.msra.mxu1 %v614_v46 }
 0x1ba   : > { %1958 = vmatprep.subr.bf16.mxu1 %v2517_v1 }
 0x1bc   : > { %728 = vrot.lane.b32.xlu1 %v606_v44, %s2519_s28 }
 0x1c0   : > { %858 = vrot.lane.b32.xlu1 %v606_v44, %s2520_s7  ;;  %1955 = vmatmul.mubr.msk.bf16.vlgmr.msra.gmra.mrb[4].mxu1 %vm609_vm1, %v606_v44 }
 0x1c1   : > { %1960 = vmatprep.mubr.msk.bf16.mxu1 %vm2518_vm0, %v2517_v1  ;;  %1959 = vmatpush3.bf16.msra.mxu1 %v2858_v55 }
 0x1c2   : > { %1964 = vmatprep.subr.bf16.mxu1 %v2517_v1 }
 0x1c4   : > { %988 = vrot.lane.b32.xlu1 %v607_v45, %s2521_s13 }
 0x1c8   : > { %986 = vrot.lane.b32.xlu1 %v606_v44, %s2521_s13 }
 0x22a   : > { %v732_v62 = vpop.permute.xlu1 %731 }
 0x22b   : > { %v737_v16 = vsel %vm609_vm1, %v732_v62, 0 }
 0x22e   : > { %v729_v3 = vpop.permute.xlu1 %728 }
 0x232   : > { %v859_v8 = vpop.permute.xlu1 %858 }
 0x236   : > { %v989_v11 = vpop.permute.xlu1 %988 }
 0x237   : > { %v994_v12 = vsel %vm609_vm1, %v989_v11, 0 }
 0x23a   : > { %v987_v17 = vpop.permute.xlu1 %986 }
 0x293   : > { %v650_v56 = vpop.f32.mrb[4].mxu1 }
 0x294   : > { %v1956_v57 = vpop.f32.mrb[5].mxu1  ;;  %v658_v58 = vsel %vm657_vm2, %v650_v56, -inf }
 0x295   : > { %659 = vmax.xlane.f32.xlu0 %v658_v58  ;;  %v653_v59 = vpop.f32.mrb[6].mxu1 }
 0x296   : > { %v1957_v60 = vpop.f32.mrb[7].mxu1  ;;  %v661_v61 = vsel %vm657_vm2, %v653_v59, -inf }
 0x299   : > { %662 = vmax.xlane.f32.xlu0 %v661_v61 }
 0x2af   : > { %860 = vrot.lane.b32.xlu0 %v607_v45, %s2520_s7 }
 0x322   : > { %v660_v63 = vpop.xlane.xlu0 %659 }
 0x323   : > { %v664_v2 = vsub.f32 %v650_v56, %v660_v63 }
 0x325   : > { %v666_v4 = vmul.f32 1.442695, %v664_v2 }
 0x326   : > { %v663_v5 = vpop.xlane.xlu0 %662 }
 0x327   : > { %v665_v6 = vsub.f32 %v653_v59, %v663_v5  ;;  %2212 = vpow2.f32 %v666_v4 }
 0x329   : > { %v668_v7 = vmul.f32 1.442695, %v665_v6 }
 0x32a   : > { %v861_v9 = vpop.permute.xlu0 %860 }
 0x32b   : > { %2214 = vpow2.f32 %v668_v7  ;;  %v866_v10 = vsel %vm609_vm1, %v861_v9, 0 }
 0x32c   : > { %1977 = vmatpush3.bf16.xpose.msra.mxu0 %v866_v10 }
 0x32d   : > { %1988 = vmatprep.subr.bf16.mxu0 %v2517_v1 }
 0x331   : > { %v2869_v13 = vpop.eup %2212 }
 0x333   : > { %1979 = vmatmul.mubr.msk.bf16.vlgmr.msra.gmra.mrb[4].mxu0 %vm609_vm1, %v859_v8 }
 0x334   : > { %1989 = vmatpush3.bf16.xpose.msra.mxu0 %v994_v12  ;;  %1990 = vmatprep.mubr.msk.bf16.mxu0 %vm2518_vm0, %v2517_v1 }
 0x335   : > { %v2873_v14 = vpop.eup %2214  ;;  %2000 = vmatprep.subr.bf16.mxu0 %v2517_v1 }
 0x336   : > { %v676_v15 = vpack.c.bf16 %v2873_v14, %v2869_v13 }
 0x338   : > { %1961 = vmatmul.mubr.msk.bf16.vlgmr.msra.gmra.mrb[8].mxu1 %vm657_vm2, %v676_v15 }
 0x339   : > { %1965 = vmatpush3.bf16.xpose.msra.mxu1 %v737_v16  ;;  %1966 = vmatprep.mubr.msk.bf16.mxu1 %vm2518_vm0, %v2517_v1 }
 0x33a   : > { %1970 = vmatprep.subr.bf16.mxu1 %v2517_v1 }
 0x33b   : > { %1991 = vmatmul.mubr.msk.bf16.vlgmr.msra.gmra.mrb[8].mxu0 %vm609_vm1, %v987_v17 }
 0x33c   : > { %2016 = vmatprep.mubr.msk.bf16.mxu0 %vm2518_vm0, %v2517_v1 }
 0x340   : > { %1967 = vmatmul.mubr.msk.bf16.vlgmr.msra.gmra.mrb[12].mxu1 %vm609_vm1, %v729_v3 }
 0x341   : > { %1972 = vmatprep.mubr.msk.bf16.mxu1 %vm2518_vm0, %v2517_v1 }
 0x406   : > { %v902_v18 = vpop.f32.mrb[4].mxu0 }
 0x407   : > { %v1980_v19 = vpop.f32.mrb[5].mxu0  ;;  %v909_v20 = vsel %vm657_vm2, %v902_v18, -inf }
 0x408   : > { %910 = vmax.xlane.f32.xlu1 %v909_v20  ;;  %v905_v21 = vpop.f32.mrb[6].mxu0  ;;  %v673_v20 = vsel %vm657_vm2, %v2873_v14, 0.0 }
 0x409   : > { %v1981_v22 = vpop.f32.mrb[7].mxu0  ;;  %v912_v26 = vsel %vm657_vm2, %v905_v21, -inf }
 0x40b   : > { %v2890_v25 = vpop.f32.mrb[8].mxu1 }
 0x40c   : > { %913 = vmax.xlane.f32.xlu1 %v912_v26  ;;  %v1962_v27 = vpop.f32.mrb[9].mxu1  ;;  %v2164_v26 = vld [vmem:[#allocation8] sm:$0xff]  }
 0x40d   : > { %v2893_v28 = vpop.f32.mrb[10].mxu1  ;;  %2001 = vmatpush3.bf16.msra.mxu0 %v2164_v26  ;;  %v2165_v27 = vld [vmem:[#allocation8 + $0x8] sm:$0xff]  }
 0x40e   : > { %v1963_v29 = vpop.f32.mrb[11].mxu1  ;;  %v1030_v31 = vpop.f32.mrb[8].mxu0  ;;  %2002 = vmatprep.subr.bf16.mxu0 %v2517_v1 }
 0x40f   : > { %v1992_v34 = vpop.f32.mrb[9].mxu0  ;;  %v1037_v35 = vsel %vm657_vm2, %v1030_v31, -inf }
 0x410   : > { %1038 = vmax.xlane.f32.xlu0 %v1037_v35  ;;  %v1033_v36 = vpop.f32.mrb[10].mxu0 }
 0x411   : > { %v1993_v37 = vpop.f32.mrb[11].mxu0  ;;  %v1040_v38 = vsel %vm657_vm2, %v1033_v36, -inf  ;;  %2003 = vmatpush3.bf16.msra.mxu0 %v2165_v27 }
 0x412   : > { %1041 = vmax.xlane.f32.xlu1 %v1040_v38  ;;  %2004 = vmatprep.subr.bf16.mxu0 %v2517_v1 }
 0x413   : > { %v773_v39 = vpop.f32.mrb[12].mxu1 }
 0x414   : > { %v1968_v40 = vpop.f32.mrb[13].mxu1  ;;  %v780_v41 = vsel %vm657_vm2, %v773_v39, -inf }
 0x415   : > { %v776_v42 = vpop.f32.mrb[14].mxu1 }
 0x416   : > { %781 = vmax.xlane.f32.xlu1 %v780_v41  ;;  %v1969_v43 = vpop.f32.mrb[15].mxu1  ;;  %v783_v44 = vsel %vm657_vm2, %v776_v42, -inf }
 0x417   : > { %784 = vmax.xlane.f32.xlu0 %v783_v44  ;;  %v2167_v43 = vld [vmem:[#allocation8 + $0x18] sm:$0xff]  }
 0x427   : > { %928 = vrot.lane.b32.xlu1 %v2858_v55, %s2520_s7 }
 0x42b   : > { %1056 = vrot.lane.b32.xlu1 %v2858_v55, %s2521_s13 }
 0x42d   : > { %800 = vrot.lane.b32.xlu0 %v2858_v55, %s2519_s28 }
 0x495   : > { %v911_v45 = vpop.xlane.xlu1 %910 }
 0x496   : > { %v915_v46 = vsub.f32 %v902_v18, %v911_v45 }
 0x498   : > { %v917_v47 = vmul.f32 1.442695, %v915_v46 }
 0x499   : > { %v914_v48 = vpop.xlane.xlu1 %913 }
 0x49a   : > { %2216 = vpow2.f32 %v917_v47  ;;  %v916_v49 = vsub.f32 %v905_v21, %v914_v48  ;;  %v670_v21 = vsel %vm657_vm2, %v2869_v13, 0.0  ;;  %v2168_v47 = vld [vmem:[#allocation8 + $0x20] sm:$0xff]  }
 0x49c   : > { %v919_v50 = vmul.f32 1.442695, %v916_v49 }
 0x49d   : > { %v1039_v51 = vpop.xlane.xlu0 %1038 }
 0x49e   : > { %2218 = vpow2.f32 %v919_v50  ;;  %v1043_v52 = vsub.f32 %v1030_v31, %v1039_v51  ;;  %v2169_v51 = vld [vmem:[#allocation8 + $0x28] sm:$0xff]  }
 0x49f   : > { %v1042_v53 = vpop.xlane.xlu1 %1041 }
 0x4a0   : > { %v1045_v54 = vmul.f32 1.442695, %v1043_v52  ;;  %v1044_v56 = vsub.f32 %v1033_v36, %v1042_v53 }
 0x4a2   : > { %v1047_v57 = vmul.f32 1.442695, %v1044_v56  ;;  %2220 = vpow2.f32 %v1045_v54 }
 0x4a3   : > { %v782_v58 = vpop.xlane.xlu1 %781 }
 0x4a4   : > { %v2217_v59 = vpop.eup %2216  ;;  %2222 = vpow2.f32 %v1047_v57  ;;  %v786_v60 = vsub.f32 %v773_v39, %v782_v58  ;;  %v785_v55 = vpop.xlane.xlu0 %784 }
 0x4a5   : > { %v787_v61 = vsub.f32 %v776_v42, %v785_v55  ;;  %v921_v62 = vsel %vm657_vm2, %v2217_v59, 0.0  ;;  %v2166_v42 = vld [vmem:[#allocation8 + $0x10] sm:$0xff]  }
 0x4a6   : > { %v788_v63 = vmul.f32 1.442695, %v786_v60  ;;  %922 = vadd.xlane.f32.xlu0 %v921_v62  ;;  %2005 = vmatpush3.bf16.msra.mxu0 %v2166_v42  ;;  %v2170_v60 = vld [vmem:[#allocation8 + $0x30] sm:$0xff]   ;;  %v2171_v62 = vld [vmem:[#allocation8 + $0x38] sm:$0xff]  }
 0x4a7   : > { %v790_v2 = vmul.f32 1.442695, %v787_v61  ;;  %v929_v17 = vpop.permute.xlu1 %928  ;;  %2006 = vmatprep.subr.bf16.mxu0 %v2517_v1  ;;  %v2183_v42 = vld [vmem:[#allocation9 + $0x34] ss:$8 sps:$4 sm:$0xff]  }
 0x4a8   : > { %v2219_v3 = vpop.eup %2218  ;;  %2224 = vpow2.f32 %v788_v63  ;;  %v801_v4 = vpop.permute.xlu0 %800 }
 0x4a9   : > { %2226 = vpow2.f32 %v790_v2  ;;  %1971 = vmatpush3.bf16.msra.mxu1 %v801_v4  ;;  %v924_v5 = vsel %vm657_vm2, %v2219_v3, 0.0  ;;  %v927_v6 = vpack.c.bf16 %v2219_v3, %v2217_v59 }
 0x4aa   : > { %925 = vadd.xlane.f32.xlu0 %v924_v5  ;;  %1982 = vmatprep.subr.bf16.mxu1 %v2517_v1 }
 0x4ab   : > { %v1057_v22 = vpop.permute.xlu1 %1056  ;;  %2007 = vmatpush3.bf16.msra.mxu0 %v2167_v43  ;;  %v2181_v43 = vld [vmem:[#allocation9 + $0x30] ss:$8 sps:$4 sm:$0xff]  }
 0x4ac   : > { %v2221_v7 = vpop.eup %2220  ;;  %2008 = vmatprep.subr.bf16.mxu0 %v2517_v1 }
 0x4ad   : > { %v1049_v19 = vsel %vm657_vm2, %v2221_v7, 0.0 }
 0x4ae   : > { %v2223_v8 = vpop.eup %2222 }
 0x4af   : > { %v1055_v9 = vpack.c.bf16 %v2223_v8, %v2221_v7  ;;  %v1052_v18 = vsel %vm657_vm2, %v2223_v8, 0.0  ;;  %2009 = vmatpush3.bf16.msra.mxu0 %v2168_v47  ;;  %v2190_v47 = vld [vmem:[#allocation9 + $0x60] ss:$8 sps:$4 sm:$0xff]  }
 0x4b0   : > { %2010 = vmatprep.subr.bf16.mxu0 %v2517_v1 }
 0x4b2   : > { %v2225_v10 = vpop.eup %2224 }
 0x4b3   : > { %v2227_v11 = vpop.eup %2226  ;;  %v792_v12 = vsel %vm657_vm2, %v2225_v10, 0.0  ;;  %2011 = vmatpush3.bf16.msra.mxu0 %v2169_v51  ;;  %v2197_v51 = vld [vmem:[#allocation11] sm:$0xff]  }
 0x4b4   : > { %793 = vadd.xlane.f32.xlu0 %v792_v12  ;;  %v795_v15 = vsel %vm657_vm2, %v2227_v11, 0.0  ;;  %v798_v16 = vpack.c.bf16 %v2227_v11, %v2225_v10  ;;  %2012 = vmatprep.subr.bf16.mxu0 %v2517_v1 }
 0x4b5   : > { %796 = vadd.xlane.f32.xlu1 %v795_v15 }
 0x4b6   : > { %1973 = vmatmul.mubr.msk.bf16.vlgmr.msra.gmra.mrb[16].mxu1 %vm657_vm2, %v798_v16  ;;  %v1133_v16 = vsub.s32 1, %v2839_v30 }
 0x4b7   : > { %1983 = vmatpush3.bf16.msra.mxu1 %v929_v17  ;;  %1984 = vmatprep.mubr.msk.bf16.mxu1 %vm2518_vm0, %v2517_v1 }
 0x4b8   : > { %1053 = vadd.xlane.f32.xlu0 %v1052_v18  ;;  %1994 = vmatprep.subr.bf16.mxu1 %v2517_v1  ;;  %v1134_v17 = vrot.slane %v2842_v32, %v1133_v16 }
 0x4b9   : > { %1050 = vadd.xlane.f32.xlu1 %v1049_v19  ;;  %2013 = vmatpush3.bf16.msra.mxu0 %v2170_v60  ;;  %v2205_v60 = vld [vmem:[#allocation11 + $0x20] sm:$0xff]  }
 0x4ba   : > { %2014 = vmatprep.subr.bf16.mxu0 %v2517_v1 }
 0x4bc   : > { %674 = vadd.xlane.f32.xlu0 %v673_v20 }
 0x4bd   : > { %671 = vadd.xlane.f32.xlu1 %v670_v21  ;;  %2015 = vmatpush3.bf16.msra.mxu0 %v2171_v62 }
 0x4be   : > { %1985 = vmatmul.mubr.msk.bf16.vlgmr.msra.gmra.mrb[20].mxu1 %vm657_vm2, %v927_v6 }
 0x4bf   : > { %1995 = vmatpush3.bf16.msra.mxu1 %v1057_v22  ;;  %1996 = vmatprep.mubr.msk.bf16.mxu1 %vm2518_vm0, %v2517_v1 }
 0x4c6   : > { %1997 = vmatmul.mubr.msk.bf16.vlgmr.msra.gmra.mrb[24].mxu1 %vm657_vm2, %v1055_v9 }
 0x4c7   : > { %1398 = vmatprep.mubr.bf16.mxu1 %v2516_v0 }
 0x533   : > { %v923_v13 = vpop.xlane.xlu0 %922 }
 0x537   : > { %v926_v14 = vpop.xlane.xlu0 %925 }
 0x541   : > { %v794_v29 = vpop.xlane.xlu0 %793 }
 0x542   : > { %v797_v31 = vpop.xlane.xlu1 %796 }
 0x545   : > { %v1054_v34 = vpop.xlane.xlu0 %1053 }
 0x546   : > { %v1051_v35 = vpop.xlane.xlu1 %1050 }
 0x549   : > { %v675_v36 = vpop.xlane.xlu0 %674 }
 0x54a   : > { %2228 = vrcp.f32 %v675_v36  ;;  %v672_v37 = vpop.xlane.xlu1 %671 }
 0x54b   : > { %2230 = vrcp.f32 %v672_v37 }
 0x54c   : > { %2232 = vrcp.f32 %v794_v29  ;;  %v2174_v29 = vld [vmem:[#allocation9 + $0x4] ss:$8 sps:$4 sm:$0xff]  }
 0x54d   : > { %2234 = vrcp.f32 %v797_v31  ;;  %v2177_v31 = vld [vmem:[#allocation9 + $0x14] ss:$8 sps:$4 sm:$0xff]   ;;  %1366 = vmatprep.subr.bf16.mxu1 %v2174_v29 }
 0x54e   : > { %2236 = vrcp.f32 %v923_v13 }
 0x54f   : > { %2238 = vrcp.f32 %v926_v14  ;;  %v2172_v14 = vld [vmem:[#allocation9] ss:$8 sps:$4 sm:$0xff]  }
 0x550   : > { %2240 = vrcp.f32 %v1051_v35  ;;  %1367 = vmatpush1.bf16.msra.mxu1 %v2172_v14 }
 0x551   : > { %2242 = vrcp.f32 %v1054_v34  ;;  %v2175_v34 = vld [vmem:[#allocation9 + $0x10] ss:$8 sps:$4 sm:$0xff]   ;;  %1368 = vmatprep.subr.bf16.mxu1 %v2177_v31 }
 0x554   : > { %v2229_v38 = vpop.eup %2228  ;;  %1369 = vmatpush1.bf16.msra.mxu1 %v2175_v34 }
 0x555   : > { %v2231_v0 = vpop.eup %2230  ;;  %v724_v39 = vmul.f32 %v2229_v38, %v2893_v28 }
 0x556   : > { %v723_v40 = vmul.f32 %v2231_v0, %v2890_v25  ;;  %v2233_v45 = vpop.eup %2232 }
 0x557   : > { %v2235_v28 = vpop.eup %2234 }
 0x558   : > { %v725_v41 = vpack.c.bf16 %v724_v39, %v723_v40  ;;  %v2237_v53 = vpop.eup %2236  ;;  %v2180_v40 = vld [vmem:[#allocation9 + $0x24] ss:$8 sps:$4 sm:$0xff]  }
 0x559   : > { %v2239_v58 = vpop.eup %2238  ;;  %1370 = vmatprep.subr.bf16.mxu1 %v2180_v40 }
 0x55a   : > { %726 = vst.msk [vmem:[#allocation2] sm:$0xff] %vm609_vm1, %v725_v41  ;;  %v2241_v2 = vpop.eup %2240  ;;  %v2178_v41 = vld [vmem:[#allocation9 + $0x20] ss:$8 sps:$4 sm:$0xff]  }
 0x55b   : > { %v2243_v6 = vpop.eup %2242  ;;  %1371 = vmatpush1.bf16.msra.mxu1 %v2178_v41 }
 0x55c   : > { %1372 = vmatprep.subr.bf16.mxu1 %v2183_v42 }
 0x55f   : > { %1373 = vmatpush1.bf16.msra.mxu1 %v2181_v43  ;;  %v1449_v43 = vsub.s32 3, %v2839_v30 }
 0x589   : > { %v840_v44 = vpop.f32.mrb[16].mxu1 }
 0x58a   : > { %v1974_v46 = vpop.f32.mrb[17].mxu1  ;;  %v849_v48 = vmul.f32 %v2233_v45, %v840_v44  ;;  %v2186_v44 = vld [vmem:[#allocation9 + $0x44] ss:$8 sps:$4 sm:$0xff]   ;;  %v2184_v45 = vld [vmem:[#allocation9 + $0x40] ss:$8 sps:$4 sm:$0xff]  }
 0x58b   : > { %v843_v25 = vpop.f32.mrb[18].mxu1  ;;  %1374 = vmatprep.subr.bf16.mxu1 %v2186_v44  ;;  %v2189_v46 = vld [vmem:[#allocation9 + $0x54] ss:$8 sps:$4 sm:$0xff]  }
 0x58c   : > { %v850_v49 = vmul.f32 %v2235_v28, %v843_v25  ;;  %v1975_v50 = vpop.f32.mrb[19].mxu1  ;;  %1375 = vmatpush1.bf16.msra.mxu1 %v2184_v45  ;;  %v2187_v28 = vld [vmem:[#allocation9 + $0x50] ss:$8 sps:$4 sm:$0xff]   ;;  %v2192_v25 = vld [vmem:[#allocation9 + $0x64] ss:$8 sps:$4 sm:$0xff]  }
 0x58d   : > { %1376 = vmatprep.subr.bf16.mxu1 %v2189_v46  ;;  %v2196_v50 = vld [vmem:[#allocation11 + $0x40] sm:$0xff]  }
 0x58e   : > { %v851_v52 = vpack.c.bf16 %v850_v49, %v849_v48  ;;  %v2195_v48 = vld [vmem:[#allocation9 + $0x74] ss:$8 sps:$4 sm:$0xff]   ;;  %v2193_v49 = vld [vmem:[#allocation9 + $0x70] ss:$8 sps:$4 sm:$0xff]   ;;  %1910 = vmatprep.subr.bf16.mxu0 %v2196_v50 }
 0x590   : > { %853 = vrot.lane.b32.xlu1 %v851_v52, %s2521_s13  ;;  %1377 = vmatpush1.bf16.msra.mxu1 %v2187_v28  ;;  %v2198_v52 = vld [vmem:[#allocation11 + $0x48] sm:$0xff]  }
 0x591   : > { %v968_v54 = vpop.f32.mrb[20].mxu1  ;;  %1378 = vmatprep.subr.bf16.mxu1 %v2192_v25 }
 0x592   : > { %v977_v56 = vmul.f32 %v2237_v53, %v968_v54  ;;  %v1986_v57 = vpop.f32.mrb[21].mxu1  ;;  %v2199_v53 = vld [vmem:[#allocation11 + $0x8] sm:$0xff]   ;;  %v2200_v54 = vld [vmem:[#allocation11 + $0x50] sm:$0xff]  }
 0x593   : > { %v971_v59 = vpop.f32.mrb[22].mxu1  ;;  %v2202_v57 = vld [vmem:[#allocation11 + $0x58] sm:$0xff]  }
 0x594   : > { %v978_v55 = vmul.f32 %v2239_v58, %v971_v59  ;;  %v1987_v61 = vpop.f32.mrb[23].mxu1  ;;  %1379 = vmatpush1.bf16.msra.mxu1 %v2190_v47  ;;  %v2203_v58 = vld [vmem:[#allocation11 + $0x18] sm:$0xff]   ;;  %v2204_v59 = vld [vmem:[#allocation11 + $0x60] sm:$0xff]  }
 0x595   : > { %1380 = vmatprep.subr.bf16.mxu1 %v2195_v48 }
 0x596   : > { %v979_v63 = vpack.c.bf16 %v978_v55, %v977_v56  ;;  %v2201_v56 = vld [vmem:[#allocation11 + $0x10] sm:$0xff]   ;;  %v2206_v55 = vld [vmem:[#allocation11 + $0x68] sm:$0xff]  }
 0x598   : > { %981 = vrot.lane.b32.xlu0 %v979_v63, %s2520_s7  ;;  %1381 = vmatpush1.bf16.msra.mxu1 %v2193_v49 }
 0x599   : > { %v1096_v3 = vpop.f32.mrb[24].mxu1 }
 0x59a   : > { %v1105_v4 = vmul.f32 %v2241_v2, %v1096_v3  ;;  %v1998_v5 = vpop.f32.mrb[25].mxu1 }
 0x59b   : > { %v1099_v7 = vpop.f32.mrb[26].mxu1  ;;  %v1251_v5 = vsub.s32 4, %v2839_v30 }
 0x59c   : > { %v1106_v8 = vmul.f32 %v2243_v6, %v1099_v7  ;;  %v1999_v9 = vpop.f32.mrb[27].mxu1  ;;  %v1257_v7 = vsub.s32 5, %v2839_v30 }
 0x59d   : > { %v1252_v6 = vrot.slane %v2842_v32, %v1251_v5 }
 0x59e   : > { %v1107_v10 = vpack.c.bf16 %v1106_v8, %v1105_v4 }
 0x5a0   : > { %1109 = vrot.lane.b32.xlu1 %v1107_v10, %s2519_s28 }
 0x602   : > { %v854_v11 = vpop.permute.xlu1 %853 }
 0x603   : > { %857 = vst.msk [vmem:[#allocation2] sm:$0xff] %vm856_vm3, %v854_v11 }
 0x60a   : > { %v982_v12 = vpop.permute.xlu0 %981 }
 0x60b   : > { %985 = vst.msk [vmem:[#allocation2] sm:$0xff] %vm984_vm4, %v982_v12 }
 0x612   : > { %v1110_v1 = vpop.permute.xlu1 %1109 }
 0x613   : > { %1113 = vst.msk [vmem:[#allocation2] sm:$0xff] %vm1112_vm5, %v1110_v1  ;;  %v1258_v1 = vrot.slane %v2842_v32, %v1257_v7 }
 0x61a   : > { %v1114_v15 = vld [vmem:[#allocation2] sm:$0xff] }
 0x61b   : > { %2017 = vmatmul.mubr.bf16.vlgmr.msra.gmra.mrb[12].mxu0 %v1114_v15 }
 0x61c   : > { %1911 = vmatpush3.bf16.msra.mxu0 %v2197_v51 }
 0x61d   : > { %1912 = vmatprep.subr.bf16.mxu0 %v2198_v52 }
 0x620   : > { %1913 = vmatpush3.bf16.msra.mxu0 %v2199_v53 }
 0x621   : > { %1914 = vmatprep.subr.bf16.mxu0 %v2200_v54 }
 0x624   : > { %1915 = vmatpush3.bf16.msra.mxu0 %v2201_v56 }
 0x625   : > { %1916 = vmatprep.subr.bf16.mxu0 %v2202_v57 }
 0x628   : > { %1917 = vmatpush3.bf16.msra.mxu0 %v2203_v58 }
 0x629   : > { %1918 = vmatprep.subr.bf16.mxu0 %v2204_v59 }
 0x62c   : > { %1919 = vmatpush3.bf16.msra.mxu0 %v2205_v60 }
 0x62d   : > { %1920 = vmatprep.subr.bf16.mxu0 %v2206_v55 }
 0x6ee   : > { %v1217_v18 = vpop.f32.mrb[12].mxu0 }
 0x6ef   : > { %v1218_v19 = vadd.f32 %v1217_v18, %v1134_v17  ;;  %v2018_v20 = vpop.f32.mrb[13].mxu0 }
 0x6f0   : > { %v1220_v21 = vpop.f32.mrb[14].mxu0  ;;  %v2208_v20 = vld [vmem:[#allocation11 + $0x70] sm:$0xff]  }
 0x6f1   : > { %v1221_v22 = vadd.f32 %v1220_v21, %v1134_v17  ;;  %v2019_v26 = vpop.f32.mrb[15].mxu0  ;;  %v1224_v27 = vadd.f32 %v1218_v19, %v2820_v23  ;;  %v2207_v19 = vld [vmem:[#allocation11 + $0x28] sm:$0xff]   ;;  %v2209_v21 = vld [vmem:[#allocation11 + $0x30] sm:$0xff]  }
 0x6f2   : > { %1921 = vmatpush3.bf16.msra.mxu0 %v2207_v19  ;;  %v2211_v26 = vld [vmem:[#allocation11 + $0x38] sm:$0xff]  }
 0x6f3   : > { %1226 = vadd.xlane.f32.xlu1 %v1224_v27  ;;  %v1225_v13 = vadd.f32 %v1221_v22, %v2823_v24  ;;  %1922 = vmatprep.subr.bf16.mxu0 %v2208_v20  ;;  %v2210_v22 = vld [vmem:[#allocation11 + $0x78] sm:$0xff]  }
 0x6f5   : > { %1228 = vadd.xlane.f32.xlu0 %v1225_v13 }
 0x6f6   : > { %1923 = vmatpush3.bf16.msra.mxu0 %v2209_v21 }
 0x6f7   : > { %1924 = vmatprep.subr.bf16.mxu0 %v2210_v22 }
 0x6fa   : > { %1925 = vmatpush3.bf16.msra.mxu0 %v2211_v26 }
 0x780   : > { %v1227_v35 = vpop.xlane.xlu1 %1226 }
 0x781   : > { %v1231_v36 = vmul.f32 0.0078125, %v1227_v35 }
 0x782   : > { %v1229_v37 = vpop.xlane.xlu0 %1228 }
 0x783   : > { %v2942_v38 = vsub.f32 %v1224_v27, %v1231_v36  ;;  %v1232_v0 = vmul.f32 0.0078125, %v1229_v37  ;;  %v1280_v27 = vsub.s32 2, %v2839_v30 }
 0x785   : > { %v2944_v39 = vsub.f32 %v1225_v13, %v1232_v0  ;;  %v1235_v23 = vmul.f32 %v2942_v38, %v2942_v38  ;;  %v1281_v13 = vrot.slane %v2842_v32, %v1280_v27  ;;  %v1285_v14 = vrot.slane %v2844_v33, %v1280_v27 }
 0x786   : > { %v1450_v33 = vrot.slane %v2842_v32, %v1449_v43 }
 0x787   : > { %1237 = vadd.xlane.f32.xlu0 %v1235_v23  ;;  %v1236_v24 = vmul.f32 %v2944_v39, %v2944_v39 }
 0x789   : > { %1239 = vadd.xlane.f32.xlu1 %v1236_v24 }
 0x814   : > { %v1238_v61 = vpop.xlane.xlu0 %1237 }
 0x815   : > { %v1241_v62 = vmul.f32 0.0078125, %v1238_v61 }
 0x816   : > { %v1240_v63 = vpop.xlane.xlu1 %1239 }
 0x817   : > { %v1243_v2 = vadd.f32 1e-05, %v1241_v62  ;;  %v1242_v3 = vmul.f32 0.0078125, %v1240_v63 }
 0x819   : > { %2244 = vrsqrt.f32 %v1243_v2  ;;  %v1244_v4 = vadd.f32 1e-05, %v1242_v3 }
 0x81b   : > { %2246 = vrsqrt.f32 %v1244_v4  ;;  %v1614_v4 = vsub.s32 6, %v2839_v30 }
 0x81d   : > { %v1615_v5 = vrot.slane %v2842_v32, %v1614_v4 }
 0x823   : > { %v2245_v8 = vpop.eup %2244 }
 0x824   : > { %v1247_v9 = vmul.f32 %v2245_v8, %v2942_v38 }
 0x825   : > { %v2247_v10 = vpop.eup %2246 }
 0x826   : > { %v1248_v11 = vmul.f32 %v2247_v10, %v2944_v39  ;;  %v1253_v12 = vmul.f32 %v1252_v6, %v1247_v9 }
 0x828   : > { %v1254_v15 = vmul.f32 %v1252_v6, %v1248_v11  ;;  %v1259_v16 = vadd.f32 %v1258_v1, %v1253_v12  ;;  %v1620_v6 = vsub.s32 7, %v2839_v30 }
 0x82a   : > { %v1260_v17 = vadd.f32 %v1258_v1, %v1254_v15  ;;  %v1621_v10 = vrot.slane %v2842_v32, %v1620_v6 }
 0x82c   : > { %v1261_v18 = vpack.c.bf16 %v1260_v17, %v1259_v16 }
 0x82e   : > { %1399 = vmatmul.mubr.bf16.vlgmr.msra.gmra.mrb[28].mxu1 %v1261_v18 }
 0x901   : > { %v1400_v29 = vpop.f32.mrb[28].mxu1 }
 0x902   : > { %v1401_v31 = vadd.f32 %v1400_v29, %v1281_v13  ;;  %v1402_v34 = vpop.f32.mrb[29].mxu1 }
 0x903   : > { %v1403_v35 = vadd.f32 %v1402_v34, %v1285_v14  ;;  %v1404_v36 = vpop.f32.mrb[30].mxu1 }
 0x904   : > { %v1405_v37 = vadd.f32 %v1404_v36, %v1281_v13  ;;  %v1406_v38 = vpop.f32.mrb[31].mxu1  ;;  %v1409_v39 = vmax.f32 %v1401_v31, 0.0 }
 0x905   : > { %v1407_v0 = vadd.f32 %v1406_v38, %v1285_v14  ;;  %v1410_v24 = vmax.f32 %v1403_v35, 0.0 }
 0x906   : > { %v1411_v23 = vmax.f32 %v1405_v37, 0.0 }
 0x907   : > { %v1412_v40 = vmax.f32 %v1407_v0, 0.0 }
 0x908   : > { %v1413_v41 = vpack.c.bf16 %v1411_v23, %v1409_v39 }
 0x909   : > { %v1414_v42 = vpack.c.bf16 %v1412_v40, %v1410_v24 }
 0x90b   : > { %1579 = vmatprep.mubr.bf16.mxu0 %v1414_v42 }
 0x90c   : > { %1580 = vmatmul.mubr.bf16.vlgmr.msra.gmra.mrb[16].mxu0 %v1413_v41 }
 0x9df   : > { %v1926_v44 = vpop.f32.mrb[16].mxu0 }
 0x9e0   : > { %v1927_v45 = vpop.f32.mrb[17].mxu0 }
 0x9e1   : > { %v1928_v46 = vadd.f32 %v1927_v45, %v1926_v44  ;;  %v1929_v28 = vpop.f32.mrb[18].mxu0 }
 0x9e2   : > { %v1930_v25 = vpop.f32.mrb[19].mxu0 }
 0x9e3   : > { %v1582_v47 = vadd.f32 %v1928_v46, %v1450_v33  ;;  %v1931_v48 = vadd.f32 %v1930_v25, %v1929_v28 }
 0x9e5   : > { %v1585_v49 = vadd.f32 %v1931_v48, %v1450_v33  ;;  %v1588_v50 = vadd.f32 %v1582_v47, %v1259_v16 }
 0x9e7   : > { %1590 = vadd.xlane.f32.xlu0 %v1588_v50  ;;  %v1589_v51 = vadd.f32 %v1585_v49, %v1260_v17 }
 0x9e9   : > { %1592 = vadd.xlane.f32.xlu1 %v1589_v51 }
 0xa74   : > { %v1591_v52 = vpop.xlane.xlu0 %1590 }
 0xa75   : > { %v1594_v53 = vmul.f32 0.0078125, %v1591_v52 }
 0xa76   : > { %v1593_v54 = vpop.xlane.xlu1 %1592 }
 0xa77   : > { %v1596_v56 = vsub.f32 %v1588_v50, %v1594_v53  ;;  %v1595_v57 = vmul.f32 0.0078125, %v1593_v54 }
 0xa79   : > { %v1597_v58 = vsub.f32 %v1589_v51, %v1595_v57  ;;  %v1598_v59 = vmul.f32 %v1596_v56, %v1596_v56 }
 0xa7b   : > { %1600 = vadd.xlane.f32.xlu0 %v1598_v59  ;;  %v1599_v60 = vmul.f32 %v1597_v58, %v1597_v58 }
 0xa7d   : > { %1602 = vadd.xlane.f32.xlu1 %v1599_v60 }
 0xb08   : > { %v1601_v55 = vpop.xlane.xlu0 %1600 }
 0xb09   : > { %v1604_v61 = vmul.f32 0.0078125, %v1601_v55 }
 0xb0a   : > { %v1603_v62 = vpop.xlane.xlu1 %1602 }
 0xb0b   : > { %v1606_v63 = vadd.f32 1e-05, %v1604_v61  ;;  %v1605_v2 = vmul.f32 0.0078125, %v1603_v62 }
 0xb0d   : > { %2248 = vrsqrt.f32 %v1606_v63  ;;  %v1607_v3 = vadd.f32 1e-05, %v1605_v2 }
 0xb0f   : > { %2250 = vrsqrt.f32 %v1607_v3 }
 0xb17   : > { %v2249_v7 = vpop.eup %2248 }
 0xb18   : > { %v1610_v8 = vmul.f32 %v2249_v7, %v1596_v56 }
 0xb19   : > { %v2251_v9 = vpop.eup %2250 }
 0xb1a   : > { %v1616_v11 = vmul.f32 %v1615_v5, %v1610_v8  ;;  %v1611_v12 = vmul.f32 %v2251_v9, %v1597_v58 }
 0xb1c   : > { %v1617_v1 = vmul.f32 %v1615_v5, %v1611_v12  ;;  %v1622_v15 = vadd.f32 %v1621_v10, %v1616_v11 }
 0xb1e   : > { %v1623_v16 = vadd.f32 %v1621_v10, %v1617_v1 }
 0xb20   : > { %v1874_v30 = vpack.c.bf16 %v1623_v16, %v1622_v15 }
 0xb22   : > { %1875 = vst [vmem:[%s342_s25] sm:$0xff] %v1874_v30  }
 0xb23   : > { %2435 = shalt.err (!%p2432_p8)
}
 0xb24   : > { %s2436_s28 = scalar_lea.hbm %s2970_s14, 128  ;;  %s2440_s16 = scalar_lea.hbm %s3024_s6, 256 }
 0xb25   : > { %p2437_p6 = scmp.ne.s32.totalorder %s2970_s14, %s2436_s28  ;;  %p2441_p3 = scmp.lt.u32.totalorder %s2970_s14, %s3024_s6 }
 0xb26   : > { %p2442_p0 = scmp.lt.u32.totalorder %s2440_s16, %s2436_s28  ;;  %p2444_p2 = scmp.lt.u32.totalorder %s2436_s28, %s2970_s14 }
 0xb27   : > { %p2438_p9 = pnand %p2437_p6, %p3047_p7 }
 0xb28   : > { %p2443_p5 = por %p2442_p0, %p2441_p3 }
 0xb29   : > { %p2439_p4 = pneg %p2438_p9 }
 0xb2a   : > { %p2445_p10 = por %p2444_p2, %p2443_p5 }
 0xb2c   : > { %p2446_p1 = pnand %p2445_p10, %p2439_p4 }
 0xb2e   : > { %2449 = shalt.err (!%p2446_p1)
}
 0xb2f   : > { %s2523_s26 = smov 4  }
 0xb30   : > { %2042 = dma.vmem_to_hbm [thread:$0]  (%p3047_p7), %s2972_s12, 128, %s2970_s14, %s1635_s19, %s2520_s7, %s2520_s7, %s2523_s26  }
 0xb31 PF: > { %s1663_s10 = sand.u32 1, %s2488_s21   ;;  %p3048_p11 = scmp.ne.s32.totalorder %s3036_s20, 0 }
 0xb32   : > { %p3049_p12 = scmp.ge.s32.totalorder %s2500_s24, 2  ;;  %s1664_s27 = scalar_lea.sflag [#allocation5], %s1663_s10 }
 0xb34   : > { %p2065_p13 = pnand %p3049_p12, %p3048_p11 }
 0xb36   : > { %2483 = dma.done.wait (!%p2065_p13), %s1664_s27, 128  }
 0xb37   : > { %2485 = vsyncadd (!%p2065_p13), %s1664_s27, 4294967168  ;;  %p22_p8 = scmp.ge.s32.totalorder %s2716_s9, 4   ;;  %s3050_s21 = smov %s2492_s22 }
 0xb38   : > { %s3051_s22 = smov %s2496_s23  ;;  %s3052_s23 = smov %s2728_s17 }
 0xb39   : > { %s3053_s24 = smov %s2716_s9  ;;  %24 = sbr.rel (!%p22_p8) target bundleno = 8 (0x8), region = 109 }
 0xb40   :  { %1669 = vsyncpa [#allocation4], 1 }
 0xb41   :  { %1671 = vsyncpa [#allocation4 + $0x1], 1 }
 0xb42   :  { %1672 = vsyncpa [#allocation7], 1 }
 0xb43   :  { %1673 = vsyncpa [#allocation10], 1 }
 0xb44   :  { %1674 = vsyncpa [#allocation13], 1 }
 0xb45   :  { %1675 = vsyncpa [#allocation5], 1 }
 0xb46   :  { %1677 = vsyncpa [#allocation5 + $0x1], 1 }

</bundles_post_ra>
